<compile_context>
chip_gen: v6e
topology: v6e:2x2x1
jax: 0.10.0
libtpu: 0.0.40
codegen_flags: <defaults>
</compile_context>

<pallas_src>
import functools

import numpy as np
import jax
import jax.numpy as jnp
from jax.experimental import pallas as pl
from jax.experimental.pallas import tpu as pltpu


# Synthetic config (deterministic, in-script).  Real LithoBench loads .pt files;
# here kernels/scales are generated with jax.random instead.
CONFIG = dict(
    KernelNum=4,
    TargetDensity=0.225,
    PrintThresh=0.225,
    PrintSteepness=4.0,
    DoseMax=1.02,
    DoseMin=0.98,
    DoseNom=1.0,
)


def _round_up(x, m):
    return ((x + m - 1) // m) * m


def _corner_dft(n_full, half):
    """DFT rows restricted to frequencies {0..half} U {n-half..n-1}, zero-padded
    to a multiple of 8 rows.  F[a, x] = exp(-2*pi*i*freq[a]*x/n_full); the phase
    uses exact integer mod (host numpy) so large n_full keeps full precision."""
    nk = 2 * half + 1
    nk_pad = max(8, _round_up(nk, 8))
    freqs = np.concatenate(
        [np.arange(half + 1), np.arange(n_full - half, n_full)]).astype(np.int64)
    x = np.arange(n_full, dtype=np.int64)
    phase = (freqs[:, None] * x[None, :]) % n_full
    theta = 2.0 * np.pi * phase.astype(np.float64) / float(n_full)
    fr = np.zeros((nk_pad, n_full), np.float32)
    fi = np.zeros((nk_pad, n_full), np.float32)
    fr[:nk] = np.cos(theta).astype(np.float32)
    fi[:nk] = (-np.sin(theta)).astype(np.float32)
    return fr, fi, nk, nk_pad


def _pack_kernel(kern, scales, K, dose, H, W, nkr, nkr_pad, nkc, nkc_pad):
    """Reorder the compact frequency kernel into corner-frequency order (matching
    _kernelMult's four-quadrant layout), folding dose, the forward-FFT 1/(H*W)
    normalisation and sqrt(|scale_k|) into it.  Returns the packed complex kernel
    (K, nkr_pad, nkc_pad) and the per-k sign of scale (handled statically)."""
    kern = np.asarray(kern)[:K]
    scales = np.asarray(scales)[:K].astype(np.float64)
    knx, kny = kern.shape[-2:]
    knxh, knyh = knx // 2, kny // 2
    row_sel = np.concatenate([np.arange(knx - knxh - 1, knx), np.arange(knxh)])
    col_sel = np.concatenate([np.arange(kny - knyh - 1, kny), np.arange(knyh)])
    small = kern[:, row_sel][:, :, col_sel].astype(np.complex128)
    small = small * (np.sqrt(np.abs(scales))[:, None, None] * (dose / (H * W)))
    out = np.zeros((K, nkr_pad, nkc_pad), np.complex64)
    out[:, :nkr, :nkc] = small.astype(np.complex64)
    signs = np.where(scales >= 0.0, 1.0, -1.0)
    return out, signs


def _pick_row_tile(H, W, P, Q, K):
    """Largest row tile (divisor of H, multiple of 8) that keeps the per-step
    VMEM footprint bounded (targets ~46 MiB so it also fits v7x's 64 MiB)."""
    if H <= 256:
        return H
    budget = 46 << 20
    fixed = (2 * H * W                                   # resident mask (2 bufs)
             + (2 * K) * (2 * P) * (2 * W)               # Rbuf scratch
             + 2 * (2 * K * P * Q * 2 + 2 * P * H + W * 2 * Q + 3 * Q * 2 * W)) * 4
    cands = [t for t in (512, 256, 128, 64, 32, 16, 8) if t < H and H % t == 0]
    if not cands:
        return H
    for t in cands:
        per_tile = (6 * t * W + 2 * t * 2 * P + 6 * t * 2 * W) * 4
        if fixed + per_tile <= budget:
            return t
    return cands[-1]


# ----------------------------------------------------------------------------
# Pallas kernel.  Grid = (batch, row-tile).  At rt==0 the corner spectrum and
# the per-pair (16, 2W) stage-2 RHS matrices are built into scratch; every row
# tile then does one contraction-16 matmul per (dose-group, kernel) pair and
# writes all three printed tiles.  Complex arithmetic uses real/imag f32 planes.
# ----------------------------------------------------------------------------
def _litho_kernel(mask_ref,                    # VMEM (1, H, W) f32
                  kr_ref, ki_ref,              # VMEM (2K, P, Q) f32 (scaled kernels)
                  fb_ref,                      # VMEM (2P, H)  = [Fr_re; Fr_im]
                  fct_ref,                     # VMEM (W, 2Q)  = [Fc_re^T | Fc_im^T]
                  c1_ref, c2_ref, c3_ref,      # VMEM (Q, 2W)  conj(Fc) building blocks
                  frt_ref,                     # VMEM (TH, 2P) = [GrT_re | GrT_im] row tile
                  nom_ref, max_ref, min_ref,   # VMEM (1, TH, W) f32 each
                  rbuf_ref,                    # VMEM scratch (2K, 2P, 2W) f32
                  *, kernel_num, P, Q, W, steep, target, dose_ratio_sq, signs):
    n_pairs = 2 * kernel_num
    dot = functools.partial(jnp.dot,
                            preferred_element_type=jnp.float32,
                            precision=jax.lax.Precision.HIGHEST)

    # ------ once per batch element: corner spectrum + per-pair stage-2 RHS ----
    @pl.when(pl.program_id(1) == 0)
    def _build_rhs():
        m = mask_ref[0]                               # (H, W)
        a = dot(fb_ref[...], m)                       # (2P, W): rows [ar; ai]
        pq = dot(a, fct_ref[...])                     # (2P, 2Q)
        mfr = pq[:P, :Q] - pq[P:, Q:]                 # corner spectrum (P, Q)
        mfi = pq[:P, Q:] + pq[P:, :Q]
        for p in range(n_pairs):                      # small & static: unroll
            kr = kr_ref[p]                            # (P, Q)
            ki = ki_ref[p]
            tr = kr * mfr - ki * mfi                  # T = kern * Mf (tiny)
            ti = kr * mfi + ki * mfr
            # S = T @ conj(Fc):  top = [sr | si],  bot = [si | -sr]
            top = dot(tr, c1_ref[...]) + dot(ti, c2_ref[...])   # (P, 2W)
            bot = dot(tr, c3_ref[...]) + dot(ti, c1_ref[...])   # (P, 2W)
            rbuf_ref[p, :P, :] = top
            rbuf_ref[p, P:, :] = bot

    # ------ every row tile: one contraction-16 matmul per (group, k) pair ----
    fa = frt_ref[...]                                 # (TH, 2P)

    def pair_plane(p):
        xri = dot(fa, rbuf_ref[p])                    # (TH, 2W) = [xr | xi]
        sq = xri * xri
        return sq[:, :W] + sq[:, W:]                  # |X|^2 (sqrt(scale) folded in)

    # Focus group @ DoseNom -> printedNom, printedMax (exact dose^2 rescale).
    acc = None
    for p in range(kernel_num):
        pln = pair_plane(p)
        pln = pln if signs[p] >= 0.0 else -pln
        acc = pln if acc is None else acc + pln
    nom_ref[0] = jax.nn.sigmoid(steep * (acc - target))
    max_ref[0] = jax.nn.sigmoid(steep * (dose_ratio_sq * acc - target))

    # Defocus group @ DoseMin -> printedMin.
    acc = None
    for p in range(kernel_num, n_pairs):
        pln = pair_plane(p)
        pln = pln if signs[p] >= 0.0 else -pln
        acc = pln if acc is None else acc + pln
    min_ref[0] = jax.nn.sigmoid(steep * (acc - target))


# ----------------------------------------------------------------------------
# Wrapper: host-side parameter prep (corner reorder, stacked DFT operands,
# scale folding) + pallas_call with row-tiled grid.
# ----------------------------------------------------------------------------
def litho_sim(mask, kern_focus, scl_focus, kern_defocus, scl_defocus, cfg):
    B, H, W = mask.shape
    K = int(cfg["KernelNum"])
    knx, kny = kern_focus.shape[-2:]
    assert tuple(kern_defocus.shape[-2:]) == (knx, kny)
    knxh, knyh = knx // 2, kny // 2
    assert knx <= H and kny <= W, "kernel must fit inside the mask spectrum"

    mask = mask.astype(jnp.float32)

    # Corner-frequency DFT matrices (rows for H, cols for W).
    frr, fri, nkr, P = _corner_dft(H, knxh)
    fcr, fci, nkc, Q = _corner_dft(W, knyh)

    # Host-stacked operands (fewer, wider matmuls in-kernel).
    fb = np.concatenate([frr, fri], axis=0).astype(np.float32)          # (2P, H)
    frt = np.concatenate([np.ascontiguousarray(frr.T),
                          np.ascontiguousarray(fri.T)], axis=1).astype(np.float32)   # (H, 2P)
    fct = np.concatenate([np.ascontiguousarray(fcr.T),
                          np.ascontiguousarray(fci.T)], axis=1).astype(np.float32)   # (W, 2Q)
    c1 = np.concatenate([fcr, -fci], axis=1).astype(np.float32)         # (Q, 2W)
    c2 = np.concatenate([fci, fcr], axis=1).astype(np.float32)          # (Q, 2W)
    c3 = np.concatenate([-fci, -fcr], axis=1).astype(np.float32)        # (Q, 2W)

    dose_nom = float(cfg["DoseNom"])
    dose_max = float(cfg["DoseMax"])
    dose_min = float(cfg["DoseMin"])

    # Compact, reordered kernels with dose, 1/(H*W) and sqrt(|scale|) folded in.
    kf, sgn_f = _pack_kernel(kern_focus, scl_focus, K, dose_nom, H, W, nkr, P, nkc, Q)
    kd, sgn_d = _pack_kernel(kern_defocus, scl_defocus, K, dose_min, H, W, nkr, P, nkc, Q)
    k_all = np.concatenate([kf, kd], axis=0)                            # (2K, P, Q)
    kr_all = jnp.asarray(np.ascontiguousarray(k_all.real), jnp.float32)
    ki_all = jnp.asarray(np.ascontiguousarray(k_all.imag), jnp.float32)
    signs = tuple(float(s) for s in np.concatenate([sgn_f, sgn_d]))     # static

    TH = _pick_row_tile(H, W, P, Q, K)
    RT = H // TH

    kernel = functools.partial(
        _litho_kernel,
        kernel_num=K, P=P, Q=Q, W=W,
        steep=float(cfg["PrintSteepness"]),
        target=float(cfg["TargetDensity"]),
        dose_ratio_sq=float((dose_max / dose_nom) ** 2),
        signs=signs,
    )

    # VMEM budget: resident mask (2 bufs) + row-tiled outputs + constants +
    # Rbuf scratch + per-tile temporaries; clamp <=56 MiB so it is safe on v7x.
    fp = 4
    vmem_est = ((2 * H * W
                 + 6 * TH * W
                 + 2 * TH * 2 * P
                 + 2 * (2 * K * P * Q * 2 + 2 * P * H + W * 2 * Q + 3 * Q * 2 * W)
                 + (2 * K) * (2 * P) * (2 * W)
                 + 6 * TH * 2 * W) * fp + (4 << 20))
    vmem_limit = int(min(max(vmem_est, 16 << 20), 56 << 20))

    out_spec = pl.BlockSpec((1, TH, W), lambda b, rt: (b, rt, 0))

    outs = pl.pallas_call(
        kernel,
        out_shape=(jax.ShapeDtypeStruct((B, H, W), jnp.float32),) * 3,
        grid_spec=pltpu.PrefetchScalarGridSpec(
            num_scalar_prefetch=0,
            grid=(B, RT),
            in_specs=[
                pl.BlockSpec((1, H, W), lambda b, rt: (b, 0, 0)),       # mask (full plane)
                pl.BlockSpec((2 * K, P, Q), lambda b, rt: (0, 0, 0)),   # kernel real
                pl.BlockSpec((2 * K, P, Q), lambda b, rt: (0, 0, 0)),   # kernel imag
                pl.BlockSpec((2 * P, H), lambda b, rt: (0, 0)),         # fb
                pl.BlockSpec((W, 2 * Q), lambda b, rt: (0, 0)),         # fct
                pl.BlockSpec((Q, 2 * W), lambda b, rt: (0, 0)),         # c1
                pl.BlockSpec((Q, 2 * W), lambda b, rt: (0, 0)),         # c2
                pl.BlockSpec((Q, 2 * W), lambda b, rt: (0, 0)),         # c3
                pl.BlockSpec((TH, 2 * P), lambda b, rt: (rt, 0)),       # frt row tile
            ],
            out_specs=[out_spec, out_spec, out_spec],
            scratch_shapes=[pltpu.VMEM((2 * K, 2 * P, 2 * W), jnp.float32)],
        ),
        compiler_params=pltpu.CompilerParams(
            dimension_semantics=("parallel", "arbitrary"),
            vmem_limit_bytes=vmem_limit),
    )(mask, kr_all, ki_all,
      jnp.asarray(fb), jnp.asarray(fct),
      jnp.asarray(c1), jnp.asarray(c2), jnp.asarray(c3),
      jnp.asarray(frt))

    # (printedNom, printedMax, printedMin)
    return outs[0], outs[1], outs[2]


# ----------------------------------------------------------------------------
# Pure-JAX reference that mirrors the PyTorch code path (jnp.fft based).
# ----------------------------------------------------------------------------
def _ref_forward(mask, kern_focus, scl_focus, kern_defocus, scl_defocus, cfg):
    def one(dose, kern, scales):
        K = int(cfg["KernelNum"])
        cmask = (dose * mask).astype(jnp.complex64)
        cmask = jnp.expand_dims(cmask, axis=mask.ndim - 2)           # [B,1,H,W]
        mf = jnp.fft.fft2(cmask, norm="forward")
        knx, kny = kern.shape[-2:]
        knxh, knyh = knx // 2, kny // 2
        out = jnp.zeros((mask.shape[0], K, mask.shape[-2], mask.shape[-1]),
                        dtype=mf.dtype)
        out = out.at[:, :, :knxh + 1, :knyh + 1].set(
            mf[:, :, :knxh + 1, :knyh + 1] * kern[None, :K, -(knxh + 1):, -(knyh + 1):])
        out = out.at[:, :, :knxh + 1, -knyh:].set(
            mf[:, :, :knxh + 1, -knyh:] * kern[None, :K, -(knxh + 1):, :knyh])
        out = out.at[:, :, -knxh:, :knyh + 1].set(
            mf[:, :, -knxh:, :knyh + 1] * kern[None, :K, :knxh, -(knyh + 1):])
        out = out.at[:, :, -knxh:, -knyh:].set(
            mf[:, :, -knxh:, -knyh:] * kern[None, :K, :knxh, :knyh])
        tmp = jnp.fft.ifft2(out, norm="forward")
        scale = scales[:K][None, :, None, None]
        aerial = jnp.sum(scale * jnp.abs(tmp) ** 2, axis=1)
        return jax.nn.sigmoid(cfg["PrintSteepness"] * (aerial - cfg["TargetDensity"]))

    return (one(cfg["DoseNom"], kern_focus, scl_focus),
            one(cfg["DoseMax"], kern_focus, scl_focus),
            one(cfg["DoseMin"], kern_defocus, scl_defocus))


if __name__ == "__main__":
    key = jax.random.PRNGKey(0)
    B, H, W = 2, 16, 16
    K = CONFIG["KernelNum"]
    knx = kny = 7

    k1, k2, k3, k4, k5, k6 = jax.random.split(key, 6)
    mask = (jax.random.uniform(k1, (B, H, W)) > 0.5).astype(jnp.float32)
    kern_focus = ((jax.random.normal(k2, (K, knx, kny))
                   + 1j * jax.random.normal(k3, (K, knx, kny))) * 0.1
                  ).astype(jnp.complex64)
    kern_defocus = ((jax.random.normal(k4, (K, knx, kny))
                     + 1j * jax.random.normal(k5, (K, knx, kny))) * 0.1
                    ).astype(jnp.complex64)
    scl_focus = jax.random.uniform(k6, (K,), minval=0.5, maxval=1.5).astype(jnp.float32)
    scl_defocus = (scl_focus * 0.9).astype(jnp.float32)

    pn, px, pm = litho_sim(mask, kern_focus, scl_focus,
                           kern_defocus, scl_defocus, CONFIG)
    jax.block_until_ready((pn, px, pm))

    rn, rx, rm = _ref_forward(mask, kern_focus, scl_focus,
                              kern_defocus, scl_defocus, CONFIG)
    for got, want in ((pn, rn), (px, rx), (pm, rm)):
        np.testing.assert_allclose(np.asarray(got), np.asarray(want),
                                   rtol=1e-3, atol=1e-3)

    # TODO(synk): only the forward pass is implemented; the custom autograd
    # backward of _LithoSim is out of scope for this kernel.
    print("KERNEL_OK")
</pallas_src>

<mosaic_0001>
module attributes {stable_mosaic.version = 11 : i64} {
  func.func @_litho_kernel(%arg0: i32, %arg1: i32, %arg2: memref<1x16x16xf32, #tpu.memory_space<vmem>>, %arg3: memref<8x8x8xf32, #tpu.memory_space<vmem>>, %arg4: memref<8x8x8xf32, #tpu.memory_space<vmem>>, %arg5: memref<16x16xf32, #tpu.memory_space<vmem>>, %arg6: memref<16x16xf32, #tpu.memory_space<vmem>>, %arg7: memref<8x32xf32, #tpu.memory_space<vmem>>, %arg8: memref<8x32xf32, #tpu.memory_space<vmem>>, %arg9: memref<8x32xf32, #tpu.memory_space<vmem>>, %arg10: memref<16x16xf32, #tpu.memory_space<vmem>>, %arg11: memref<1x16x16xf32, #tpu.memory_space<vmem>>, %arg12: memref<1x16x16xf32, #tpu.memory_space<vmem>>, %arg13: memref<1x16x16xf32, #tpu.memory_space<vmem>>, %arg14: memref<8x16x32xf32, #tpu.memory_space<vmem>>) attributes {dimension_semantics = [#tpu.dimension_semantics<parallel>, #tpu.dimension_semantics<arbitrary>], iteration_bounds = array<i64: 2, 1>, scalar_prefetch = 0 : i64, scratch_operands = 1 : i64, tpu.core_type = #tpu.core_type<tc>, window_params = [{transform_indices = @transform_0, window_bounds = array<i64: 1, 16, 16>}, {pipeline_mode = #tpu.pipeline_mode<synchronous>, transform_indices = @transform_1, window_bounds = array<i64: 8, 8, 8>}, {pipeline_mode = #tpu.pipeline_mode<synchronous>, transform_indices = @transform_2, window_bounds = array<i64: 8, 8, 8>}, {pipeline_mode = #tpu.pipeline_mode<synchronous>, transform_indices = @transform_3, window_bounds = array<i64: 16, 16>}, {pipeline_mode = #tpu.pipeline_mode<synchronous>, transform_indices = @transform_4, window_bounds = array<i64: 16, 16>}, {pipeline_mode = #tpu.pipeline_mode<synchronous>, transform_indices = @transform_5, window_bounds = array<i64: 8, 32>}, {pipeline_mode = #tpu.pipeline_mode<synchronous>, transform_indices = @transform_6, window_bounds = array<i64: 8, 32>}, {pipeline_mode = #tpu.pipeline_mode<synchronous>, transform_indices = @transform_7, window_bounds = array<i64: 8, 32>}, {transform_indices = @transform_8, window_bounds = array<i64: 16, 16>}, {transform_indices = @transform_9, window_bounds = array<i64: 1, 16, 16>}, {transform_indices = @transform_10, window_bounds = array<i64: 1, 16, 16>}, {transform_indices = @transform_11, window_bounds = array<i64: 1, 16, 16>}]} {
    %c0_i32 = arith.constant 0 : i32
    %0 = arith.cmpi eq, %arg1, %c0_i32 : i32
    %1 = arith.extui %0 : i1 to i32
    %c0_i32_0 = arith.constant 0 : i32
    %2 = arith.cmpi ne, %1, %c0_i32_0 : i32
    scf.if %2 {
      %c0_45 = arith.constant 0 : index
      %c0_46 = arith.constant 0 : index
      %c0_47 = arith.constant 0 : index
      %104 = vector.load %arg2[%c0_45, %c0_46, %c0_47] : memref<1x16x16xf32, #tpu.memory_space<vmem>>, vector<1x16x16xf32>
      %105 = vector.shape_cast %104 : vector<1x16x16xf32> to vector<16x16xf32>
      %c0_48 = arith.constant 0 : index
      %c0_49 = arith.constant 0 : index
      %106 = vector.load %arg5[%c0_48, %c0_49] : memref<16x16xf32, #tpu.memory_space<vmem>>, vector<16x16xf32>
      %cst_50 = arith.constant dense<0.000000e+00> : vector<16x16xf32>
      %107 = tpu.matmul %106, %105, %cst_50 {dimension_numbers = #tpu.dot_dimension_numbers<[1], [0], [0], [1], [0, 0, 1, 1], [], []>, precision = #tpu.contract_precision<fp32>} : vector<16x16xf32>, vector<16x16xf32>, vector<16x16xf32> -> vector<16x16xf32>
      %c0_51 = arith.constant 0 : index
      %c0_52 = arith.constant 0 : index
      %108 = vector.load %arg6[%c0_51, %c0_52] : memref<16x16xf32, #tpu.memory_space<vmem>>, vector<16x16xf32>
      %cst_53 = arith.constant dense<0.000000e+00> : vector<16x16xf32>
      %109 = tpu.matmul %107, %108, %cst_53 {dimension_numbers = #tpu.dot_dimension_numbers<[1], [0], [0], [1], [0, 0, 1, 1], [], []>, precision = #tpu.contract_precision<fp32>} : vector<16x16xf32>, vector<16x16xf32>, vector<16x16xf32> -> vector<16x16xf32>
      %110 = vector.extract_strided_slice %109 {offsets = [0, 0], sizes = [8, 8], strides = [1, 1]} : vector<16x16xf32> to vector<8x8xf32>
      %111 = vector.extract_strided_slice %109 {offsets = [8, 8], sizes = [8, 8], strides = [1, 1]} : vector<16x16xf32> to vector<8x8xf32>
      %112 = arith.subf %110, %111 : vector<8x8xf32>
      %113 = vector.extract_strided_slice %109 {offsets = [0, 8], sizes = [8, 8], strides = [1, 1]} : vector<16x16xf32> to vector<8x8xf32>
      %114 = vector.extract_strided_slice %109 {offsets = [8, 0], sizes = [8, 8], strides = [1, 1]} : vector<16x16xf32> to vector<8x8xf32>
      %115 = arith.addf %113, %114 : vector<8x8xf32>
      %c0_54 = arith.constant 0 : index
      %c0_55 = arith.constant 0 : index
      %c0_56 = arith.constant 0 : index
      %116 = vector.load %arg3[%c0_54, %c0_55, %c0_56] : memref<8x8x8xf32, #tpu.memory_space<vmem>>, vector<1x8x8xf32>
      %117 = vector.shape_cast %116 : vector<1x8x8xf32> to vector<8x8xf32>
      %c0_57 = arith.constant 0 : index
      %c0_58 = arith.constant 0 : index
      %c0_59 = arith.constant 0 : index
      %118 = vector.load %arg4[%c0_57, %c0_58, %c0_59] : memref<8x8x8xf32, #tpu.memory_space<vmem>>, vector<1x8x8xf32>
      %119 = vector.shape_cast %118 : vector<1x8x8xf32> to vector<8x8xf32>
      %120 = arith.mulf %117, %112 : vector<8x8xf32>
      %121 = arith.mulf %119, %115 : vector<8x8xf32>
      %122 = arith.subf %120, %121 : vector<8x8xf32>
      %123 = arith.mulf %117, %115 : vector<8x8xf32>
      %124 = arith.mulf %119, %112 : vector<8x8xf32>
      %125 = arith.addf %123, %124 : vector<8x8xf32>
      %c0_60 = arith.constant 0 : index
      %c0_61 = arith.constant 0 : index
      %126 = vector.load %arg7[%c0_60, %c0_61] : memref<8x32xf32, #tpu.memory_space<vmem>>, vector<8x32xf32>
      %cst_62 = arith.constant dense<0.000000e+00> : vector<8x32xf32>
      %127 = tpu.matmul %122, %126, %cst_62 {dimension_numbers = #tpu.dot_dimension_numbers<[1], [0], [0], [1], [0, 0, 1, 1], [], []>, precision = #tpu.contract_precision<fp32>} : vector<8x8xf32>, vector<8x32xf32>, vector<8x32xf32> -> vector<8x32xf32>
      %c0_63 = arith.constant 0 : index
      %c0_64 = arith.constant 0 : index
      %128 = vector.load %arg8[%c0_63, %c0_64] : memref<8x32xf32, #tpu.memory_space<vmem>>, vector<8x32xf32>
      %cst_65 = arith.constant dense<0.000000e+00> : vector<8x32xf32>
      %129 = tpu.matmul %125, %128, %cst_65 {dimension_numbers = #tpu.dot_dimension_numbers<[1], [0], [0], [1], [0, 0, 1, 1], [], []>, precision = #tpu.contract_precision<fp32>} : vector<8x8xf32>, vector<8x32xf32>, vector<8x32xf32> -> vector<8x32xf32>
      %130 = arith.addf %127, %129 : vector<8x32xf32>
      %c0_66 = arith.constant 0 : index
      %c0_67 = arith.constant 0 : index
      %131 = vector.load %arg9[%c0_66, %c0_67] : memref<8x32xf32, #tpu.memory_space<vmem>>, vector<8x32xf32>
      %cst_68 = arith.constant dense<0.000000e+00> : vector<8x32xf32>
      %132 = tpu.matmul %122, %131, %cst_68 {dimension_numbers = #tpu.dot_dimension_numbers<[1], [0], [0], [1], [0, 0, 1, 1], [], []>, precision = #tpu.contract_precision<fp32>} : vector<8x8xf32>, vector<8x32xf32>, vector<8x32xf32> -> vector<8x32xf32>
      %c0_69 = arith.constant 0 : index
      %c0_70 = arith.constant 0 : index
      %133 = vector.load %arg7[%c0_69, %c0_70] : memref<8x32xf32, #tpu.memory_space<vmem>>, vector<8x32xf32>
      %cst_71 = arith.constant dense<0.000000e+00> : vector<8x32xf32>
      %134 = tpu.matmul %125, %133, %cst_71 {dimension_numbers = #tpu.dot_dimension_numbers<[1], [0], [0], [1], [0, 0, 1, 1], [], []>, precision = #tpu.contract_precision<fp32>} : vector<8x8xf32>, vector<8x32xf32>, vector<8x32xf32> -> vector<8x32xf32>
      %135 = arith.addf %132, %134 : vector<8x32xf32>
      %c0_72 = arith.constant 0 : index
      %c0_73 = arith.constant 0 : index
      %c0_74 = arith.constant 0 : index
      %136 = vector.load %arg14[%c0_72, %c0_73, %c0_74] : memref<8x16x32xf32, #tpu.memory_space<vmem>>, vector<1x8x32xf32>
      %137 = vector.shape_cast %136 : vector<1x8x32xf32> to vector<8x32xf32>
      %138 = vector.shape_cast %130 : vector<8x32xf32> to vector<1x8x32xf32>
      tpu.vector_store %arg14[%c0_72, %c0_73, %c0_74], %138 {strides = array<i32>} : memref<8x16x32xf32, #tpu.memory_space<vmem>>, vector<1x8x32xf32>,
      %c0_75 = arith.constant 0 : index
      %c8 = arith.constant 8 : index
      %c0_76 = arith.constant 0 : index
      %139 = vector.load %arg14[%c0_75, %c8, %c0_76] : memref<8x16x32xf32, #tpu.memory_space<vmem>>, vector<1x8x32xf32>
      %140 = vector.shape_cast %139 : vector<1x8x32xf32> to vector<8x32xf32>
      %141 = vector.shape_cast %135 : vector<8x32xf32> to vector<1x8x32xf32>
      tpu.vector_store %arg14[%c0_75, %c8, %c0_76], %141 {strides = array<i32>} : memref<8x16x32xf32, #tpu.memory_space<vmem>>, vector<1x8x32xf32>,
      %c1_77 = arith.constant 1 : index
      %c0_78 = arith.constant 0 : index
      %c0_79 = arith.constant 0 : index
      %142 = vector.load %arg3[%c1_77, %c0_78, %c0_79] : memref<8x8x8xf32, #tpu.memory_space<vmem>>, vector<1x8x8xf32>
      %143 = vector.shape_cast %142 : vector<1x8x8xf32> to vector<8x8xf32>
      %c1_80 = arith.constant 1 : index
      %c0_81 = arith.constant 0 : index
      %c0_82 = arith.constant 0 : index
      %144 = vector.load %arg4[%c1_80, %c0_81, %c0_82] : memref<8x8x8xf32, #tpu.memory_space<vmem>>, vector<1x8x8xf32>
      %145 = vector.shape_cast %144 : vector<1x8x8xf32> to vector<8x8xf32>
      %146 = arith.mulf %143, %112 : vector<8x8xf32>
      %147 = arith.mulf %145, %115 : vector<8x8xf32>
      %148 = arith.subf %146, %147 : vector<8x8xf32>
      %149 = arith.mulf %143, %115 : vector<8x8xf32>
      %150 = arith.mulf %145, %112 : vector<8x8xf32>
      %151 = arith.addf %149, %150 : vector<8x8xf32>
      %c0_83 = arith.constant 0 : index
      %c0_84 = arith.constant 0 : index
      %152 = vector.load %arg7[%c0_83, %c0_84] : memref<8x32xf32, #tpu.memory_space<vmem>>, vector<8x32xf32>
      %cst_85 = arith.constant dense<0.000000e+00> : vector<8x32xf32>
      %153 = tpu.matmul %148, %152, %cst_85 {dimension_numbers = #tpu.dot_dimension_numbers<[1], [0], [0], [1], [0, 0, 1, 1], [], []>, precision = #tpu.contract_precision<fp32>} : vector<8x8xf32>, vector<8x32xf32>, vector<8x32xf32> -> vector<8x32xf32>
      %c0_86 = arith.constant 0 : index
      %c0_87 = arith.constant 0 : index
      %154 = vector.load %arg8[%c0_86, %c0_87] : memref<8x32xf32, #tpu.memory_space<vmem>>, vector<8x32xf32>
      %cst_88 = arith.constant dense<0.000000e+00> : vector<8x32xf32>
      %155 = tpu.matmul %151, %154, %cst_88 {dimension_numbers = #tpu.dot_dimension_numbers<[1], [0], [0], [1], [0, 0, 1, 1], [], []>, precision = #tpu.contract_precision<fp32>} : vector<8x8xf32>, vector<8x32xf32>, vector<8x32xf32> -> vector<8x32xf32>
      %156 = arith.addf %153, %155 : vector<8x32xf32>
      %c0_89 = arith.constant 0 : index
      %c0_90 = arith.constant 0 : index
      %157 = vector.load %arg9[%c0_89, %c0_90] : memref<8x32xf32, #tpu.memory_space<vmem>>, vector<8x32xf32>
      %cst_91 = arith.constant dense<0.000000e+00> : vector<8x32xf32>
      %158 = tpu.matmul %148, %157, %cst_91 {dimension_numbers = #tpu.dot_dimension_numbers<[1], [0], [0], [1], [0, 0, 1, 1], [], []>, precision = #tpu.contract_precision<fp32>} : vector<8x8xf32>, vector<8x32xf32>, vector<8x32xf32> -> vector<8x32xf32>
      %c0_92 = arith.constant 0 : index
      %c0_93 = arith.constant 0 : index
      %159 = vector.load %arg7[%c0_92, %c0_93] : memref<8x32xf32, #tpu.memory_space<vmem>>, vector<8x32xf32>
      %cst_94 = arith.constant dense<0.000000e+00> : vector<8x32xf32>
      %160 = tpu.matmul %151, %159, %cst_94 {dimension_numbers = #tpu.dot_dimension_numbers<[1], [0], [0], [1], [0, 0, 1, 1], [], []>, precision = #tpu.contract_precision<fp32>} : vector<8x8xf32>, vector<8x32xf32>, vector<8x32xf32> -> vector<8x32xf32>
      %161 = arith.addf %158, %160 : vector<8x32xf32>
      %c1_95 = arith.constant 1 : index
      %c0_96 = arith.constant 0 : index
      %c0_97 = arith.constant 0 : index
      %162 = vector.load %arg14[%c1_95, %c0_96, %c0_97] : memref<8x16x32xf32, #tpu.memory_space<vmem>>, vector<1x8x32xf32>
      %163 = vector.shape_cast %162 : vector<1x8x32xf32> to vector<8x32xf32>
      %164 = vector.shape_cast %156 : vector<8x32xf32> to vector<1x8x32xf32>
      tpu.vector_store %arg14[%c1_95, %c0_96, %c0_97], %164 {strides = array<i32>} : memref<8x16x32xf32, #tpu.memory_space<vmem>>, vector<1x8x32xf32>,
      %c1_98 = arith.constant 1 : index
      %c8_99 = arith.constant 8 : index
      %c0_100 = arith.constant 0 : index
      %165 = vector.load %arg14[%c1_98, %c8_99, %c0_100] : memref<8x16x32xf32, #tpu.memory_space<vmem>>, vector<1x8x32xf32>
      %166 = vector.shape_cast %165 : vector<1x8x32xf32> to vector<8x32xf32>
      %167 = vector.shape_cast %161 : vector<8x32xf32> to vector<1x8x32xf32>
      tpu.vector_store %arg14[%c1_98, %c8_99, %c0_100], %167 {strides = array<i32>} : memref<8x16x32xf32, #tpu.memory_space<vmem>>, vector<1x8x32xf32>,
      %c2_101 = arith.constant 2 : index
      %c0_102 = arith.constant 0 : index
      %c0_103 = arith.constant 0 : index
      %168 = vector.load %arg3[%c2_101, %c0_102, %c0_103] : memref<8x8x8xf32, #tpu.memory_space<vmem>>, vector<1x8x8xf32>
      %169 = vector.shape_cast %168 : vector<1x8x8xf32> to vector<8x8xf32>
      %c2_104 = arith.constant 2 : index
      %c0_105 = arith.constant 0 : index
      %c0_106 = arith.constant 0 : index
      %170 = vector.load %arg4[%c2_104, %c0_105, %c0_106] : memref<8x8x8xf32, #tpu.memory_space<vmem>>, vector<1x8x8xf32>
      %171 = vector.shape_cast %170 : vector<1x8x8xf32> to vector<8x8xf32>
      %172 = arith.mulf %169, %112 : vector<8x8xf32>
      %173 = arith.mulf %171, %115 : vector<8x8xf32>
      %174 = arith.subf %172, %173 : vector<8x8xf32>
      %175 = arith.mulf %169, %115 : vector<8x8xf32>
      %176 = arith.mulf %171, %112 : vector<8x8xf32>
      %177 = arith.addf %175, %176 : vector<8x8xf32>
      %c0_107 = arith.constant 0 : index
      %c0_108 = arith.constant 0 : index
      %178 = vector.load %arg7[%c0_107, %c0_108] : memref<8x32xf32, #tpu.memory_space<vmem>>, vector<8x32xf32>
      %cst_109 = arith.constant dense<0.000000e+00> : vector<8x32xf32>
      %179 = tpu.matmul %174, %178, %cst_109 {dimension_numbers = #tpu.dot_dimension_numbers<[1], [0], [0], [1], [0, 0, 1, 1], [], []>, precision = #tpu.contract_precision<fp32>} : vector<8x8xf32>, vector<8x32xf32>, vector<8x32xf32> -> vector<8x32xf32>
      %c0_110 = arith.constant 0 : index
      %c0_111 = arith.constant 0 : index
      %180 = vector.load %arg8[%c0_110, %c0_111] : memref<8x32xf32, #tpu.memory_space<vmem>>, vector<8x32xf32>
      %cst_112 = arith.constant dense<0.000000e+00> : vector<8x32xf32>
      %181 = tpu.matmul %177, %180, %cst_112 {dimension_numbers = #tpu.dot_dimension_numbers<[1], [0], [0], [1], [0, 0, 1, 1], [], []>, precision = #tpu.contract_precision<fp32>} : vector<8x8xf32>, vector<8x32xf32>, vector<8x32xf32> -> vector<8x32xf32>
      %182 = arith.addf %179, %181 : vector<8x32xf32>
      %c0_113 = arith.constant 0 : index
      %c0_114 = arith.constant 0 : index
      %183 = vector.load %arg9[%c0_113, %c0_114] : memref<8x32xf32, #tpu.memory_space<vmem>>, vector<8x32xf32>
      %cst_115 = arith.constant dense<0.000000e+00> : vector<8x32xf32>
      %184 = tpu.matmul %174, %183, %cst_115 {dimension_numbers = #tpu.dot_dimension_numbers<[1], [0], [0], [1], [0, 0, 1, 1], [], []>, precision = #tpu.contract_precision<fp32>} : vector<8x8xf32>, vector<8x32xf32>, vector<8x32xf32> -> vector<8x32xf32>
      %c0_116 = arith.constant 0 : index
      %c0_117 = arith.constant 0 : index
      %185 = vector.load %arg7[%c0_116, %c0_117] : memref<8x32xf32, #tpu.memory_space<vmem>>, vector<8x32xf32>
      %cst_118 = arith.constant dense<0.000000e+00> : vector<8x32xf32>
      %186 = tpu.matmul %177, %185, %cst_118 {dimension_numbers = #tpu.dot_dimension_numbers<[1], [0], [0], [1], [0, 0, 1, 1], [], []>, precision = #tpu.contract_precision<fp32>} : vector<8x8xf32>, vector<8x32xf32>, vector<8x32xf32> -> vector<8x32xf32>
      %187 = arith.addf %184, %186 : vector<8x32xf32>
      %c2_119 = arith.constant 2 : index
      %c0_120 = arith.constant 0 : index
      %c0_121 = arith.constant 0 : index
      %188 = vector.load %arg14[%c2_119, %c0_120, %c0_121] : memref<8x16x32xf32, #tpu.memory_space<vmem>>, vector<1x8x32xf32>
      %189 = vector.shape_cast %188 : vector<1x8x32xf32> to vector<8x32xf32>
      %190 = vector.shape_cast %182 : vector<8x32xf32> to vector<1x8x32xf32>
      tpu.vector_store %arg14[%c2_119, %c0_120, %c0_121], %190 {strides = array<i32>} : memref<8x16x32xf32, #tpu.memory_space<vmem>>, vector<1x8x32xf32>,
      %c2_122 = arith.constant 2 : index
      %c8_123 = arith.constant 8 : index
      %c0_124 = arith.constant 0 : index
      %191 = vector.load %arg14[%c2_122, %c8_123, %c0_124] : memref<8x16x32xf32, #tpu.memory_space<vmem>>, vector<1x8x32xf32>
      %192 = vector.shape_cast %191 : vector<1x8x32xf32> to vector<8x32xf32>
      %193 = vector.shape_cast %187 : vector<8x32xf32> to vector<1x8x32xf32>
      tpu.vector_store %arg14[%c2_122, %c8_123, %c0_124], %193 {strides = array<i32>} : memref<8x16x32xf32, #tpu.memory_space<vmem>>, vector<1x8x32xf32>,
      %c3_125 = arith.constant 3 : index
      %c0_126 = arith.constant 0 : index
      %c0_127 = arith.constant 0 : index
      %194 = vector.load %arg3[%c3_125, %c0_126, %c0_127] : memref<8x8x8xf32, #tpu.memory_space<vmem>>, vector<1x8x8xf32>
      %195 = vector.shape_cast %194 : vector<1x8x8xf32> to vector<8x8xf32>
      %c3_128 = arith.constant 3 : index
      %c0_129 = arith.constant 0 : index
      %c0_130 = arith.constant 0 : index
      %196 = vector.load %arg4[%c3_128, %c0_129, %c0_130] : memref<8x8x8xf32, #tpu.memory_space<vmem>>, vector<1x8x8xf32>
      %197 = vector.shape_cast %196 : vector<1x8x8xf32> to vector<8x8xf32>
      %198 = arith.mulf %195, %112 : vector<8x8xf32>
      %199 = arith.mulf %197, %115 : vector<8x8xf32>
      %200 = arith.subf %198, %199 : vector<8x8xf32>
      %201 = arith.mulf %195, %115 : vector<8x8xf32>
      %202 = arith.mulf %197, %112 : vector<8x8xf32>
      %203 = arith.addf %201, %202 : vector<8x8xf32>
      %c0_131 = arith.constant 0 : index
      %c0_132 = arith.constant 0 : index
      %204 = vector.load %arg7[%c0_131, %c0_132] : memref<8x32xf32, #tpu.memory_space<vmem>>, vector<8x32xf32>
      %cst_133 = arith.constant dense<0.000000e+00> : vector<8x32xf32>
      %205 = tpu.matmul %200, %204, %cst_133 {dimension_numbers = #tpu.dot_dimension_numbers<[1], [0], [0], [1], [0, 0, 1, 1], [], []>, precision = #tpu.contract_precision<fp32>} : vector<8x8xf32>, vector<8x32xf32>, vector<8x32xf32> -> vector<8x32xf32>
      %c0_134 = arith.constant 0 : index
      %c0_135 = arith.constant 0 : index
      %206 = vector.load %arg8[%c0_134, %c0_135] : memref<8x32xf32, #tpu.memory_space<vmem>>, vector<8x32xf32>
      %cst_136 = arith.constant dense<0.000000e+00> : vector<8x32xf32>
      %207 = tpu.matmul %203, %206, %cst_136 {dimension_numbers = #tpu.dot_dimension_numbers<[1], [0], [0], [1], [0, 0, 1, 1], [], []>, precision = #tpu.contract_precision<fp32>} : vector<8x8xf32>, vector<8x32xf32>, vector<8x32xf32> -> vector<8x32xf32>
      %208 = arith.addf %205, %207 : vector<8x32xf32>
      %c0_137 = arith.constant 0 : index
      %c0_138 = arith.constant 0 : index
      %209 = vector.load %arg9[%c0_137, %c0_138] : memref<8x32xf32, #tpu.memory_space<vmem>>, vector<8x32xf32>
      %cst_139 = arith.constant dense<0.000000e+00> : vector<8x32xf32>
      %210 = tpu.matmul %200, %209, %cst_139 {dimension_numbers = #tpu.dot_dimension_numbers<[1], [0], [0], [1], [0, 0, 1, 1], [], []>, precision = #tpu.contract_precision<fp32>} : vector<8x8xf32>, vector<8x32xf32>, vector<8x32xf32> -> vector<8x32xf32>
      %c0_140 = arith.constant 0 : index
      %c0_141 = arith.constant 0 : index
      %211 = vector.load %arg7[%c0_140, %c0_141] : memref<8x32xf32, #tpu.memory_space<vmem>>, vector<8x32xf32>
      %cst_142 = arith.constant dense<0.000000e+00> : vector<8x32xf32>
      %212 = tpu.matmul %203, %211, %cst_142 {dimension_numbers = #tpu.dot_dimension_numbers<[1], [0], [0], [1], [0, 0, 1, 1], [], []>, precision = #tpu.contract_precision<fp32>} : vector<8x8xf32>, vector<8x32xf32>, vector<8x32xf32> -> vector<8x32xf32>
      %213 = arith.addf %210, %212 : vector<8x32xf32>
      %c3_143 = arith.constant 3 : index
      %c0_144 = arith.constant 0 : index
      %c0_145 = arith.constant 0 : index
      %214 = vector.load %arg14[%c3_143, %c0_144, %c0_145] : memref<8x16x32xf32, #tpu.memory_space<vmem>>, vector<1x8x32xf32>
      %215 = vector.shape_cast %214 : vector<1x8x32xf32> to vector<8x32xf32>
      %216 = vector.shape_cast %208 : vector<8x32xf32> to vector<1x8x32xf32>
      tpu.vector_store %arg14[%c3_143, %c0_144, %c0_145], %216 {strides = array<i32>} : memref<8x16x32xf32, #tpu.memory_space<vmem>>, vector<1x8x32xf32>,
      %c3_146 = arith.constant 3 : index
      %c8_147 = arith.constant 8 : index
      %c0_148 = arith.constant 0 : index
      %217 = vector.load %arg14[%c3_146, %c8_147, %c0_148] : memref<8x16x32xf32, #tpu.memory_space<vmem>>, vector<1x8x32xf32>
      %218 = vector.shape_cast %217 : vector<1x8x32xf32> to vector<8x32xf32>
      %219 = vector.shape_cast %213 : vector<8x32xf32> to vector<1x8x32xf32>
      tpu.vector_store %arg14[%c3_146, %c8_147, %c0_148], %219 {strides = array<i32>} : memref<8x16x32xf32, #tpu.memory_space<vmem>>, vector<1x8x32xf32>,
      %c4_149 = arith.constant 4 : index
      %c0_150 = arith.constant 0 : index
      %c0_151 = arith.constant 0 : index
      %220 = vector.load %arg3[%c4_149, %c0_150, %c0_151] : memref<8x8x8xf32, #tpu.memory_space<vmem>>, vector<1x8x8xf32>
      %221 = vector.shape_cast %220 : vector<1x8x8xf32> to vector<8x8xf32>
      %c4_152 = arith.constant 4 : index
      %c0_153 = arith.constant 0 : index
      %c0_154 = arith.constant 0 : index
      %222 = vector.load %arg4[%c4_152, %c0_153, %c0_154] : memref<8x8x8xf32, #tpu.memory_space<vmem>>, vector<1x8x8xf32>
      %223 = vector.shape_cast %222 : vector<1x8x8xf32> to vector<8x8xf32>
      %224 = arith.mulf %221, %112 : vector<8x8xf32>
      %225 = arith.mulf %223, %115 : vector<8x8xf32>
      %226 = arith.subf %224, %225 : vector<8x8xf32>
      %227 = arith.mulf %221, %115 : vector<8x8xf32>
      %228 = arith.mulf %223, %112 : vector<8x8xf32>
      %229 = arith.addf %227, %228 : vector<8x8xf32>
      %c0_155 = arith.constant 0 : index
      %c0_156 = arith.constant 0 : index
      %230 = vector.load %arg7[%c0_155, %c0_156] : memref<8x32xf32, #tpu.memory_space<vmem>>, vector<8x32xf32>
      %cst_157 = arith.constant dense<0.000000e+00> : vector<8x32xf32>
      %231 = tpu.matmul %226, %230, %cst_157 {dimension_numbers = #tpu.dot_dimension_numbers<[1], [0], [0], [1], [0, 0, 1, 1], [], []>, precision = #tpu.contract_precision<fp32>} : vector<8x8xf32>, vector<8x32xf32>, vector<8x32xf32> -> vector<8x32xf32>
      %c0_158 = arith.constant 0 : index
      %c0_159 = arith.constant 0 : index
      %232 = vector.load %arg8[%c0_158, %c0_159] : memref<8x32xf32, #tpu.memory_space<vmem>>, vector<8x32xf32>
      %cst_160 = arith.constant dense<0.000000e+00> : vector<8x32xf32>
      %233 = tpu.matmul %229, %232, %cst_160 {dimension_numbers = #tpu.dot_dimension_numbers<[1], [0], [0], [1], [0, 0, 1, 1], [], []>, precision = #tpu.contract_precision<fp32>} : vector<8x8xf32>, vector<8x32xf32>, vector<8x32xf32> -> vector<8x32xf32>
      %234 = arith.addf %231, %233 : vector<8x32xf32>
      %c0_161 = arith.constant 0 : index
      %c0_162 = arith.constant 0 : index
      %235 = vector.load %arg9[%c0_161, %c0_162] : memref<8x32xf32, #tpu.memory_space<vmem>>, vector<8x32xf32>
      %cst_163 = arith.constant dense<0.000000e+00> : vector<8x32xf32>
      %236 = tpu.matmul %226, %235, %cst_163 {dimension_numbers = #tpu.dot_dimension_numbers<[1], [0], [0], [1], [0, 0, 1, 1], [], []>, precision = #tpu.contract_precision<fp32>} : vector<8x8xf32>, vector<8x32xf32>, vector<8x32xf32> -> vector<8x32xf32>
      %c0_164 = arith.constant 0 : index
      %c0_165 = arith.constant 0 : index
      %237 = vector.load %arg7[%c0_164, %c0_165] : memref<8x32xf32, #tpu.memory_space<vmem>>, vector<8x32xf32>
      %cst_166 = arith.constant dense<0.000000e+00> : vector<8x32xf32>
      %238 = tpu.matmul %229, %237, %cst_166 {dimension_numbers = #tpu.dot_dimension_numbers<[1], [0], [0], [1], [0, 0, 1, 1], [], []>, precision = #tpu.contract_precision<fp32>} : vector<8x8xf32>, vector<8x32xf32>, vector<8x32xf32> -> vector<8x32xf32>
      %239 = arith.addf %236, %238 : vector<8x32xf32>
      %c4_167 = arith.constant 4 : index
      %c0_168 = arith.constant 0 : index
      %c0_169 = arith.constant 0 : index
      %240 = vector.load %arg14[%c4_167, %c0_168, %c0_169] : memref<8x16x32xf32, #tpu.memory_space<vmem>>, vector<1x8x32xf32>
      %241 = vector.shape_cast %240 : vector<1x8x32xf32> to vector<8x32xf32>
      %242 = vector.shape_cast %234 : vector<8x32xf32> to vector<1x8x32xf32>
      tpu.vector_store %arg14[%c4_167, %c0_168, %c0_169], %242 {strides = array<i32>} : memref<8x16x32xf32, #tpu.memory_space<vmem>>, vector<1x8x32xf32>,
      %c4_170 = arith.constant 4 : index
      %c8_171 = arith.constant 8 : index
      %c0_172 = arith.constant 0 : index
      %243 = vector.load %arg14[%c4_170, %c8_171, %c0_172] : memref<8x16x32xf32, #tpu.memory_space<vmem>>, vector<1x8x32xf32>
      %244 = vector.shape_cast %243 : vector<1x8x32xf32> to vector<8x32xf32>
      %245 = vector.shape_cast %239 : vector<8x32xf32> to vector<1x8x32xf32>
      tpu.vector_store %arg14[%c4_170, %c8_171, %c0_172], %245 {strides = array<i32>} : memref<8x16x32xf32, #tpu.memory_space<vmem>>, vector<1x8x32xf32>,
      %c5_173 = arith.constant 5 : index
      %c0_174 = arith.constant 0 : index
      %c0_175 = arith.constant 0 : index
      %246 = vector.load %arg3[%c5_173, %c0_174, %c0_175] : memref<8x8x8xf32, #tpu.memory_space<vmem>>, vector<1x8x8xf32>
      %247 = vector.shape_cast %246 : vector<1x8x8xf32> to vector<8x8xf32>
      %c5_176 = arith.constant 5 : index
      %c0_177 = arith.constant 0 : index
      %c0_178 = arith.constant 0 : index
      %248 = vector.load %arg4[%c5_176, %c0_177, %c0_178] : memref<8x8x8xf32, #tpu.memory_space<vmem>>, vector<1x8x8xf32>
      %249 = vector.shape_cast %248 : vector<1x8x8xf32> to vector<8x8xf32>
      %250 = arith.mulf %247, %112 : vector<8x8xf32>
      %251 = arith.mulf %249, %115 : vector<8x8xf32>
      %252 = arith.subf %250, %251 : vector<8x8xf32>
      %253 = arith.mulf %247, %115 : vector<8x8xf32>
      %254 = arith.mulf %249, %112 : vector<8x8xf32>
      %255 = arith.addf %253, %254 : vector<8x8xf32>
      %c0_179 = arith.constant 0 : index
      %c0_180 = arith.constant 0 : index
      %256 = vector.load %arg7[%c0_179, %c0_180] : memref<8x32xf32, #tpu.memory_space<vmem>>, vector<8x32xf32>
      %cst_181 = arith.constant dense<0.000000e+00> : vector<8x32xf32>
      %257 = tpu.matmul %252, %256, %cst_181 {dimension_numbers = #tpu.dot_dimension_numbers<[1], [0], [0], [1], [0, 0, 1, 1], [], []>, precision = #tpu.contract_precision<fp32>} : vector<8x8xf32>, vector<8x32xf32>, vector<8x32xf32> -> vector<8x32xf32>
      %c0_182 = arith.constant 0 : index
      %c0_183 = arith.constant 0 : index
      %258 = vector.load %arg8[%c0_182, %c0_183] : memref<8x32xf32, #tpu.memory_space<vmem>>, vector<8x32xf32>
      %cst_184 = arith.constant dense<0.000000e+00> : vector<8x32xf32>
      %259 = tpu.matmul %255, %258, %cst_184 {dimension_numbers = #tpu.dot_dimension_numbers<[1], [0], [0], [1], [0, 0, 1, 1], [], []>, precision = #tpu.contract_precision<fp32>} : vector<8x8xf32>, vector<8x32xf32>, vector<8x32xf32> -> vector<8x32xf32>
      %260 = arith.addf %257, %259 : vector<8x32xf32>
      %c0_185 = arith.constant 0 : index
      %c0_186 = arith.constant 0 : index
      %261 = vector.load %arg9[%c0_185, %c0_186] : memref<8x32xf32, #tpu.memory_space<vmem>>, vector<8x32xf32>
      %cst_187 = arith.constant dense<0.000000e+00> : vector<8x32xf32>
      %262 = tpu.matmul %252, %261, %cst_187 {dimension_numbers = #tpu.dot_dimension_numbers<[1], [0], [0], [1], [0, 0, 1, 1], [], []>, precision = #tpu.contract_precision<fp32>} : vector<8x8xf32>, vector<8x32xf32>, vector<8x32xf32> -> vector<8x32xf32>
      %c0_188 = arith.constant 0 : index
      %c0_189 = arith.constant 0 : index
      %263 = vector.load %arg7[%c0_188, %c0_189] : memref<8x32xf32, #tpu.memory_space<vmem>>, vector<8x32xf32>
      %cst_190 = arith.constant dense<0.000000e+00> : vector<8x32xf32>
      %264 = tpu.matmul %255, %263, %cst_190 {dimension_numbers = #tpu.dot_dimension_numbers<[1], [0], [0], [1], [0, 0, 1, 1], [], []>, precision = #tpu.contract_precision<fp32>} : vector<8x8xf32>, vector<8x32xf32>, vector<8x32xf32> -> vector<8x32xf32>
      %265 = arith.addf %262, %264 : vector<8x32xf32>
      %c5_191 = arith.constant 5 : index
      %c0_192 = arith.constant 0 : index
      %c0_193 = arith.constant 0 : index
      %266 = vector.load %arg14[%c5_191, %c0_192, %c0_193] : memref<8x16x32xf32, #tpu.memory_space<vmem>>, vector<1x8x32xf32>
      %267 = vector.shape_cast %266 : vector<1x8x32xf32> to vector<8x32xf32>
      %268 = vector.shape_cast %260 : vector<8x32xf32> to vector<1x8x32xf32>
      tpu.vector_store %arg14[%c5_191, %c0_192, %c0_193], %268 {strides = array<i32>} : memref<8x16x32xf32, #tpu.memory_space<vmem>>, vector<1x8x32xf32>,
      %c5_194 = arith.constant 5 : index
      %c8_195 = arith.constant 8 : index
      %c0_196 = arith.constant 0 : index
      %269 = vector.load %arg14[%c5_194, %c8_195, %c0_196] : memref<8x16x32xf32, #tpu.memory_space<vmem>>, vector<1x8x32xf32>
      %270 = vector.shape_cast %269 : vector<1x8x32xf32> to vector<8x32xf32>
      %271 = vector.shape_cast %265 : vector<8x32xf32> to vector<1x8x32xf32>
      tpu.vector_store %arg14[%c5_194, %c8_195, %c0_196], %271 {strides = array<i32>} : memref<8x16x32xf32, #tpu.memory_space<vmem>>, vector<1x8x32xf32>,
      %c6_197 = arith.constant 6 : index
      %c0_198 = arith.constant 0 : index
      %c0_199 = arith.constant 0 : index
      %272 = vector.load %arg3[%c6_197, %c0_198, %c0_199] : memref<8x8x8xf32, #tpu.memory_space<vmem>>, vector<1x8x8xf32>
      %273 = vector.shape_cast %272 : vector<1x8x8xf32> to vector<8x8xf32>
      %c6_200 = arith.constant 6 : index
      %c0_201 = arith.constant 0 : index
      %c0_202 = arith.constant 0 : index
      %274 = vector.load %arg4[%c6_200, %c0_201, %c0_202] : memref<8x8x8xf32, #tpu.memory_space<vmem>>, vector<1x8x8xf32>
      %275 = vector.shape_cast %274 : vector<1x8x8xf32> to vector<8x8xf32>
      %276 = arith.mulf %273, %112 : vector<8x8xf32>
      %277 = arith.mulf %275, %115 : vector<8x8xf32>
      %278 = arith.subf %276, %277 : vector<8x8xf32>
      %279 = arith.mulf %273, %115 : vector<8x8xf32>
      %280 = arith.mulf %275, %112 : vector<8x8xf32>
      %281 = arith.addf %279, %280 : vector<8x8xf32>
      %c0_203 = arith.constant 0 : index
      %c0_204 = arith.constant 0 : index
      %282 = vector.load %arg7[%c0_203, %c0_204] : memref<8x32xf32, #tpu.memory_space<vmem>>, vector<8x32xf32>
      %cst_205 = arith.constant dense<0.000000e+00> : vector<8x32xf32>
      %283 = tpu.matmul %278, %282, %cst_205 {dimension_numbers = #tpu.dot_dimension_numbers<[1], [0], [0], [1], [0, 0, 1, 1], [], []>, precision = #tpu.contract_precision<fp32>} : vector<8x8xf32>, vector<8x32xf32>, vector<8x32xf32> -> vector<8x32xf32>
      %c0_206 = arith.constant 0 : index
      %c0_207 = arith.constant 0 : index
      %284 = vector.load %arg8[%c0_206, %c0_207] : memref<8x32xf32, #tpu.memory_space<vmem>>, vector<8x32xf32>
      %cst_208 = arith.constant dense<0.000000e+00> : vector<8x32xf32>
      %285 = tpu.matmul %281, %284, %cst_208 {dimension_numbers = #tpu.dot_dimension_numbers<[1], [0], [0], [1], [0, 0, 1, 1], [], []>, precision = #tpu.contract_precision<fp32>} : vector<8x8xf32>, vector<8x32xf32>, vector<8x32xf32> -> vector<8x32xf32>
      %286 = arith.addf %283, %285 : vector<8x32xf32>
      %c0_209 = arith.constant 0 : index
      %c0_210 = arith.constant 0 : index
      %287 = vector.load %arg9[%c0_209, %c0_210] : memref<8x32xf32, #tpu.memory_space<vmem>>, vector<8x32xf32>
      %cst_211 = arith.constant dense<0.000000e+00> : vector<8x32xf32>
      %288 = tpu.matmul %278, %287, %cst_211 {dimension_numbers = #tpu.dot_dimension_numbers<[1], [0], [0], [1], [0, 0, 1, 1], [], []>, precision = #tpu.contract_precision<fp32>} : vector<8x8xf32>, vector<8x32xf32>, vector<8x32xf32> -> vector<8x32xf32>
      %c0_212 = arith.constant 0 : index
      %c0_213 = arith.constant 0 : index
      %289 = vector.load %arg7[%c0_212, %c0_213] : memref<8x32xf32, #tpu.memory_space<vmem>>, vector<8x32xf32>
      %cst_214 = arith.constant dense<0.000000e+00> : vector<8x32xf32>
      %290 = tpu.matmul %281, %289, %cst_214 {dimension_numbers = #tpu.dot_dimension_numbers<[1], [0], [0], [1], [0, 0, 1, 1], [], []>, precision = #tpu.contract_precision<fp32>} : vector<8x8xf32>, vector<8x32xf32>, vector<8x32xf32> -> vector<8x32xf32>
      %291 = arith.addf %288, %290 : vector<8x32xf32>
      %c6_215 = arith.constant 6 : index
      %c0_216 = arith.constant 0 : index
      %c0_217 = arith.constant 0 : index
      %292 = vector.load %arg14[%c6_215, %c0_216, %c0_217] : memref<8x16x32xf32, #tpu.memory_space<vmem>>, vector<1x8x32xf32>
      %293 = vector.shape_cast %292 : vector<1x8x32xf32> to vector<8x32xf32>
      %294 = vector.shape_cast %286 : vector<8x32xf32> to vector<1x8x32xf32>
      tpu.vector_store %arg14[%c6_215, %c0_216, %c0_217], %294 {strides = array<i32>} : memref<8x16x32xf32, #tpu.memory_space<vmem>>, vector<1x8x32xf32>,
      %c6_218 = arith.constant 6 : index
      %c8_219 = arith.constant 8 : index
      %c0_220 = arith.constant 0 : index
      %295 = vector.load %arg14[%c6_218, %c8_219, %c0_220] : memref<8x16x32xf32, #tpu.memory_space<vmem>>, vector<1x8x32xf32>
      %296 = vector.shape_cast %295 : vector<1x8x32xf32> to vector<8x32xf32>
      %297 = vector.shape_cast %291 : vector<8x32xf32> to vector<1x8x32xf32>
      tpu.vector_store %arg14[%c6_218, %c8_219, %c0_220], %297 {strides = array<i32>} : memref<8x16x32xf32, #tpu.memory_space<vmem>>, vector<1x8x32xf32>,
      %c7_221 = arith.constant 7 : index
      %c0_222 = arith.constant 0 : index
      %c0_223 = arith.constant 0 : index
      %298 = vector.load %arg3[%c7_221, %c0_222, %c0_223] : memref<8x8x8xf32, #tpu.memory_space<vmem>>, vector<1x8x8xf32>
      %299 = vector.shape_cast %298 : vector<1x8x8xf32> to vector<8x8xf32>
      %c7_224 = arith.constant 7 : index
      %c0_225 = arith.constant 0 : index
      %c0_226 = arith.constant 0 : index
      %300 = vector.load %arg4[%c7_224, %c0_225, %c0_226] : memref<8x8x8xf32, #tpu.memory_space<vmem>>, vector<1x8x8xf32>
      %301 = vector.shape_cast %300 : vector<1x8x8xf32> to vector<8x8xf32>
      %302 = arith.mulf %299, %112 : vector<8x8xf32>
      %303 = arith.mulf %301, %115 : vector<8x8xf32>
      %304 = arith.subf %302, %303 : vector<8x8xf32>
      %305 = arith.mulf %299, %115 : vector<8x8xf32>
      %306 = arith.mulf %301, %112 : vector<8x8xf32>
      %307 = arith.addf %305, %306 : vector<8x8xf32>
      %c0_227 = arith.constant 0 : index
      %c0_228 = arith.constant 0 : index
      %308 = vector.load %arg7[%c0_227, %c0_228] : memref<8x32xf32, #tpu.memory_space<vmem>>, vector<8x32xf32>
      %cst_229 = arith.constant dense<0.000000e+00> : vector<8x32xf32>
      %309 = tpu.matmul %304, %308, %cst_229 {dimension_numbers = #tpu.dot_dimension_numbers<[1], [0], [0], [1], [0, 0, 1, 1], [], []>, precision = #tpu.contract_precision<fp32>} : vector<8x8xf32>, vector<8x32xf32>, vector<8x32xf32> -> vector<8x32xf32>
      %c0_230 = arith.constant 0 : index
      %c0_231 = arith.constant 0 : index
      %310 = vector.load %arg8[%c0_230, %c0_231] : memref<8x32xf32, #tpu.memory_space<vmem>>, vector<8x32xf32>
      %cst_232 = arith.constant dense<0.000000e+00> : vector<8x32xf32>
      %311 = tpu.matmul %307, %310, %cst_232 {dimension_numbers = #tpu.dot_dimension_numbers<[1], [0], [0], [1], [0, 0, 1, 1], [], []>, precision = #tpu.contract_precision<fp32>} : vector<8x8xf32>, vector<8x32xf32>, vector<8x32xf32> -> vector<8x32xf32>
      %312 = arith.addf %309, %311 : vector<8x32xf32>
      %c0_233 = arith.constant 0 : index
      %c0_234 = arith.constant 0 : index
      %313 = vector.load %arg9[%c0_233, %c0_234] : memref<8x32xf32, #tpu.memory_space<vmem>>, vector<8x32xf32>
      %cst_235 = arith.constant dense<0.000000e+00> : vector<8x32xf32>
      %314 = tpu.matmul %304, %313, %cst_235 {dimension_numbers = #tpu.dot_dimension_numbers<[1], [0], [0], [1], [0, 0, 1, 1], [], []>, precision = #tpu.contract_precision<fp32>} : vector<8x8xf32>, vector<8x32xf32>, vector<8x32xf32> -> vector<8x32xf32>
      %c0_236 = arith.constant 0 : index
      %c0_237 = arith.constant 0 : index
      %315 = vector.load %arg7[%c0_236, %c0_237] : memref<8x32xf32, #tpu.memory_space<vmem>>, vector<8x32xf32>
      %cst_238 = arith.constant dense<0.000000e+00> : vector<8x32xf32>
      %316 = tpu.matmul %307, %315, %cst_238 {dimension_numbers = #tpu.dot_dimension_numbers<[1], [0], [0], [1], [0, 0, 1, 1], [], []>, precision = #tpu.contract_precision<fp32>} : vector<8x8xf32>, vector<8x32xf32>, vector<8x32xf32> -> vector<8x32xf32>
      %317 = arith.addf %314, %316 : vector<8x32xf32>
      %c7_239 = arith.constant 7 : index
      %c0_240 = arith.constant 0 : index
      %c0_241 = arith.constant 0 : index
      %318 = vector.load %arg14[%c7_239, %c0_240, %c0_241] : memref<8x16x32xf32, #tpu.memory_space<vmem>>, vector<1x8x32xf32>
      %319 = vector.shape_cast %318 : vector<1x8x32xf32> to vector<8x32xf32>
      %320 = vector.shape_cast %312 : vector<8x32xf32> to vector<1x8x32xf32>
      tpu.vector_store %arg14[%c7_239, %c0_240, %c0_241], %320 {strides = array<i32>} : memref<8x16x32xf32, #tpu.memory_space<vmem>>, vector<1x8x32xf32>,
      %c7_242 = arith.constant 7 : index
      %c8_243 = arith.constant 8 : index
      %c0_244 = arith.constant 0 : index
      %321 = vector.load %arg14[%c7_242, %c8_243, %c0_244] : memref<8x16x32xf32, #tpu.memory_space<vmem>>, vector<1x8x32xf32>
      %322 = vector.shape_cast %321 : vector<1x8x32xf32> to vector<8x32xf32>
      %323 = vector.shape_cast %317 : vector<8x32xf32> to vector<1x8x32xf32>
      tpu.vector_store %arg14[%c7_242, %c8_243, %c0_244], %323 {strides = array<i32>} : memref<8x16x32xf32, #tpu.memory_space<vmem>>, vector<1x8x32xf32>,
    } else {
    }
    %c0 = arith.constant 0 : index
    %c0_1 = arith.constant 0 : index
    %3 = vector.load %arg10[%c0, %c0_1] : memref<16x16xf32, #tpu.memory_space<vmem>>, vector<16x16xf32>
    %c0_2 = arith.constant 0 : index
    %c0_3 = arith.constant 0 : index
    %c0_4 = arith.constant 0 : index
    %4 = vector.load %arg14[%c0_2, %c0_3, %c0_4] : memref<8x16x32xf32, #tpu.memory_space<vmem>>, vector<1x16x32xf32>
    %5 = vector.shape_cast %4 : vector<1x16x32xf32> to vector<16x32xf32>
    %cst = arith.constant dense<0.000000e+00> : vector<16x32xf32>
    %6 = tpu.matmul %3, %5, %cst {dimension_numbers = #tpu.dot_dimension_numbers<[1], [0], [0], [1], [0, 0, 1, 1], [], []>, precision = #tpu.contract_precision<fp32>} : vector<16x16xf32>, vector<16x32xf32>, vector<16x32xf32> -> vector<16x32xf32>
    %7 = arith.mulf %6, %6 : vector<16x32xf32>
    %8 = vector.extract_strided_slice %7 {offsets = [0, 0], sizes = [16, 16], strides = [1, 1]} : vector<16x32xf32> to vector<16x16xf32>
    %9 = vector.extract_strided_slice %7 {offsets = [0, 16], sizes = [16, 16], strides = [1, 1]} : vector<16x32xf32> to vector<16x16xf32>
    %10 = arith.addf %8, %9 : vector<16x16xf32>
    %c1 = arith.constant 1 : index
    %c0_5 = arith.constant 0 : index
    %c0_6 = arith.constant 0 : index
    %11 = vector.load %arg14[%c1, %c0_5, %c0_6] : memref<8x16x32xf32, #tpu.memory_space<vmem>>, vector<1x16x32xf32>
    %12 = vector.shape_cast %11 : vector<1x16x32xf32> to vector<16x32xf32>
    %cst_7 = arith.constant dense<0.000000e+00> : vector<16x32xf32>
    %13 = tpu.matmul %3, %12, %cst_7 {dimension_numbers = #tpu.dot_dimension_numbers<[1], [0], [0], [1], [0, 0, 1, 1], [], []>, precision = #tpu.contract_precision<fp32>} : vector<16x16xf32>, vector<16x32xf32>, vector<16x32xf32> -> vector<16x32xf32>
    %14 = arith.mulf %13, %13 : vector<16x32xf32>
    %15 = vector.extract_strided_slice %14 {offsets = [0, 0], sizes = [16, 16], strides = [1, 1]} : vector<16x32xf32> to vector<16x16xf32>
    %16 = vector.extract_strided_slice %14 {offsets = [0, 16], sizes = [16, 16], strides = [1, 1]} : vector<16x32xf32> to vector<16x16xf32>
    %17 = arith.addf %15, %16 : vector<16x16xf32>
    %18 = arith.addf %10, %17 : vector<16x16xf32>
    %c2 = arith.constant 2 : index
    %c0_8 = arith.constant 0 : index
    %c0_9 = arith.constant 0 : index
    %19 = vector.load %arg14[%c2, %c0_8, %c0_9] : memref<8x16x32xf32, #tpu.memory_space<vmem>>, vector<1x16x32xf32>
    %20 = vector.shape_cast %19 : vector<1x16x32xf32> to vector<16x32xf32>
    %cst_10 = arith.constant dense<0.000000e+00> : vector<16x32xf32>
    %21 = tpu.matmul %3, %20, %cst_10 {dimension_numbers = #tpu.dot_dimension_numbers<[1], [0], [0], [1], [0, 0, 1, 1], [], []>, precision = #tpu.contract_precision<fp32>} : vector<16x16xf32>, vector<16x32xf32>, vector<16x32xf32> -> vector<16x32xf32>
    %22 = arith.mulf %21, %21 : vector<16x32xf32>
    %23 = vector.extract_strided_slice %22 {offsets = [0, 0], sizes = [16, 16], strides = [1, 1]} : vector<16x32xf32> to vector<16x16xf32>
    %24 = vector.extract_strided_slice %22 {offsets = [0, 16], sizes = [16, 16], strides = [1, 1]} : vector<16x32xf32> to vector<16x16xf32>
    %25 = arith.addf %23, %24 : vector<16x16xf32>
    %26 = arith.addf %18, %25 : vector<16x16xf32>
    %c3 = arith.constant 3 : index
    %c0_11 = arith.constant 0 : index
    %c0_12 = arith.constant 0 : index
    %27 = vector.load %arg14[%c3, %c0_11, %c0_12] : memref<8x16x32xf32, #tpu.memory_space<vmem>>, vector<1x16x32xf32>
    %28 = vector.shape_cast %27 : vector<1x16x32xf32> to vector<16x32xf32>
    %cst_13 = arith.constant dense<0.000000e+00> : vector<16x32xf32>
    %29 = tpu.matmul %3, %28, %cst_13 {dimension_numbers = #tpu.dot_dimension_numbers<[1], [0], [0], [1], [0, 0, 1, 1], [], []>, precision = #tpu.contract_precision<fp32>} : vector<16x16xf32>, vector<16x32xf32>, vector<16x32xf32> -> vector<16x32xf32>
    %30 = arith.mulf %29, %29 : vector<16x32xf32>
    %31 = vector.extract_strided_slice %30 {offsets = [0, 0], sizes = [16, 16], strides = [1, 1]} : vector<16x32xf32> to vector<16x16xf32>
    %32 = vector.extract_strided_slice %30 {offsets = [0, 16], sizes = [16, 16], strides = [1, 1]} : vector<16x32xf32> to vector<16x16xf32>
    %33 = arith.addf %31, %32 : vector<16x16xf32>
    %34 = arith.addf %26, %33 : vector<16x16xf32>
    %cst_14 = arith.constant 2.250000e-01 : f32
    %35 = vector.broadcast %cst_14 : f32 to vector<16x16xf32>
    %36 = arith.subf %34, %35 : vector<16x16xf32>
    %cst_15 = arith.constant 4.000000e+00 : f32
    %37 = vector.broadcast %cst_15 : f32 to vector<16x16xf32>
    %38 = arith.mulf %37, %36 : vector<16x16xf32>
    %39 = arith.negf %38 : vector<16x16xf32>
    %40 = math.exp %39 : vector<16x16xf32>
    %cst_16 = arith.constant 1.000000e+00 : f32
    %41 = vector.broadcast %cst_16 : f32 to vector<16x16xf32>
    %42 = arith.addf %41, %40 : vector<16x16xf32>
    %43 = arith.divf %41, %42 : vector<16x16xf32>
    %c0_17 = arith.constant 0 : index
    %c0_18 = arith.constant 0 : index
    %c0_19 = arith.constant 0 : index
    %44 = vector.load %arg11[%c0_17, %c0_18, %c0_19] : memref<1x16x16xf32, #tpu.memory_space<vmem>>, vector<1x16x16xf32>
    %45 = vector.shape_cast %44 : vector<1x16x16xf32> to vector<16x16xf32>
    %46 = vector.shape_cast %43 : vector<16x16xf32> to vector<1x16x16xf32>
    tpu.vector_store %arg11[%c0_17, %c0_18, %c0_19], %46 {strides = array<i32>} : memref<1x16x16xf32, #tpu.memory_space<vmem>>, vector<1x16x16xf32>,
    %cst_20 = arith.constant 1.040400e+00 : f32
    %47 = vector.broadcast %cst_20 : f32 to vector<16x16xf32>
    %48 = arith.mulf %47, %34 : vector<16x16xf32>
    %cst_21 = arith.constant 2.250000e-01 : f32
    %49 = vector.broadcast %cst_21 : f32 to vector<16x16xf32>
    %50 = arith.subf %48, %49 : vector<16x16xf32>
    %cst_22 = arith.constant 4.000000e+00 : f32
    %51 = vector.broadcast %cst_22 : f32 to vector<16x16xf32>
    %52 = arith.mulf %51, %50 : vector<16x16xf32>
    %53 = arith.negf %52 : vector<16x16xf32>
    %54 = math.exp %53 : vector<16x16xf32>
    %cst_23 = arith.constant 1.000000e+00 : f32
    %55 = vector.broadcast %cst_23 : f32 to vector<16x16xf32>
    %56 = arith.addf %55, %54 : vector<16x16xf32>
    %57 = arith.divf %55, %56 : vector<16x16xf32>
    %c0_24 = arith.constant 0 : index
    %c0_25 = arith.constant 0 : index
    %c0_26 = arith.constant 0 : index
    %58 = vector.load %arg12[%c0_24, %c0_25, %c0_26] : memref<1x16x16xf32, #tpu.memory_space<vmem>>, vector<1x16x16xf32>
    %59 = vector.shape_cast %58 : vector<1x16x16xf32> to vector<16x16xf32>
    %60 = vector.shape_cast %57 : vector<16x16xf32> to vector<1x16x16xf32>
    tpu.vector_store %arg12[%c0_24, %c0_25, %c0_26], %60 {strides = array<i32>} : memref<1x16x16xf32, #tpu.memory_space<vmem>>, vector<1x16x16xf32>,
    %c4 = arith.constant 4 : index
    %c0_27 = arith.constant 0 : index
    %c0_28 = arith.constant 0 : index
    %61 = vector.load %arg14[%c4, %c0_27, %c0_28] : memref<8x16x32xf32, #tpu.memory_space<vmem>>, vector<1x16x32xf32>
    %62 = vector.shape_cast %61 : vector<1x16x32xf32> to vector<16x32xf32>
    %cst_29 = arith.constant dense<0.000000e+00> : vector<16x32xf32>
    %63 = tpu.matmul %3, %62, %cst_29 {dimension_numbers = #tpu.dot_dimension_numbers<[1], [0], [0], [1], [0, 0, 1, 1], [], []>, precision = #tpu.contract_precision<fp32>} : vector<16x16xf32>, vector<16x32xf32>, vector<16x32xf32> -> vector<16x32xf32>
    %64 = arith.mulf %63, %63 : vector<16x32xf32>
    %65 = vector.extract_strided_slice %64 {offsets = [0, 0], sizes = [16, 16], strides = [1, 1]} : vector<16x32xf32> to vector<16x16xf32>
    %66 = vector.extract_strided_slice %64 {offsets = [0, 16], sizes = [16, 16], strides = [1, 1]} : vector<16x32xf32> to vector<16x16xf32>
    %67 = arith.addf %65, %66 : vector<16x16xf32>
    %c5 = arith.constant 5 : index
    %c0_30 = arith.constant 0 : index
    %c0_31 = arith.constant 0 : index
    %68 = vector.load %arg14[%c5, %c0_30, %c0_31] : memref<8x16x32xf32, #tpu.memory_space<vmem>>, vector<1x16x32xf32>
    %69 = vector.shape_cast %68 : vector<1x16x32xf32> to vector<16x32xf32>
    %cst_32 = arith.constant dense<0.000000e+00> : vector<16x32xf32>
    %70 = tpu.matmul %3, %69, %cst_32 {dimension_numbers = #tpu.dot_dimension_numbers<[1], [0], [0], [1], [0, 0, 1, 1], [], []>, precision = #tpu.contract_precision<fp32>} : vector<16x16xf32>, vector<16x32xf32>, vector<16x32xf32> -> vector<16x32xf32>
    %71 = arith.mulf %70, %70 : vector<16x32xf32>
    %72 = vector.extract_strided_slice %71 {offsets = [0, 0], sizes = [16, 16], strides = [1, 1]} : vector<16x32xf32> to vector<16x16xf32>
    %73 = vector.extract_strided_slice %71 {offsets = [0, 16], sizes = [16, 16], strides = [1, 1]} : vector<16x32xf32> to vector<16x16xf32>
    %74 = arith.addf %72, %73 : vector<16x16xf32>
    %75 = arith.addf %67, %74 : vector<16x16xf32>
    %c6 = arith.constant 6 : index
    %c0_33 = arith.constant 0 : index
    %c0_34 = arith.constant 0 : index
    %76 = vector.load %arg14[%c6, %c0_33, %c0_34] : memref<8x16x32xf32, #tpu.memory_space<vmem>>, vector<1x16x32xf32>
    %77 = vector.shape_cast %76 : vector<1x16x32xf32> to vector<16x32xf32>
    %cst_35 = arith.constant dense<0.000000e+00> : vector<16x32xf32>
    %78 = tpu.matmul %3, %77, %cst_35 {dimension_numbers = #tpu.dot_dimension_numbers<[1], [0], [0], [1], [0, 0, 1, 1], [], []>, precision = #tpu.contract_precision<fp32>} : vector<16x16xf32>, vector<16x32xf32>, vector<16x32xf32> -> vector<16x32xf32>
    %79 = arith.mulf %78, %78 : vector<16x32xf32>
    %80 = vector.extract_strided_slice %79 {offsets = [0, 0], sizes = [16, 16], strides = [1, 1]} : vector<16x32xf32> to vector<16x16xf32>
    %81 = vector.extract_strided_slice %79 {offsets = [0, 16], sizes = [16, 16], strides = [1, 1]} : vector<16x32xf32> to vector<16x16xf32>
    %82 = arith.addf %80, %81 : vector<16x16xf32>
    %83 = arith.addf %75, %82 : vector<16x16xf32>
    %c7 = arith.constant 7 : index
    %c0_36 = arith.constant 0 : index
    %c0_37 = arith.constant 0 : index
    %84 = vector.load %arg14[%c7, %c0_36, %c0_37] : memref<8x16x32xf32, #tpu.memory_space<vmem>>, vector<1x16x32xf32>
    %85 = vector.shape_cast %84 : vector<1x16x32xf32> to vector<16x32xf32>
    %cst_38 = arith.constant dense<0.000000e+00> : vector<16x32xf32>
    %86 = tpu.matmul %3, %85, %cst_38 {dimension_numbers = #tpu.dot_dimension_numbers<[1], [0], [0], [1], [0, 0, 1, 1], [], []>, precision = #tpu.contract_precision<fp32>} : vector<16x16xf32>, vector<16x32xf32>, vector<16x32xf32> -> vector<16x32xf32>
    %87 = arith.mulf %86, %86 : vector<16x32xf32>
    %88 = vector.extract_strided_slice %87 {offsets = [0, 0], sizes = [16, 16], strides = [1, 1]} : vector<16x32xf32> to vector<16x16xf32>
    %89 = vector.extract_strided_slice %87 {offsets = [0, 16], sizes = [16, 16], strides = [1, 1]} : vector<16x32xf32> to vector<16x16xf32>
    %90 = arith.addf %88, %89 : vector<16x16xf32>
    %91 = arith.addf %83, %90 : vector<16x16xf32>
    %cst_39 = arith.constant 2.250000e-01 : f32
    %92 = vector.broadcast %cst_39 : f32 to vector<16x16xf32>
    %93 = arith.subf %91, %92 : vector<16x16xf32>
    %cst_40 = arith.constant 4.000000e+00 : f32
    %94 = vector.broadcast %cst_40 : f32 to vector<16x16xf32>
    %95 = arith.mulf %94, %93 : vector<16x16xf32>
    %96 = arith.negf %95 : vector<16x16xf32>
    %97 = math.exp %96 : vector<16x16xf32>
    %cst_41 = arith.constant 1.000000e+00 : f32
    %98 = vector.broadcast %cst_41 : f32 to vector<16x16xf32>
    %99 = arith.addf %98, %97 : vector<16x16xf32>
    %100 = arith.divf %98, %99 : vector<16x16xf32>
    %c0_42 = arith.constant 0 : index
    %c0_43 = arith.constant 0 : index
    %c0_44 = arith.constant 0 : index
    %101 = vector.load %arg13[%c0_42, %c0_43, %c0_44] : memref<1x16x16xf32, #tpu.memory_space<vmem>>, vector<1x16x16xf32>
    %102 = vector.shape_cast %101 : vector<1x16x16xf32> to vector<16x16xf32>
    %103 = vector.shape_cast %100 : vector<16x16xf32> to vector<1x16x16xf32>
    tpu.vector_store %arg13[%c0_42, %c0_43, %c0_44], %103 {strides = array<i32>} : memref<1x16x16xf32, #tpu.memory_space<vmem>>, vector<1x16x16xf32>,
    return
  }
  func.func @transform_0(%arg0: i32, %arg1: i32) -> (i32, i32, i32) {
    %c0_i32 = arith.constant 0 : i32
    %c0_i32_0 = arith.constant 0 : i32
    %c0_i32_1 = arith.constant 0 : i32
    return %arg0, %c0_i32, %c0_i32_0 : i32, i32, i32
  }
  func.func @transform_1(%arg0: i32, %arg1: i32) -> (i32, i32, i32) {
    %c0_i32 = arith.constant 0 : i32
    %c0_i32_0 = arith.constant 0 : i32
    %c0_i32_1 = arith.constant 0 : i32
    %c0_i32_2 = arith.constant 0 : i32
    return %c0_i32, %c0_i32_0, %c0_i32_1 : i32, i32, i32
  }
  func.func @transform_2(%arg0: i32, %arg1: i32) -> (i32, i32, i32) {
    %c0_i32 = arith.constant 0 : i32
    %c0_i32_0 = arith.constant 0 : i32
    %c0_i32_1 = arith.constant 0 : i32
    %c0_i32_2 = arith.constant 0 : i32
    return %c0_i32, %c0_i32_0, %c0_i32_1 : i32, i32, i32
  }
  func.func @transform_3(%arg0: i32, %arg1: i32) -> (i32, i32) {
    %c0_i32 = arith.constant 0 : i32
    %c0_i32_0 = arith.constant 0 : i32
    %c0_i32_1 = arith.constant 0 : i32
    return %c0_i32, %c0_i32_0 : i32, i32
  }
  func.func @transform_4(%arg0: i32, %arg1: i32) -> (i32, i32) {
    %c0_i32 = arith.constant 0 : i32
    %c0_i32_0 = arith.constant 0 : i32
    %c0_i32_1 = arith.constant 0 : i32
    return %c0_i32, %c0_i32_0 : i32, i32
  }
  func.func @transform_5(%arg0: i32, %arg1: i32) -> (i32, i32) {
    %c0_i32 = arith.constant 0 : i32
    %c0_i32_0 = arith.constant 0 : i32
    %c0_i32_1 = arith.constant 0 : i32
    return %c0_i32, %c0_i32_0 : i32, i32
  }
  func.func @transform_6(%arg0: i32, %arg1: i32) -> (i32, i32) {
    %c0_i32 = arith.constant 0 : i32
    %c0_i32_0 = arith.constant 0 : i32
    %c0_i32_1 = arith.constant 0 : i32
    return %c0_i32, %c0_i32_0 : i32, i32
  }
  func.func @transform_7(%arg0: i32, %arg1: i32) -> (i32, i32) {
    %c0_i32 = arith.constant 0 : i32
    %c0_i32_0 = arith.constant 0 : i32
    %c0_i32_1 = arith.constant 0 : i32
    return %c0_i32, %c0_i32_0 : i32, i32
  }
  func.func @transform_8(%arg0: i32, %arg1: i32) -> (i32, i32) {
    %c0_i32 = arith.constant 0 : i32
    %c0_i32_0 = arith.constant 0 : i32
    return %arg1, %c0_i32 : i32, i32
  }
  func.func @transform_9(%arg0: i32, %arg1: i32) -> (i32, i32, i32) {
    %c0_i32 = arith.constant 0 : i32
    %c0_i32_0 = arith.constant 0 : i32
    return %arg0, %arg1, %c0_i32 : i32, i32, i32
  }
  func.func @transform_10(%arg0: i32, %arg1: i32) -> (i32, i32, i32) {
    %c0_i32 = arith.constant 0 : i32
    %c0_i32_0 = arith.constant 0 : i32
    return %arg0, %arg1, %c0_i32 : i32, i32, i32
  }
  func.func @transform_11(%arg0: i32, %arg1: i32) -> (i32, i32, i32) {
    %c0_i32 = arith.constant 0 : i32
    %c0_i32_0 = arith.constant 0 : i32
    return %arg0, %arg1, %c0_i32 : i32, i32, i32
  }
}

</mosaic_0001>

<bundles_post_ra>
// kernel: tpu_custom_call.1
= control target key start
LH: loop header
LB: loop body
LE: loop exit
PB: predicated region body
PF: predicated region fallthrough
CT: control target
= control target key end

     0   :  { %s25363_s0 = inlined_call_operand.hbm [shape: f32[2,16,16], index: 0, kind: input, shape index: {}]   ;;  %s25364_s1 = inlined_call_operand.hbm [shape: f32[8,8,8], index: 1, kind: input, shape index: {}]   ;;  %s25365_s2 = inlined_call_operand.hbm [shape: f32[8,8,8], index: 2, kind: input, shape index: {}]   ;;  %s25366_s3 = inlined_call_operand.hbm [shape: f32[16,16], index: 3, kind: input, shape index: {}]   ;;  %s25367_s4 = inlined_call_operand.hbm [shape: f32[16,16], index: 4, kind: input, shape index: {}]   ;;  %s25368_s5 = inlined_call_operand.vmem [shape: f32[8,32], index: 5, kind: input, shape index: {}]   ;;  %s25369_s6 = inlined_call_operand.hbm [shape: f32[8,32], index: 6, kind: input, shape index: {}]   ;;  %s25370_s7 = inlined_call_operand.hbm [shape: f32[8,32], index: 7, kind: input, shape index: {}]   ;;  %s25371_s8 = inlined_call_operand.hbm [shape: f32[16,16], index: 8, kind: input, shape index: {}]   ;;  %s25372_s9 = inlined_call_operand.hbm [shape: f32[2,16,16], index: 9, kind: output, shape index: {0}]   ;;  %s25373_s10 = inlined_call_operand.hbm [shape: f32[2,16,16], index: 10, kind: output, shape index: {1}]   ;;  %s25374_s11 = inlined_call_operand.hbm [shape: f32[2,16,16], index: 11, kind: output, shape index: {2}]  }
   0x1   :  { %25383 = sst [smem:[#allocation29_spill]] %s25364_s1 }
   0x2   :  { %25384 = sst [smem:[#allocation30_spill]] %s25365_s2 }
   0x3   :  { %25385 = sst [smem:[#allocation31_spill]] %s25366_s3 }
   0x4   :  { %25386 = sst [smem:[#allocation32_spill]] %s25367_s4 }
   0x5   :  { %25387 = sst [smem:[#allocation33_spill]] %s25369_s6 }
   0x6   :  { %25388 = sst [smem:[#allocation34_spill]] %s25370_s7 }
   0x7   :  { %25389 = sst [smem:[#allocation35_spill]] %s25371_s8 }
   0x8   :  { %25390 = sst [smem:[#allocation36_spill]] %s25374_s11 }
   0x9   :  { %17 = vsyncpa [#allocation4], 0 }
   0xa   :  { %19 = vsyncpa [#allocation4 + $0x1], 0 }
   0xb   :  { %20 = vsyncpa [#allocation7], 0 }
   0xc   :  { %21 = vsyncpa [#allocation10], 0 }
   0xd   :  { %22 = vsyncpa [#allocation13], 0 }
   0xe   :  { %23 = vsyncpa [#allocation16], 0 }
   0xf   :  { %24 = vsyncpa [#allocation5], 0 }
  0x10   :  { %26 = vsyncpa [#allocation5 + $0x1], 0 }
  0x11   :  { %27 = vsyncpa [#allocation19], 0 }
  0x12   :  { %29 = vsyncpa [#allocation19 + $0x1], 0  ;;  %s23207_s17 = smov 0   ;;  %s23209_s18 = smov 0  }
  0x13   :  { %s23211_s19 = smov 0   ;;  %s23213_s20 = smov 0  }
  0x14   :  { %s23215_s21 = smov 0   ;;  %s23217_s22 = smov 0  }
  0x15 LB: > { %s23238_s23 = sadd.s32 4294967295, %s23126_s22   ;;  %p20534_p0 = scmp.ge.s32.totalorder %s23126_s22, 1  ;;  %s23126_s22 = sphi %s23217_s22, %s35_s22   ;;  %s23122_s21 = sphi %s23215_s21, %s25427_s21   ;;  %s23118_s20 = sphi %s23213_s20, %s25426_s20   ;;  %s23114_s19 = sphi %s23211_s19, %s25425_s19   ;;  %s23110_s18 = sphi %s23209_s18, %s25424_s18   ;;  %s23106_s17 = sphi %s23207_s17, %s25423_s17  }
  0x16   : > { %p25378_p1 = scmp.eq.s32.totalorder %s23238_s23, 0  ;;  %p335_p2 = scmp.lt.s32.totalorder %s23126_s22, 3 }
  0x17   : > { %s23128_s25 = smov [#allocation6]   ;;  %s23129_s28 = smov [#allocation9]  }
  0x18   : > { %p23243_p3 = pnand %p20534_p0, %p335_p2  ;;  %s347_s26 = sshll.u32 %s23128_s25, 4  ;;  %s348_s26 = int_to_ptr.vmem [resolvable:$true] %s347_s26 }
  0x19   : > { %s373_s29 = sshll.u32 %s23129_s28, 4  ;;  %s23130_s30 = smov [#allocation12]   ;;  %s374_s29 = int_to_ptr.vmem [resolvable:$true] %s373_s29 }
  0x1a   : > { %s25391_s24 = scalar_select %p23243_p3, 1, 0 }
  0x1b   : > { %p22625_p4 = pneg %p23243_p3  ;;  %s403_s12 = sshll.u32 %s23130_s30, 4  ;;  %s404_s12 = int_to_ptr.vmem [resolvable:$true] %s403_s12 }
  0x1c   : > { %s22775_s14 = scalar_lea.vmem %s348_s26, 1024  ;;  %p22783_p11 = scmp.lt.s32.totalorder %s348_s26, %s348_s26 }
  0x1d   : > { %p23252_p6 = pnand %p22625_p4, %p25378_p1  ;;  %p22776_p8 = scmp.ne.s32.totalorder %s348_s26, %s22775_s14 }
  0x1e   : > { %p22784_p12 = scmp.lt.s32.totalorder %s22775_s14, %s22775_s14 }
  0x1f   : > { %p23258_p7 = pneg %p23252_p6 }
  0x20   : > { %p22785_p13 = por %p22784_p12, %p22783_p11 }
  0x21   : > { %p22778_p9 = pnand %p22776_p8, %p23258_p7 }
  0x23   : > { %p22779_p10 = pneg %p22778_p9 }
  0x25   : > { %p22786_p0 = pnand %p22785_p13, %p22779_p10 }
  0x27   : > { %22789 = shalt.err (!%p22786_p0)
}
  0x28   : > { %s25376_s15 = smov 128   ;;  %s25380_s16 = smov 8  }
  0x29   : > { %s25394_s1 = sld [smem:[#allocation29_spill]]  ;;  %s22801_s30 = scalar_lea.vmem %s374_s29, 256 }
  0x2a   : > { %p22802_p2 = scmp.ne.s32.totalorder %s374_s29, %s22801_s30  ;;  %p22809_p9 = scmp.lt.s32.totalorder %s374_s29, %s374_s29 }
  0x2b   : > { %p22810_p10 = scmp.lt.s32.totalorder %s22801_s30, %s22801_s30 }
  0x2c   : > { %p22804_p4 = pnand %p22802_p2, %p23258_p7 }
  0x2d   : > { %p22811_p11 = por %p22810_p10, %p22809_p9 }
  0x2e   : > { %p22805_p8 = pneg %p22804_p4 }
  0x2f   : > { %22628 = dma.hbm_to_vmem [thread:$0]  (!%p23252_p6), %s25394_s1, 1024, %s348_s26, [#allocation7], %s25376_s15, %s25376_s15, %s25380_s16  }
  0x30   : > { %p22812_p12 = pnand %p22811_p11, %p22805_p8 }
  0x32   : > { %22815 = shalt.err (!%p22812_p12)
}
  0x33   : > { %s25395_s3 = sld [smem:[#allocation31_spill]]  ;;  %s22827_s26 = scalar_lea.vmem %s404_s12, 128 }
  0x34   : > { %p22828_p13 = scmp.ne.s32.totalorder %s404_s12, %s22827_s26  ;;  %p22835_p4 = scmp.lt.s32.totalorder %s404_s12, %s404_s12 }
  0x35   : > { %p22836_p9 = scmp.lt.s32.totalorder %s22827_s26, %s22827_s26 }
  0x36   : > { %p22830_p0 = pnand %p22828_p13, %p23258_p7 }
  0x37   : > { %p22837_p8 = por %p22836_p9, %p22835_p4 }
  0x38   : > { %p22831_p2 = pneg %p22830_p0 }
  0x39   : > { %22634 = dma.hbm_to_vmem [thread:$0]  (!%p23252_p6), %s25395_s3, 256, %s374_s29, [#allocation10], %s25376_s15, %s25376_s15, %s25380_s16  }
  0x3a   : > { %p22838_p10 = pnand %p22837_p8, %p22831_p2 }
  0x3c   : > { %22841 = shalt.err (!%p22838_p10)
}
  0x3d   : > { %s25396_s6 = sld [smem:[#allocation33_spill]]  ;;  %s23133_s11 = smov [#allocation8]  }
  0x3e   : > { %s360_s29 = sshll.u32 %s23133_s11, 4  ;;  %s23134_s30 = smov [#allocation11]   ;;  %s361_s29 = int_to_ptr.vmem [resolvable:$true] %s360_s29 }
  0x3f   : > { %s386_s14 = sshll.u32 %s23134_s30, 4  ;;  %s22853_s15 = scalar_lea.vmem %s361_s29, 1024  ;;  %s387_s14 = int_to_ptr.vmem [resolvable:$true] %s386_s14 }
  0x40   : > { %p22854_p11 = scmp.ne.s32.totalorder %s361_s29, %s22853_s15  ;;  %p22861_p0 = scmp.lt.s32.totalorder %s361_s29, %s361_s29 }
  0x41   : > { %p22862_p2 = scmp.lt.s32.totalorder %s22853_s15, %s22853_s15 }
  0x42   : > { %p22856_p12 = pnand %p22854_p11, %p23258_p7 }
  0x43   : > { %22640 = dma.hbm_to_vmem [thread:$0]  (!%p23252_p6), %s25396_s6, 128, %s404_s12, [#allocation13]  }
  0x44   : > { %p22857_p13 = pneg %p22856_p12  ;;  %p22863_p4 = por %p22862_p2, %p22861_p0 }
  0x46   : > { %p22864_p9 = pnand %p22863_p4, %p22857_p13 }
  0x48   : > { %22867 = shalt.err (!%p22864_p9)
}
  0x49   : > { %s25397_s26 = smov 128   ;;  %s25398_s2 = sld [smem:[#allocation30_spill]] }
  0x4a   : > { %s22879_s28 = scalar_lea.vmem %s387_s14, 256  ;;  %p22887_p12 = scmp.lt.s32.totalorder %s387_s14, %s387_s14 }
  0x4b   : > { %p22880_p8 = scmp.ne.s32.totalorder %s387_s14, %s22879_s28  ;;  %p22888_p0 = scmp.lt.s32.totalorder %s22879_s28, %s22879_s28 }
  0x4d   : > { %p22882_p10 = pnand %p22880_p8, %p23258_p7  ;;  %p22889_p13 = por %p22888_p0, %p22887_p12 }
  0x4f   : > { %22631 = dma.hbm_to_vmem [thread:$0]  (!%p23252_p6), %s25398_s2, 1024, %s361_s29, [#allocation7], %s25397_s26, %s25397_s26, %s25380_s16  }
  0x50   : > { %p22883_p11 = pneg %p22882_p10 }
  0x52   : > { %p22890_p2 = pnand %p22889_p13, %p22883_p11 }
  0x54   : > { %22893 = shalt.err (!%p22890_p2)
}
  0x55   : > { %s25399_s4 = sld [smem:[#allocation32_spill]]  ;;  %s23135_s29 = smov [#allocation14]  }
  0x56   : > { %s414_s30 = sshll.u32 %s23135_s29, 4  ;;  %s23136_s12 = smov [#allocation15]   ;;  %s415_s30 = int_to_ptr.vmem [resolvable:$true] %s414_s30 }
  0x57   : > { %s427_s25 = sshll.u32 %s23136_s12, 4  ;;  %s22905_s1 = scalar_lea.vmem %s415_s30, 128  ;;  %s428_s25 = int_to_ptr.vmem [resolvable:$true] %s427_s25 }
  0x58   : > { %p22906_p4 = scmp.ne.s32.totalorder %s415_s30, %s22905_s1  ;;  %p22913_p10 = scmp.lt.s32.totalorder %s415_s30, %s415_s30 }
  0x59   : > { %p22914_p11 = scmp.lt.s32.totalorder %s22905_s1, %s22905_s1 }
  0x5a   : > { %p22908_p9 = pnand %p22906_p4, %p23258_p7 }
  0x5b   : > { %22637 = dma.hbm_to_vmem [thread:$0]  (!%p23252_p6), %s25399_s4, 256, %s387_s14, [#allocation10], %s25397_s26, %s25397_s26, %s25380_s16  }
  0x5c   : > { %p22909_p8 = pneg %p22908_p9  ;;  %p22915_p12 = por %p22914_p11, %p22913_p10 }
  0x5e   : > { %p22916_p0 = pnand %p22915_p12, %p22909_p8 }
  0x60   : > { %22919 = shalt.err (!%p22916_p0)
}
  0x61   : > { %s25400_s7 = sld [smem:[#allocation34_spill]]  ;;  %s22931_s14 = scalar_lea.vmem %s428_s25, 256 }
  0x62   : > { %p22932_p13 = scmp.ne.s32.totalorder %s428_s25, %s22931_s14  ;;  %p22939_p4 = scmp.lt.s32.totalorder %s428_s25, %s428_s25 }
  0x63   : > { %p22940_p9 = scmp.lt.s32.totalorder %s22931_s14, %s22931_s14 }
  0x64   : > { %p22934_p2 = pnand %p22932_p13, %p23258_p7 }
  0x65   : > { %p22941_p1 = por %p22940_p9, %p22939_p4 }
  0x66   : > { %p22935_p5 = pneg %p22934_p2 }
  0x67   : > { %22643 = dma.hbm_to_vmem [thread:$0]  (!%p23252_p6), %s25400_s7, 128, %s415_s30, [#allocation13]  }
  0x68   : > { %p22942_p3 = pnand %p22941_p1, %p22935_p5 }
  0x6a   : > { %22945 = shalt.err (!%p22942_p3)
}
  0x6b   : > { %s25401_s8 = sld [smem:[#allocation35_spill]]  ;;  %s25381_s27 = sadd.s32 4294967294, %s23126_s22  }
  0x6c   : > { %s47_s13 = sadd.s32 1, %s23122_s21  ;;  %s54_s29 = sadd.s32 1, %s23114_s19 }
  0x6d   : > { %p49_p1 = scmp.ge.s32.totalorder %s47_s13, 2  ;;  %p61_p3 = scmp.ne.s32.totalorder %s23114_s19, %s23110_s18 }
  0x6e   : > { %p62_p5 = scmp.eq.s32.totalorder %s23126_s22, 0  ;;  %p67_p7 = scmp.ne.s32.totalorder %s23110_s18, %s23106_s17 }
  0x6f   : > { %s25429_s13 = smov (%p49_p1, %s47_s13), 0  ;;  %p25404_p10 = scmp.eq.s32.totalorder %s23238_s23, 0 }
  0x70   : > { %25402 = sst [smem:[#allocation28_spill]] %s25429_s13  ;;  %p23336_p8 = por %p62_p5, %p61_p3 }
  0x71   : > { %22646 = dma.hbm_to_vmem [thread:$0]  (!%p23252_p6), %s25401_s8, 256, %s428_s25, [#allocation16], %s25397_s26, %s25397_s26, %s25380_s16  }
  0x72   : > { %p23342_p6 = por %p25404_p10, %p67_p7  ;;  %s51_s25 = ssub.s32 %s23122_s21, %s25429_s13 }
  0x73   : > { %p266_p11 = scmp.eq.s32.totalorder %s23238_s23, 1  ;;  %p52_p12 = scmp.eq.s32.totalorder %s51_s25, 0 }
  0x74   : > { %p272_p0 = scmp.eq.s32.totalorder %s25381_s27, 1  ;;  %p22668_p2 = scmp.lt.s32.totalorder %s23126_s22, 2 }
  0x75   : > { %p23351_p13 = por %p266_p11, %p61_p3  ;;  %s441_s1 = sand.u32 1, %s23114_s19  }
  0x76   : > { %s23357_s15 = scalar_select %p52_p12, %s23114_s19, %s54_s29  }
  0x77   : > { %p23359_p4 = por %p272_p0, %p67_p7  ;;  %s20543_s11 = sshll.u32 %s441_s1, 4 }
  0x78   : > { %s20581_s16 = sshll.u32 %s23122_s21, 8  ;;  %s445_s4 = scalar_lea.vmem [#allocation3], %s20543_s11 }
  0x79   : > { %s451_s25 = scalar_lea.hbm %s25363_s0, %s20581_s16  ;;  %s452_s27 = sshll.u32 %s445_s4, 4  ;;  %s453_s27 = int_to_ptr.vmem [resolvable:$true] %s452_s27 }
  0x7a   : > { %p23370_p9 = pnand %p22668_p2, %p23336_p8  ;;  %s442_s29 = scalar_lea.sflag [#allocation4], %s441_s1 }
  0x7b   : > { %s22959_s7 = scalar_lea.vmem %s453_s27, 256  ;;  %s23137_s8 = smov [#allocation3]  }
  0x7c   : > { %p22948_p1 = pneg %p23370_p9  ;;  %p22960_p3 = scmp.ne.s32.totalorder %s453_s27, %s22959_s7 }
  0x7d   : > { %s22964_s13 = sshll.u32 %s23137_s8, 4  ;;  %s22965_s13 = int_to_ptr.vmem [resolvable:$false] %s22964_s13 }
  0x7e   : > { %p22962_p5 = pnand %p22960_p3, %p22948_p1  ;;  %s22966_s2 = scalar_lea.vmem %s22965_s13, 512 }
  0x7f   : > { %p22967_p10 = scmp.lt.s32.totalorder %s453_s27, %s22965_s13  ;;  %p22968_p11 = scmp.lt.s32.totalorder %s22966_s2, %s22959_s7 }
  0x80   : > { %p22963_p7 = pneg %p22962_p5 }
  0x81   : > { %p22969_p12 = por %p22968_p11, %p22967_p10 }
  0x83   : > { %p22970_p0 = pnand %p22969_p12, %p22963_p7 }
  0x85   : > { %22973 = shalt.err (!%p22970_p0)
}
  0x86   : > { %s25409_s3 = smov 8   ;;  %p25410_p8 = scmp.ne.s32.totalorder %s25391_s24, 0 }
  0x87   : > { %22650 = dma.hbm_to_vmem [thread:$0]  (!%p23370_p9), %s451_s25, 256, %s453_s27, %s442_s29, %s25397_s26, %s25397_s26, %s25409_s3  }
  0x88   : > { %464 = sbr.rel (%p25410_p8) target bundleno = 1819 (0x71b), region = 56  ;;  %s23384_s4 = sand.u32 (!%p25410_p8), 1, %s23110_s18  }
  0x89   : > { %s23387_s8 = sshll.u32 (!%p25410_p8), %s23384_s4, 4  ;;  %s467_s7 = scalar_lea.sflag (!%p25410_p8), [#allocation4], %s23384_s4 }
  0x8a   : > { %s470_s16 = scalar_lea.vmem (!%p25410_p8), [#allocation3], %s23387_s8 }
  0x8d   : > { %23077 = dma.done.wait (%p23342_p6), %s467_s7, 256  }
  0x8e   : > { %23079 = vsyncadd (%p23342_p6), %s467_s7, 4294967040  ;;  %p25411_p2 = scmp.eq.s32.totalorder %s23238_s23, 0 }
  0x90   : > { %23081 = dma.done.wait (%p25411_p2), [#allocation7], 2048   ;;  %p25412_p9 = pmov %p25411_p2 }
  0x91   : > { %p25413_p1 = pmov %p25411_p2 }
  0x92   : > { %23083 = vsyncadd (%p25412_p9), [#allocation7], 4294965248 }
  0x93   : > { %23085 = dma.done.wait (%p25413_p1), [#allocation10], 512   ;;  %p25414_p3 = pmov %p25413_p1 }
  0x94   : > { %p25415_p5 = pmov %p25413_p1 }
  0x95   : > { %23087 = vsyncadd (%p25414_p3), [#allocation10], 4294966784 }
  0x96   : > { %23089 = dma.done.wait (%p25415_p5), [#allocation13], 256   ;;  %p25416_p7 = pmov %p25413_p1 }
  0x97   : > { %p25417_p6 = pmov %p25413_p1 }
  0x98   : > { %23091 = vsyncadd (%p25416_p7), [#allocation13], 4294967040 }
  0x99   : > { %23093 = dma.done.wait (%p25417_p6), [#allocation16], 256   ;;  %p25418_p10 = pmov %p25413_p1 }
  0x9a   : > { %vm559_vm0 = vcmask 130048   ;;  %v556_v0 = vld [vmem:[%s470_s16 + $0x8] sm:$0xff]  ;;  %v555_v1 = vld [vmem:[%s470_s16] sm:$0xff]  ;;  %s23138_s6 = smov 8   ;;  %s23139_s24 = smov 120   ;;  %vm23141_vm1 = vmmov 0  }
  0x9b   : > { %23095 = vsyncadd (%p25418_p10), [#allocation16], 4294967040  ;;  %v557_v2 = vld [vmem:[#allocation9] sm:$0xff]  ;;  %v595_v3 = vand.u32 4294901760, %v556_v0  ;;  %v598_v4 = vand.u32 4294901760, %v555_v1  ;;  %v558_v6 = vld [vmem:[#allocation9 + $0x8] sm:$0xff] }
  0x9c   : > { %v561_v5 = vsel %vm559_vm0, %v557_v2, 0  ;;  %v564_v8 = vsel %vm559_vm0, %v558_v6, 0  ;;  %v1069_v26 = vld [vmem:[#allocation11 + $0x8] sm:$0xff]  ;;  %v1068_v28 = vld [vmem:[#allocation11] sm:$0xff]  ;;  %vm1601_vm2 = vcmask 64512   ;;  %vm3393_vm3 = vcmask 261120  }
  0x9d   : > { %v633_v7 = vand.u32 4294901760, %v561_v5  ;;  %21209 = vmatprep.subr.mxu0 %v595_v3  ;;  %v683_v9 = vsub.f32 %v556_v0, %v595_v3  ;;  %v643_v10 = vand.u32 4294901760, %v564_v8  ;;  %v690_v12 = vsub.f32 %v555_v1, %v598_v4  ;;  %s23142_s11 = smov 112   ;;  %s25207_s25 = scalar_lea.vmem [#allocation17], %s23387_s8 }
  0x9e   : > { %21210 = vmatpush3.msra.mxu0 %v595_v3  ;;  %v1105_v27 = vand.u32 4294901760, %v1069_v26  ;;  %v23415_v30 = vand.u32 4294901760, %v1068_v28  ;;  %s539_s29 = scalar_lea.vmem [#allocation18], %s23387_s8  ;;  %s20255_s2 = sand.u32 1, %s23238_s23  }
  0x9f   : > { %v634_v11 = vsub.f32 %v561_v5, %v633_v7  ;;  %21220 = vmatprep.mubr.f32.mxu1 %v633_v7  ;;  %21211 = vmatprep.subr.mxu0 %v598_v4  ;;  %v684_v13 = vand.u32 4294901760, %v683_v9  ;;  %v644_v14 = vsub.f32 %v564_v8, %v643_v10  ;;  %v691_v16 = vand.u32 4294901760, %v690_v12  ;;  %s25226_s3 = sshll.u32 %s23118_s20, 8  ;;  %s20294_s26 = sshll.u32 %s539_s29, 4  ;;  %s25234_s26 = int_to_ptr.vmem [resolvable:$true] %s20294_s26 }
  0xa0   : > { %21212 = vmatpush3.msra.mxu0 %v598_v4  ;;  %v23413_v29 = vsub.f32 %v1069_v26, %v1105_v27  ;;  %v23421_v32 = vsub.f32 %v1068_v28, %v23415_v30  ;;  %v23140_v28 = vmov 0.0   ;;  %s25236_s27 = scalar_lea.sflag [#allocation19], %s20255_s2  ;;  %s22974_s13 = scalar_lea.vmem %s25234_s26, 256 }
  0xa1   : > { %v635_v15 = vand.u32 4294901760, %v634_v11  ;;  %v685_v17 = vsub.f32 %v683_v9, %v684_v13  ;;  %v645_v18 = vand.u32 4294901760, %v644_v14  ;;  %21223 = vmatprep.subr.mxu0 %v683_v9  ;;  %v692_v20 = vsub.f32 %v690_v12, %v691_v16  ;;  %p22975_p11 = scmp.ne.s32.totalorder %s25234_s26, %s22974_s13  ;;  %s23143_s20 = smov [#allocation18]  }
  0xa2   : > { %v23418_v31 = vand.u32 4294901760, %v23413_v29  ;;  %v23428_v34 = vand.u32 4294901760, %v23421_v32  ;;  %s22978_s23 = sshll.u32 %s23143_s20, 4  ;;  %s22979_s23 = int_to_ptr.vmem [resolvable:$false] %s22978_s23 }
  0xa3   : > { %v636_v19 = vsub.f32 %v634_v11, %v635_v15  ;;  %v686_v21 = vand.u32 4294901760, %v685_v17  ;;  %v646_v22 = vsub.f32 %v644_v14, %v645_v18  ;;  %v693_v24 = vand.u32 4294901760, %v692_v20  ;;  %p22976_p12 = pnand %p22975_p11, %p23351_p13  ;;  %s22980_s30 = scalar_lea.vmem %s22979_s23, 512 }
  0xa4   : > { %v1195_v33 = vsub.f32 %v23413_v29, %v23418_v31  ;;  %v1202_v36 = vsub.f32 %v23421_v32, %v23428_v34  ;;  %p22981_p8 = scmp.lt.s32.totalorder %s25234_s26, %s22979_s23  ;;  %p22982_p2 = scmp.lt.s32.totalorder %s22980_s30, %s22974_s13 }
  0xa5   : > { %v637_v23 = vand.u32 4294901760, %v636_v19  ;;  %21216 = vmatprep.subr.mxu1 %v686_v21  ;;  %v647_v25 = vand.u32 4294901760, %v646_v22  ;;  %p22977_p0 = pneg %p22976_p12 }
  0xa6   : > { %21217 = vmatpush3.msra.mxu1 %v686_v21  ;;  %v1196_v35 = vand.u32 4294901760, %v1195_v33  ;;  %v1203_v37 = vand.u32 4294901760, %v1202_v36  ;;  %p22983_p9 = por %p22982_p2, %p22981_p8 }
  0xa7   : > { %21213 = vmatprep.mubr.f32.mxu0 %v637_v23  ;;  %21218 = vmatprep.subr.mxu1 %v693_v24 }
  0xa8   : > { %21214 = vmatmul.mubr.f32.vlgmr.msra.gmra.mxu0 %v647_v25  ;;  %21219 = vmatpush3.msra.mxu1 %v693_v24  ;;  %v1600_v24 = vld [vmem:[#allocation12] sm:$0xff]  ;;  %p22984_p1 = pnand %p22983_p9, %p22977_p0 }
  0xa9   : > { %21224 = vmatpush3.msra.mxu0 %v683_v9  ;;  %21221 = vmatmul.mubr.f32.vlgmr.msra.gmra.mxu1 %v643_v10  ;;  %v23447_v25 = vand.u32 4294901760, %v1600_v24 }
  0xaa   : > { %21225 = vmatprep.subr.mxu0 %v690_v12  ;;  %21230 = vmatprep.subr.mxu1 %v595_v3 }
  0xab   : > { %21226 = vmatpush3.msra.mxu0 %v690_v12  ;;  %21227 = vmatprep.mubr.f32.mxu0 %v634_v11 }
  0xac   : > { %21231 = vmatpush3.msra.mxu1 %v595_v3  ;;  %21228 = vmatmul.mubr.f32.vlgmr.msra.gmra.mxu0 %v644_v14 }
  0xad   : > { %21232 = vmatprep.subr.mxu1 %v598_v4  ;;  %21237 = vmatprep.subr.mxu0 %v684_v13 }
  0xae   : > { %21233 = vmatpush3.msra.mxu1 %v598_v4  ;;  %21234 = vmatprep.mubr.f32.mxu1 %v635_v15 }
  0xaf   : > { %21238 = vmatpush3.msra.mxu0 %v684_v13  ;;  %21235 = vmatmul.mubr.f32.vlgmr.msra.gmra.mxu1 %v645_v18 }
  0xb0   : > { %21239 = vmatprep.subr.mxu0 %v691_v16  ;;  %21244 = vmatprep.subr.mxu1 %v595_v3 }
  0xb1   : > { %21240 = vmatpush3.msra.mxu0 %v691_v16  ;;  %21241 = vmatprep.mubr.f32.mxu0 %v633_v7 }
  0xb2   : > { %21245 = vmatpush3.msra.mxu1 %v595_v3  ;;  %21242 = vmatmul.mubr.f32.vlgmr.msra.gmra.mxu0 %v643_v10 }
  0xb3   : > { %21246 = vmatprep.subr.mxu1 %v598_v4  ;;  %21248 = vmatprep.mubr.f32.mxu1 %v633_v7 }
  0xb4   : > { %21247 = vmatpush3.msra.mxu1 %v598_v4  ;;  %21251 = vmatprep.subr.mxu0 %v1105_v27 }
  0xb5   : > { %21249 = vmatmul.mubr.f32.vlgmr.msra.gmra.mxu1 %v643_v10  ;;  %21252 = vmatpush3.msra.mxu0 %v1105_v27 }
  0xb6   : > { %21253 = vmatprep.subr.mxu0 %v23415_v30  ;;  %21258 = vmatprep.subr.mxu1 %v1196_v35 }
  0xb7   : > { %21254 = vmatpush3.msra.mxu0 %v23415_v30  ;;  %21259 = vmatpush3.msra.mxu1 %v1196_v35 }
  0xb8   : > { %21265 = vmatprep.subr.mxu0 %v23413_v29  ;;  %21260 = vmatprep.subr.mxu1 %v1203_v37 }
  0xb9   : > { %21261 = vmatpush3.msra.mxu1 %v1203_v37 }
  0xba   : > { %21272 = vmatprep.subr.mxu1 %v1105_v27 }
 0x168   : > { %v21215_v38 = vpop.f32.mrf.mxu0 }
 0x169   : > { %v21222_v40 = vpop.f32.mrf.mxu1 }
 0x16a   : > { %v639_v39 = vpop.f32.mrf.mxu0  ;;  %v737_v41 = vadd.f32 %v21222_v40, %v21215_v38 }
 0x16b   : > { %v730_v42 = vpop.f32.mrf.mxu1 }
 0x16c   : > { %v731_v43 = vadd.f32 %v730_v42, %v639_v39  ;;  %v21229_v44 = vpop.f32.mrf.mxu0  ;;  %v1599_v39 = vld [vmem:[%s25368_s5] sm:$0xff] }
 0x16d   : > { %v820_v45 = vadd.f32 %v21229_v44, %v737_v41  ;;  %v23472_v41 = vand.u32 4294901760, %v1599_v39  ;;  %v1588_v44 = vld [vmem:[#allocation8] sm:$0xff] }
 0x16e   : > { %v812_v46 = vpop.f32.mrf.mxu0 }
 0x16f   : > { %v813_v47 = vadd.f32 %v812_v46, %v731_v43  ;;  %v21236_v48 = vpop.f32.mrf.mxu1  ;;  %v1587_v43 = vld [vmem:[#allocation6] sm:$0xff]  ;;  %v5205_v46 = vld [vmem:[#allocation8 + $0x10] sm:$0xff] }
 0x170   : > { %v903_v49 = vadd.f32 %v21236_v48, %v820_v45  ;;  %v5203_v45 = vld [vmem:[#allocation6 + $0x10] sm:$0xff]  ;;  %v7011_v48 = vld [vmem:[#allocation8 + $0x18] sm:$0xff] }
 0x171   : > { %v894_v50 = vpop.f32.mrf.mxu1 }
 0x172   : > { %v895_v51 = vadd.f32 %v894_v50, %v813_v47  ;;  %v21243_v52 = vpop.f32.mrf.mxu0  ;;  %v7009_v47 = vld [vmem:[#allocation6 + $0x18] sm:$0xff] }
 0x173   : > { %v986_v53 = vadd.f32 %v21243_v52, %v903_v49  ;;  %v23477_v49 = vsub.f32 %v1599_v39, %v23472_v41 }
 0x174   : > { %v979_v54 = vpop.f32.mrf.mxu0 }
 0x175   : > { %v21250_v55 = vpop.f32.mrf.mxu1  ;;  %v980_v56 = vadd.f32 %v979_v54, %v895_v51 }
 0x176   : > { %v1065_v57 = vadd.f32 %v21250_v55, %v986_v53 }
 0x177   : > { %v1058_v58 = vpop.f32.mrf.mxu1 }
 0x178   : > { %v1074_v59 = vsel %vm559_vm0, %v1065_v57, 0  ;;  %v1059_v60 = vadd.f32 %v1058_v58, %v980_v56 }
 0x179   : > { %v1153_v61 = vand.u32 4294901760, %v1074_v59 }
 0x17a   : > { %v1071_v62 = vsel %vm559_vm0, %v1059_v60, 0 }
 0x17b   : > { %v1154_v63 = vsub.f32 %v1074_v59, %v1153_v61  ;;  %v1143_v0 = vand.u32 4294901760, %v1071_v62 }
 0x17d   : > { %v1144_v1 = vsub.f32 %v1071_v62, %v1143_v0  ;;  %21262 = vmatprep.mubr.f32.mxu1 %v1143_v0  ;;  %v1155_v2 = vand.u32 4294901760, %v1154_v63 }
 0x17e   : > { %21263 = vmatmul.mubr.f32.vlgmr.msra.gmra.mxu1 %v1153_v61 }
 0x17f   : > { %21273 = vmatpush3.msra.mxu1 %v1105_v27  ;;  %v1145_v3 = vand.u32 4294901760, %v1144_v1  ;;  %v1156_v4 = vsub.f32 %v1154_v63, %v1155_v2 }
 0x180   : > { %21274 = vmatprep.subr.mxu1 %v23415_v30 }
 0x181   : > { %21275 = vmatpush3.msra.mxu1 %v23415_v30  ;;  %21276 = vmatprep.mubr.f32.mxu1 %v1145_v3  ;;  %v1146_v5 = vsub.f32 %v1144_v1, %v1145_v3  ;;  %v1157_v7 = vand.u32 4294901760, %v1156_v4 }
 0x182   : > { %21277 = vmatmul.mubr.f32.vlgmr.msra.gmra.mxu1 %v1155_v2  ;;  %21286 = vmatprep.subr.mxu1 %v1105_v27 }
 0x183   : > { %21287 = vmatpush3.msra.mxu1 %v1105_v27  ;;  %21290 = vmatprep.mubr.f32.mxu1 %v1143_v0  ;;  %v1147_v6 = vand.u32 4294901760, %v1146_v5  ;;  %v23450_v27 = vsub.f32 %v1600_v24, %v23447_v25 }
 0x184   : > { %21288 = vmatprep.subr.mxu1 %v23415_v30 }
 0x185   : > { %21255 = vmatprep.mubr.f32.mxu0 %v1147_v6  ;;  %21289 = vmatpush3.msra.mxu1 %v23415_v30 }
 0x186   : > { %21256 = vmatmul.mubr.f32.vlgmr.msra.gmra.mxu0 %v1157_v7  ;;  %21291 = vmatmul.mubr.f32.vlgmr.msra.gmra.mxu1 %v1153_v61  ;;  %v23497_v7 = vand.u32 4294901760, %v23477_v49 }
 0x187   : > { %21266 = vmatpush3.msra.mxu0 %v23413_v29  ;;  %21269 = vmatprep.mubr.f32.mxu0 %v1144_v1  ;;  %v23454_v29 = vand.u32 4294901760, %v23450_v27 }
 0x188   : > { %21267 = vmatprep.subr.mxu0 %v23421_v32  ;;  %21298 = vmatprep.subr.mxu1 %v23140_v28 }
 0x189   : > { %21268 = vmatpush3.msra.mxu0 %v23421_v32  ;;  %21300 = vmatprep.mubr.msk.f32.mxu1 %vm23141_vm1, %v23140_v28  ;;  %v1715_v32 = vsub.f32 %v23450_v27, %v23454_v29 }
 0x18a   : > { %21270 = vmatmul.mubr.f32.vlgmr.msra.gmra.mxu0 %v1154_v63  ;;  %21279 = vmatprep.subr.mxu0 %v23418_v31 }
 0x18b   : > { %21280 = vmatpush3.msra.mxu0 %v23418_v31  ;;  %21283 = vmatprep.mubr.f32.mxu0 %v1143_v0  ;;  %v23465_v33 = vand.u32 4294901760, %v1715_v32 }
 0x18c   : > { %21281 = vmatprep.subr.mxu0 %v23428_v34 }
 0x18d   : > { %21282 = vmatpush3.msra.mxu0 %v23428_v34  ;;  %21299 = vmatpush3.msra.mxu1 %v23465_v33 }
 0x18e   : > { %21284 = vmatmul.mubr.f32.vlgmr.msra.gmra.mxu0 %v1153_v61  ;;  %21293 = vmatprep.subr.mxu0 %v23140_v28 }
 0x18f   : > { %21295 = vmatprep.mubr.msk.f32.mxu0 %vm23141_vm1, %v23140_v28  ;;  %21294 = vmatpush3.msra.mxu0 %v23447_v25 }
 0x190   : > { %21303 = vmatprep.subr.mxu0 %v23140_v28  ;;  %21308 = vmatprep.subr.mxu1 %v23140_v28 }
 0x23e   : > { %v21264_v8 = vpop.f32.mrf.mxu1 }
 0x240   : > { %v1240_v9 = vpop.f32.mrf.mxu1 }
 0x242   : > { %v21278_v11 = vpop.f32.mrf.mxu1 }
 0x244   : > { %v1404_v16 = vpop.f32.mrf.mxu1 }
 0x246   : > { %v21257_v10 = vpop.f32.mrf.mxu0  ;;  %v21292_v21 = vpop.f32.mrf.mxu1 }
 0x247   : > { %v1247_v13 = vadd.f32 %v21264_v8, %v21257_v10 }
 0x248   : > { %v1149_v12 = vpop.f32.mrf.mxu0  ;;  %v1568_v35 = vpop.f32.mrf.mxu1 }
 0x249   : > { %v1241_v23 = vadd.f32 %v1240_v9, %v1149_v12 }
 0x24a   : > { %v21271_v14 = vpop.f32.mrf.mxu0 }
 0x24b   : > { %v1330_v15 = vadd.f32 %v21271_v14, %v1247_v13 }
 0x24c   : > { %v1322_v17 = vpop.f32.mrf.mxu0 }
 0x24d   : > { %v1413_v18 = vadd.f32 %v21278_v11, %v1330_v15  ;;  %v1323_v26 = vadd.f32 %v1322_v17, %v1241_v23  ;;  %v8815_v17 = vld [vmem:[#allocation6 + $0x20] sm:$0xff] }
 0x24e   : > { %v21285_v19 = vpop.f32.mrf.mxu0 }
 0x24f   : > { %v1496_v20 = vadd.f32 %v21285_v19, %v1413_v18  ;;  %v1405_v30 = vadd.f32 %v1404_v16, %v1323_v26  ;;  %v2164_v16 = vsub.f32 %v23477_v49, %v23497_v7  ;;  %v8817_v19 = vld [vmem:[#allocation8 + $0x20] sm:$0xff]  ;;  %v12427_v26 = vld [vmem:[#allocation6 + $0x30] sm:$0xff] }
 0x250   : > { %v1489_v31 = vpop.f32.mrf.mxu0 }
 0x251   : > { %v1575_v22 = vadd.f32 %v21292_v21, %v1496_v20  ;;  %v1490_v34 = vadd.f32 %v1489_v31, %v1405_v30  ;;  %v10621_v20 = vld [vmem:[#allocation6 + $0x28] sm:$0xff]  ;;  %v23539_v24 = vand.u32 4294901760, %v2164_v16  ;;  %v12429_v30 = vld [vmem:[#allocation8 + $0x30] sm:$0xff]  ;;  %v14235_v31 = vld [vmem:[#allocation8 + $0x38] sm:$0xff] }
 0x252   : > { %v10623_v21 = vld [vmem:[#allocation8 + $0x28] sm:$0xff] }
 0x253   : > { %1583 = vrot.lane.b32.xlu0 %v1575_v22, %s23138_s6  ;;  %v1569_v36 = vadd.f32 %v1568_v35, %v1490_v34 }
 0x257   : > { %1579 = vrot.lane.b32.xlu0 %v1575_v22, %s23139_s24 }
 0x2c5   : > { %v1584_v37 = vpop.permute.xlu0 %1583 }
 0x2c6   : > { %v1586_v38 = vadd.f32 %v1584_v37, %v1569_v36 }
 0x2c8   : > { %1591 = vrot.lane.b32.xlu1 %v1586_v38, %s23139_s24  ;;  %s25232_s24 = scalar_lea.hbm %s25373_s10, %s25226_s3 }
 0x2c9   : > { %v1580_v40 = vpop.permute.xlu0 %1579 }
 0x2ca   : > { %v23474_v42 = vsub.f32 %v1569_v36, %v1580_v40 }
 0x2cc   : > { %v1597_v51 = vmul.f32 %v1588_v44, %v23474_v42  ;;  %v1589_v52 = vmul.f32 %v1587_v43, %v23474_v42  ;;  %v5210_v53 = vmul.f32 %v5205_v46, %v23474_v42  ;;  %v5206_v54 = vmul.f32 %v5203_v45, %v23474_v42 }
 0x2cd   : > { %v7016_v57 = vmul.f32 %v7011_v48, %v23474_v42  ;;  %v7012_v58 = vmul.f32 %v7009_v47, %v23474_v42  ;;  %v8822_v32 = vmul.f32 %v8817_v19, %v23474_v42  ;;  %v8818_v34 = vmul.f32 %v8815_v17, %v23474_v42 }
 0x2ce   : > { %v10628_v35 = vmul.f32 %v10623_v21, %v23474_v42  ;;  %v10624_v36 = vmul.f32 %v10621_v20, %v23474_v42 }
 0x33a   : > { %v23479_v50 = vpop.permute.xlu1 %1591 }
 0x33b   : > { %v1596_v55 = vmul.f32 %v23479_v50, %v1587_v43  ;;  %v1594_v56 = vmul.f32 %v23479_v50, %v1588_v44  ;;  %v5209_v59 = vmul.f32 %v5203_v45, %v23479_v50  ;;  %v5207_v60 = vmul.f32 %v5205_v46, %v23479_v50 }
 0x33c   : > { %v7015_v61 = vmul.f32 %v7009_v47, %v23479_v50  ;;  %v7013_v62 = vmul.f32 %v7011_v48, %v23479_v50  ;;  %v8821_v37 = vmul.f32 %v8815_v17, %v23479_v50  ;;  %v8819_v38 = vmul.f32 %v8817_v19, %v23479_v50 }
 0x33d   : > { %v1598_v63 = vadd.f32 %v1597_v51, %v1596_v55  ;;  %v1595_v0 = vsub.f32 %v1589_v52, %v1594_v56  ;;  %v5211_v1 = vadd.f32 %v5210_v53, %v5209_v59  ;;  %v5208_v2 = vsub.f32 %v5206_v54, %v5207_v60  ;;  %v2500_v51 = vld [vmem:[#allocation14] sm:$0xff]  ;;  %v14233_v55 = vld [vmem:[#allocation6 + $0x38] sm:$0xff] }
 0x33e   : > { %v7017_v3 = vadd.f32 %v7016_v57, %v7015_v61  ;;  %v7014_v4 = vsub.f32 %v7012_v58, %v7013_v62  ;;  %v10627_v39 = vmul.f32 %v10621_v20, %v23479_v50  ;;  %v12434_v43 = vmul.f32 %v12429_v30, %v23474_v42 }
 0x33f   : > { %v1603_v5 = vsel %vm1601_vm2, %v1598_v63, 0  ;;  %v2052_v8 = vsel %vm1601_vm2, %v1595_v0, 0  ;;  %v23501_v9 = vsel %vm1601_vm2, %v5211_v1, 0  ;;  %v23504_v10 = vsel %vm1601_vm2, %v5208_v2, 0 }
 0x340   : > { %v23494_v6 = vand.u32 4294901760, %v1603_v5  ;;  %v23507_v11 = vsel %vm1601_vm2, %v7017_v3, 0  ;;  %v23510_v12 = vsel %vm1601_vm2, %v7014_v4, 0  ;;  %v23519_v14 = vand.u32 4294901760, %v2052_v8 }
 0x341   : > { %v12430_v44 = vmul.f32 %v12427_v26, %v23474_v42  ;;  %v14240_v45 = vmul.f32 %v14235_v31, %v23474_v42  ;;  %v8823_v46 = vadd.f32 %v8822_v32, %v8821_v37  ;;  %v8820_v47 = vsub.f32 %v8818_v34, %v8819_v38 }
 0x342   : > { %21301 = vmatmul.mubr.f32.vlgmr.msra.gmra.mxu1 %v23494_v6  ;;  %v23514_v13 = vsub.f32 %v1603_v5, %v23494_v6  ;;  %v23534_v22 = vsub.f32 %v2052_v8, %v23519_v14  ;;  %v10629_v48 = vadd.f32 %v10628_v35, %v10627_v39  ;;  %v10625_v52 = vmul.f32 %v10623_v21, %v23479_v50 }
 0x343   : > { %21309 = vmatpush3.msra.mxu1 %v23447_v25  ;;  %21310 = vmatprep.mubr.msk.f32.mxu1 %vm23141_vm1, %v23140_v28  ;;  %v12433_v53 = vmul.f32 %v12427_v26, %v23479_v50  ;;  %v12431_v54 = vmul.f32 %v12429_v30, %v23479_v50  ;;  %v23570_v56 = vsel %vm1601_vm2, %v8823_v46, 0  ;;  %v23573_v57 = vsel %vm1601_vm2, %v8820_v47, 0  ;;  %v3397_v30 = vld [vmem:[#allocation6 + $0x8] sm:$0xff] }
 0x344   : > { %v23522_v15 = vand.u32 4294901760, %v23514_v13  ;;  %21318 = vmatprep.subr.mxu1 %v23140_v28  ;;  %v23554_v40 = vand.u32 4294901760, %v23534_v22  ;;  %v23576_v58 = vsel %vm1601_vm2, %v10629_v48, 0  ;;  %v14239_v59 = vmul.f32 %v14233_v55, %v23479_v50 }
 0x345   : > { %v10626_v61 = vsub.f32 %v10624_v36, %v10625_v52  ;;  %v23587_v62 = vand.u32 4294901760, %v2500_v51  ;;  %v12435_v63 = vadd.f32 %v12434_v43, %v12433_v53  ;;  %v12432_v0 = vsub.f32 %v12430_v44, %v12431_v54 }
 0x346   : > { %21311 = vmatmul.mubr.f32.vlgmr.msra.gmra.mxu1 %v23522_v15  ;;  %v1674_v18 = vsub.f32 %v23514_v13, %v23522_v15  ;;  %v2123_v60 = vsub.f32 %v23534_v22, %v23554_v40  ;;  %v14241_v1 = vadd.f32 %v14240_v45, %v14239_v59  ;;  %v14237_v17 = vmul.f32 %v14235_v31, %v23479_v50  ;;  %v3399_v31 = vld [vmem:[#allocation8 + $0x8] sm:$0xff] }
 0x347   : > { %21319 = vmatpush3.msra.mxu1 %v23447_v25  ;;  %21320 = vmatprep.mubr.msk.f32.mxu1 %vm23141_vm1, %v23140_v28  ;;  %v23592_v2 = vsel %vm1601_vm2, %v10626_v61, 0  ;;  %v23597_v3 = vsel %vm1601_vm2, %v12435_v63, 0  ;;  %v23600_v4 = vsel %vm1601_vm2, %v12432_v0, 0  ;;  %v23614_v16 = vsub.f32 %v2500_v51, %v23587_v62 }
 0x348   : > { %v23536_v23 = vand.u32 4294901760, %v1674_v18  ;;  %21328 = vmatprep.subr.mxu1 %v23140_v28  ;;  %v23603_v5 = vsel %vm1601_vm2, %v14241_v1, 0  ;;  %v23611_v8 = vand.u32 4294901760, %v2123_v60  ;;  %v14236_v18 = vmul.f32 %v14233_v55, %v23474_v42 }
 0x349   : > { %v23629_v20 = vand.u32 4294901760, %v23614_v16  ;;  %v3403_v32 = vmul.f32 %v3397_v30, %v23479_v50  ;;  %v3404_v34 = vmul.f32 %v3399_v31, %v23474_v42  ;;  %v3400_v37 = vmul.f32 %v3397_v30, %v23474_v42 }
 0x34a   : > { %21296 = vmatmul.mubr.f32.vlgmr.msra.gmra.mxu0 %v23536_v23  ;;  %21321 = vmatmul.mubr.f32.vlgmr.msra.gmra.mxu1 %v23494_v6  ;;  %v14238_v19 = vsub.f32 %v14236_v18, %v14237_v17  ;;  %v23818_v46 = vand.u32 4294901760, %v23501_v9  ;;  %v23858_v51 = vand.u32 4294901760, %v23504_v10  ;;  %v23953_v59 = vand.u32 4294901760, %v23507_v11 }
 0x34b   : > { %21304 = vmatpush3.msra.mxu0 %v23450_v27  ;;  %21305 = vmatprep.mubr.msk.f32.mxu0 %vm23141_vm1, %v23140_v28  ;;  %v3057_v26 = vsub.f32 %v23614_v16, %v23629_v20  ;;  %v3405_v36 = vadd.f32 %v3404_v34, %v3403_v32  ;;  %v23993_v61 = vand.u32 4294901760, %v23510_v12  ;;  %v24105_v17 = vand.u32 4294901760, %v23570_v56 }
 0x34c   : > { %21329 = vmatpush3.msra.mxu1 %v23539_v24  ;;  %21330 = vmatprep.mubr.msk.f32.mxu1 %vm23141_vm1, %v23140_v28  ;;  %v23634_v21 = vsel %vm1601_vm2, %v14238_v19, 0  ;;  %v23831_v47 = vsub.f32 %v23501_v9, %v23818_v46  ;;  %v23872_v53 = vsub.f32 %v23504_v10, %v23858_v51  ;;  %v23966_v60 = vsub.f32 %v23507_v11, %v23953_v59 }
 0x34d   : > { %21313 = vmatprep.subr.mxu0 %v23140_v28  ;;  %21338 = vmatprep.subr.mxu1 %v23140_v28  ;;  %v23658_v35 = vand.u32 4294901760, %v3057_v26  ;;  %v24007_v0 = vsub.f32 %v23510_v12, %v23993_v61  ;;  %v8825_v12 = vld [vmem:[#allocation12] sm:$0xff]  ;;  %v24123_v19 = vsub.f32 %v23570_v56, %v24105_v17  ;;  %v24158_v34 = vand.u32 4294901760, %v23573_v57 }
 0x34e   : > { %21306 = vmatmul.mubr.f32.vlgmr.msra.gmra.mxu0 %v23514_v13  ;;  %21331 = vmatmul.mubr.f32.vlgmr.msra.gmra.mxu1 %v23519_v14  ;;  %v23843_v9 = vand.u32 4294901760, %v23831_v47  ;;  %v5734_v10 = vand.u32 4294901760, %v23872_v53  ;;  %v23978_v11 = vand.u32 4294901760, %v23966_v60 }
 0x34f   : > { %21314 = vmatpush3.msra.mxu0 %v23454_v29  ;;  %21315 = vmatprep.mubr.msk.f32.mxu0 %vm23141_vm1, %v23140_v28  ;;  %v24138_v56 = vand.u32 4294901760, %v24123_v19 }
 0x350   : > { %21339 = vmatpush3.msra.mxu1 %v23472_v41  ;;  %21340 = vmatprep.mubr.msk.f32.mxu1 %vm23141_vm1, %v23140_v28  ;;  %v5286_v48 = vsub.f32 %v23831_v47, %v23843_v9  ;;  %v5735_v54 = vsub.f32 %v23872_v53, %v5734_v10 }
 0x351   : > { %21323 = vmatprep.subr.mxu0 %v23140_v28  ;;  %21348 = vmatprep.subr.mxu1 %v23140_v28 }
 0x352   : > { %21316 = vmatmul.mubr.f32.vlgmr.msra.gmra.mxu0 %v23494_v6  ;;  %21341 = vmatmul.mubr.f32.vlgmr.msra.gmra.mxu1 %v23554_v40  ;;  %v5287_v52 = vand.u32 4294901760, %v5286_v48  ;;  %v5736_v55 = vand.u32 4294901760, %v5735_v54 }
 0x353   : > { %21324 = vmatpush3.msra.mxu0 %v23472_v41  ;;  %21325 = vmatprep.mubr.msk.f32.mxu0 %vm23141_vm1, %v23140_v28 }
 0x354   : > { %21349 = vmatpush3.msra.mxu1 %v23472_v41  ;;  %21350 = vmatprep.mubr.msk.f32.mxu1 %vm23141_vm1, %v23140_v28 }
 0x355   : > { %21333 = vmatprep.subr.mxu0 %v23140_v28  ;;  %21358 = vmatprep.subr.mxu1 %v23140_v28 }
 0x356   : > { %21326 = vmatmul.mubr.f32.vlgmr.msra.gmra.mxu0 %v23611_v8  ;;  %21351 = vmatmul.mubr.f32.vlgmr.msra.gmra.mxu1 %v23519_v14 }
 0x357   : > { %21334 = vmatpush3.msra.mxu0 %v23477_v49  ;;  %21335 = vmatprep.mubr.msk.f32.mxu0 %vm23141_vm1, %v23140_v28 }
 0x358   : > { %21359 = vmatpush3.msra.mxu1 %v23539_v24  ;;  %21360 = vmatprep.mubr.msk.f32.mxu1 %vm23141_vm1, %v23140_v28 }
 0x359   : > { %21343 = vmatprep.subr.mxu0 %v23140_v28  ;;  %21368 = vmatprep.subr.mxu1 %v23140_v28 }
 0x35a   : > { %21336 = vmatmul.mubr.f32.vlgmr.msra.gmra.mxu0 %v23534_v22  ;;  %21361 = vmatmul.mubr.f32.vlgmr.msra.gmra.mxu1 %v23494_v6 }
 0x35b   : > { %21344 = vmatpush3.msra.mxu0 %v23497_v7  ;;  %21345 = vmatprep.mubr.msk.f32.mxu0 %vm23141_vm1, %v23140_v28 }
 0x35c   : > { %21369 = vmatpush3.msra.mxu1 %v23472_v41  ;;  %21370 = vmatprep.mubr.msk.f32.mxu1 %vm23141_vm1, %v23140_v28 }
 0x35d   : > { %21353 = vmatprep.subr.mxu0 %v23140_v28  ;;  %21378 = vmatprep.subr.mxu1 %v23140_v28 }
 0x35e   : > { %21346 = vmatmul.mubr.f32.vlgmr.msra.gmra.mxu0 %v23519_v14  ;;  %21371 = vmatmul.mubr.f32.vlgmr.msra.gmra.mxu1 %v23522_v15  ;;  %v3409_v15 = vsel %vm1601_vm2, %v3405_v36, 0 }
 0x35f   : > { %21354 = vmatpush3.msra.mxu0 %v23472_v41  ;;  %21355 = vmatprep.mubr.msk.f32.mxu0 %vm23141_vm1, %v23140_v28 }
 0x360   : > { %21379 = vmatpush3.msra.mxu1 %v23472_v41  ;;  %21380 = vmatprep.mubr.msk.f32.mxu1 %vm23141_vm1, %v23140_v28 }
 0x361   : > { %21363 = vmatprep.subr.mxu0 %v23140_v28  ;;  %21388 = vmatprep.subr.mxu1 %v23140_v28 }
 0x362   : > { %21356 = vmatmul.mubr.f32.vlgmr.msra.gmra.mxu0 %v23536_v23  ;;  %21381 = vmatmul.mubr.f32.vlgmr.msra.gmra.mxu1 %v23494_v6  ;;  %v23681_v23 = vand.u32 4294901760, %v3409_v15 }
 0x363   : > { %21364 = vmatpush3.msra.mxu0 %v23477_v49  ;;  %21365 = vmatprep.mubr.msk.f32.mxu0 %vm23141_vm1, %v23140_v28 }
 0x364   : > { %21389 = vmatpush3.msra.mxu1 %v23658_v35  ;;  %21390 = vmatprep.mubr.msk.f32.mxu1 %vm23141_vm1, %v23140_v28  ;;  %v23696_v38 = vsub.f32 %v3409_v15, %v23681_v23 }
 0x365   : > { %21373 = vmatprep.subr.mxu0 %v23140_v28  ;;  %21398 = vmatprep.subr.mxu1 %v23140_v28 }
 0x366   : > { %21366 = vmatmul.mubr.f32.vlgmr.msra.gmra.mxu0 %v23514_v13  ;;  %21391 = vmatmul.mubr.f32.vlgmr.msra.gmra.mxu1 %v23519_v14  ;;  %v3401_v13 = vmul.f32 %v3399_v31, %v23479_v50  ;;  %v23709_v42 = vand.u32 4294901760, %v23696_v38  ;;  %v8898_v31 = vsub.f32 %v24123_v19, %v24138_v56 }
 0x367   : > { %21374 = vmatpush3.msra.mxu0 %v23497_v7  ;;  %21375 = vmatprep.mubr.msk.f32.mxu0 %vm23141_vm1, %v23140_v28 }
 0x368   : > { %21399 = vmatpush3.msra.mxu1 %v23587_v62  ;;  %21400 = vmatprep.mubr.msk.f32.mxu1 %vm23141_vm1, %v23140_v28  ;;  %v3402_v50 = vsub.f32 %v3400_v37, %v3401_v13  ;;  %v3480_v39 = vsub.f32 %v23696_v38, %v23709_v42  ;;  %v24170_v36 = vand.u32 4294901760, %v8898_v31 }
 0x369   : > { %21383 = vmatprep.subr.mxu0 %v23140_v28  ;;  %21408 = vmatprep.subr.mxu1 %v23140_v28 }
 0x36a   : > { %21376 = vmatmul.mubr.f32.vlgmr.msra.gmra.mxu0 %v23494_v6  ;;  %21401 = vmatmul.mubr.f32.vlgmr.msra.gmra.mxu1 %v23554_v40  ;;  %v3858_v6 = vsel %vm1601_vm2, %v3402_v50, 0 }
 0x36b   : > { %21384 = vmatpush3.msra.mxu0 %v23587_v62  ;;  %21385 = vmatprep.mubr.msk.f32.mxu0 %vm23141_vm1, %v23140_v28  ;;  %v23724_v40 = vand.u32 4294901760, %v3858_v6 }
 0x36c   : > { %21409 = vmatpush3.msra.mxu1 %v23587_v62  ;;  %21410 = vmatprep.mubr.msk.f32.mxu1 %vm23141_vm1, %v23140_v28 }
 0x36d   : > { %21393 = vmatprep.subr.mxu0 %v23140_v28  ;;  %21418 = vmatprep.subr.mxu1 %v23140_v28  ;;  %v23737_v43 = vsub.f32 %v3858_v6, %v23724_v40  ;;  %v9724_v6 = vld [vmem:[#allocation14] sm:$0xff] }
 0x36e   : > { %21386 = vmatmul.mubr.f32.vlgmr.msra.gmra.mxu0 %v23611_v8  ;;  %21411 = vmatmul.mubr.f32.vlgmr.msra.gmra.mxu1 %v23519_v14  ;;  %v8824_v8 = vld [vmem:[%s25368_s5] sm:$0xff] }
 0x36f   : > { %21394 = vmatpush3.msra.mxu0 %v23614_v16  ;;  %21395 = vmatprep.mubr.msk.f32.mxu0 %vm23141_vm1, %v23140_v28  ;;  %v24107_v18 = vand.u32 4294901760, %v8824_v8 }
 0x370   : > { %21419 = vmatpush3.msra.mxu1 %v23465_v33  ;;  %21420 = vmatprep.mubr.msk.f32.mxu1 %vm23141_vm1, %v23140_v28 }
 0x371   : > { %21403 = vmatprep.subr.mxu0 %v23140_v28  ;;  %21428 = vmatprep.subr.mxu1 %v23140_v28  ;;  %v24126_v26 = vsub.f32 %v8824_v8, %v24107_v18 }
 0x372   : > { %21396 = vmatmul.mubr.f32.vlgmr.msra.gmra.mxu0 %v23534_v22  ;;  %21421 = vmatmul.mubr.f32.vlgmr.msra.gmra.mxu1 %v23681_v23  ;;  %v3481_v22 = vand.u32 4294901760, %v3480_v39 }
 0x373   : > { %21404 = vmatpush3.msra.mxu0 %v23629_v20  ;;  %21405 = vmatprep.mubr.msk.f32.mxu0 %vm23141_vm1, %v23140_v28 }
 0x374   : > { %21429 = vmatpush3.msra.mxu1 %v23447_v25  ;;  %21430 = vmatprep.mubr.msk.f32.mxu1 %vm23141_vm1, %v23140_v28 }
 0x375   : > { %21413 = vmatprep.subr.mxu0 %v23140_v28  ;;  %21438 = vmatprep.subr.mxu1 %v23140_v28 }
 0x376   : > { %21406 = vmatmul.mubr.f32.vlgmr.msra.gmra.mxu0 %v23519_v14  ;;  %21431 = vmatmul.mubr.f32.vlgmr.msra.gmra.mxu1 %v23709_v42  ;;  %v3928_v14 = vand.u32 4294901760, %v23737_v43 }
 0x377   : > { %21414 = vmatpush3.msra.mxu0 %v23447_v25  ;;  %21415 = vmatprep.mubr.msk.f32.mxu0 %vm23141_vm1, %v23140_v28 }
 0x378   : > { %21439 = vmatpush3.msra.mxu1 %v23447_v25  ;;  %21440 = vmatprep.mubr.msk.f32.mxu1 %vm23141_vm1, %v23140_v28  ;;  %v3929_v44 = vsub.f32 %v23737_v43, %v3928_v14 }
 0x379   : > { %21423 = vmatprep.subr.mxu0 %v23140_v28  ;;  %21448 = vmatprep.subr.mxu1 %v23140_v28 }
 0x37a   : > { %21416 = vmatmul.mubr.f32.vlgmr.msra.gmra.mxu0 %v3481_v22  ;;  %21441 = vmatmul.mubr.f32.vlgmr.msra.gmra.mxu1 %v23681_v23  ;;  %v3930_v45 = vand.u32 4294901760, %v3929_v44 }
 0x37b   : > { %21424 = vmatpush3.msra.mxu0 %v23450_v27  ;;  %21425 = vmatprep.mubr.msk.f32.mxu0 %vm23141_vm1, %v23140_v28 }
 0x37c   : > { %21449 = vmatpush3.msra.mxu1 %v23539_v24  ;;  %21450 = vmatprep.mubr.msk.f32.mxu1 %vm23141_vm1, %v23140_v28 }
 0x37d   : > { %21433 = vmatprep.subr.mxu0 %v23140_v28  ;;  %21458 = vmatprep.subr.mxu1 %v23140_v28 }
 0x37e   : > { %21426 = vmatmul.mubr.f32.vlgmr.msra.gmra.mxu0 %v23696_v38  ;;  %21451 = vmatmul.mubr.f32.vlgmr.msra.gmra.mxu1 %v23724_v40 }
 0x37f   : > { %21434 = vmatpush3.msra.mxu0 %v23454_v29  ;;  %21435 = vmatprep.mubr.msk.f32.mxu0 %vm23141_vm1, %v23140_v28 }
 0x380   : > { %21459 = vmatpush3.msra.mxu1 %v23472_v41  ;;  %21460 = vmatprep.mubr.msk.f32.mxu1 %vm23141_vm1, %v23140_v28 }
 0x381   : > { %21443 = vmatprep.subr.mxu0 %v23140_v28  ;;  %21468 = vmatprep.subr.mxu1 %v23140_v28 }
 0x382   : > { %21436 = vmatmul.mubr.f32.vlgmr.msra.gmra.mxu0 %v23681_v23  ;;  %21461 = vmatmul.mubr.f32.vlgmr.msra.gmra.mxu1 %v3928_v14 }
 0x383   : > { %21444 = vmatpush3.msra.mxu0 %v23472_v41  ;;  %21445 = vmatprep.mubr.msk.f32.mxu0 %vm23141_vm1, %v23140_v28 }
 0x384   : > { %21469 = vmatpush3.msra.mxu1 %v23472_v41  ;;  %21470 = vmatprep.mubr.msk.f32.mxu1 %vm23141_vm1, %v23140_v28 }
 0x385   : > { %21453 = vmatprep.subr.mxu0 %v23140_v28  ;;  %21478 = vmatprep.subr.mxu1 %v23140_v28 }
 0x386   : > { %21446 = vmatmul.mubr.f32.vlgmr.msra.gmra.mxu0 %v3930_v45  ;;  %21471 = vmatmul.mubr.f32.vlgmr.msra.gmra.mxu1 %v23724_v40 }
 0x387   : > { %21454 = vmatpush3.msra.mxu0 %v23477_v49  ;;  %21455 = vmatprep.mubr.msk.f32.mxu0 %vm23141_vm1, %v23140_v28 }
 0x388   : > { %21479 = vmatpush3.msra.mxu1 %v23539_v24  ;;  %21480 = vmatprep.mubr.msk.f32.mxu1 %vm23141_vm1, %v23140_v28 }
 0x389   : > { %21463 = vmatprep.subr.mxu0 %v23140_v28  ;;  %21488 = vmatprep.subr.mxu1 %v23140_v28 }
 0x38a   : > { %21456 = vmatmul.mubr.f32.vlgmr.msra.gmra.mxu0 %v23737_v43  ;;  %21481 = vmatmul.mubr.f32.vlgmr.msra.gmra.mxu1 %v23681_v23 }
 0x38b   : > { %21464 = vmatpush3.msra.mxu0 %v23497_v7  ;;  %21465 = vmatprep.mubr.msk.f32.mxu0 %vm23141_vm1, %v23140_v28 }
 0x38c   : > { %21489 = vmatpush3.msra.mxu1 %v23472_v41  ;;  %21490 = vmatprep.mubr.msk.f32.mxu1 %vm23141_vm1, %v23140_v28 }
 0x38d   : > { %21473 = vmatprep.subr.mxu0 %v23140_v28  ;;  %21498 = vmatprep.subr.mxu1 %v23140_v28 }
 0x38e   : > { %21466 = vmatmul.mubr.f32.vlgmr.msra.gmra.mxu0 %v23724_v40  ;;  %21491 = vmatmul.mubr.f32.vlgmr.msra.gmra.mxu1 %v23709_v42 }
 0x38f   : > { %21474 = vmatpush3.msra.mxu0 %v23472_v41  ;;  %21475 = vmatprep.mubr.msk.f32.mxu0 %vm23141_vm1, %v23140_v28 }
 0x390   : > { %21499 = vmatpush3.msra.mxu1 %v23472_v41  ;;  %21500 = vmatprep.mubr.msk.f32.mxu1 %vm23141_vm1, %v23140_v28 }
 0x391   : > { %21483 = vmatprep.subr.mxu0 %v23140_v28  ;;  %21508 = vmatprep.subr.mxu1 %v23140_v28 }
 0x392   : > { %21476 = vmatmul.mubr.f32.vlgmr.msra.gmra.mxu0 %v3481_v22  ;;  %21501 = vmatmul.mubr.f32.vlgmr.msra.gmra.mxu1 %v23681_v23 }
 0x393   : > { %21484 = vmatpush3.msra.mxu0 %v23477_v49  ;;  %21485 = vmatprep.mubr.msk.f32.mxu0 %vm23141_vm1, %v23140_v28 }
 0x394   : > { %21509 = vmatpush3.msra.mxu1 %v23658_v35  ;;  %21510 = vmatprep.mubr.msk.f32.mxu1 %vm23141_vm1, %v23140_v28 }
 0x395   : > { %21493 = vmatprep.subr.mxu0 %v23140_v28  ;;  %21518 = vmatprep.subr.mxu1 %v23140_v28 }
 0x396   : > { %21486 = vmatmul.mubr.f32.vlgmr.msra.gmra.mxu0 %v23696_v38  ;;  %21511 = vmatmul.mubr.f32.vlgmr.msra.gmra.mxu1 %v23724_v40 }
 0x397   : > { %21494 = vmatpush3.msra.mxu0 %v23497_v7  ;;  %21495 = vmatprep.mubr.msk.f32.mxu0 %vm23141_vm1, %v23140_v28 }
 0x398   : > { %21519 = vmatpush3.msra.mxu1 %v23587_v62  ;;  %21520 = vmatprep.mubr.msk.f32.mxu1 %vm23141_vm1, %v23140_v28 }
 0x399   : > { %21503 = vmatprep.subr.mxu0 %v23140_v28  ;;  %21528 = vmatprep.subr.mxu1 %v23140_v28 }
 0x39a   : > { %21496 = vmatmul.mubr.f32.vlgmr.msra.gmra.mxu0 %v23681_v23  ;;  %21521 = vmatmul.mubr.f32.vlgmr.msra.gmra.mxu1 %v3928_v14  ;;  %v24176_v23 = vsub.f32 %v23573_v57, %v24158_v34 }
 0x39b   : > { %21504 = vmatpush3.msra.mxu0 %v23587_v62  ;;  %21505 = vmatprep.mubr.msk.f32.mxu0 %vm23141_vm1, %v23140_v28 }
 0x39c   : > { %21529 = vmatpush3.msra.mxu1 %v23587_v62  ;;  %21530 = vmatprep.mubr.msk.f32.mxu1 %vm23141_vm1, %v23140_v28  ;;  %v24189_v57 = vand.u32 4294901760, %v24176_v23 }
 0x39d   : > { %21513 = vmatprep.subr.mxu0 %v23140_v28  ;;  %21538 = vmatprep.subr.mxu1 %v23140_v28 }
 0x39e   : > { %21506 = vmatmul.mubr.f32.vlgmr.msra.gmra.mxu0 %v3930_v45  ;;  %21531 = vmatmul.mubr.f32.vlgmr.msra.gmra.mxu1 %v23724_v40  ;;  %v9347_v44 = vsub.f32 %v24176_v23, %v24189_v57  ;;  %v24203_v45 = vand.u32 4294901760, %v9724_v6 }
 0x39f   : > { %21514 = vmatpush3.msra.mxu0 %v23614_v16  ;;  %21515 = vmatprep.mubr.msk.f32.mxu0 %vm23141_vm1, %v23140_v28 }
 0x3a0   : > { %21539 = vmatpush3.msra.mxu1 %v23465_v33  ;;  %21540 = vmatprep.mubr.msk.f32.mxu1 %vm23141_vm1, %v23140_v28 }
 0x3a1   : > { %21523 = vmatprep.subr.mxu0 %v23140_v28  ;;  %21548 = vmatprep.subr.mxu1 %v23140_v28 }
 0x3a2   : > { %21516 = vmatmul.mubr.f32.vlgmr.msra.gmra.mxu0 %v23737_v43  ;;  %21541 = vmatmul.mubr.f32.vlgmr.msra.gmra.mxu1 %v23818_v46 }
 0x3a3   : > { %21524 = vmatpush3.msra.mxu0 %v23629_v20  ;;  %21525 = vmatprep.mubr.msk.f32.mxu0 %vm23141_vm1, %v23140_v28 }
 0x3a4   : > { %21549 = vmatpush3.msra.mxu1 %v23447_v25  ;;  %21550 = vmatprep.mubr.msk.f32.mxu1 %vm23141_vm1, %v23140_v28 }
 0x3a5   : > { %21533 = vmatprep.subr.mxu0 %v23140_v28  ;;  %21558 = vmatprep.subr.mxu1 %v23140_v28 }
 0x3a6   : > { %21526 = vmatmul.mubr.f32.vlgmr.msra.gmra.mxu0 %v23724_v40  ;;  %21551 = vmatmul.mubr.f32.vlgmr.msra.gmra.mxu1 %v23843_v9 }
 0x3a7   : > { %21534 = vmatpush3.msra.mxu0 %v23447_v25  ;;  %21535 = vmatprep.mubr.msk.f32.mxu0 %vm23141_vm1, %v23140_v28 }
 0x3a8   : > { %21559 = vmatpush3.msra.mxu1 %v23447_v25  ;;  %21560 = vmatprep.mubr.msk.f32.mxu1 %vm23141_vm1, %v23140_v28 }
 0x3a9   : > { %21543 = vmatprep.subr.mxu0 %v23140_v28  ;;  %21568 = vmatprep.subr.mxu1 %v23140_v28 }
 0x3aa   : > { %21536 = vmatmul.mubr.f32.vlgmr.msra.gmra.mxu0 %v5287_v52  ;;  %21561 = vmatmul.mubr.f32.vlgmr.msra.gmra.mxu1 %v23818_v46 }
 0x3ab   : > { %21544 = vmatpush3.msra.mxu0 %v23450_v27  ;;  %21545 = vmatprep.mubr.msk.f32.mxu0 %vm23141_vm1, %v23140_v28 }
 0x3ac   : > { %21569 = vmatpush3.msra.mxu1 %v23539_v24  ;;  %21570 = vmatprep.mubr.msk.f32.mxu1 %vm23141_vm1, %v23140_v28 }
 0x3ad   : > { %21553 = vmatprep.subr.mxu0 %v23140_v28  ;;  %21578 = vmatprep.subr.mxu1 %v23140_v28 }
 0x3ae   : > { %21546 = vmatmul.mubr.f32.vlgmr.msra.gmra.mxu0 %v23831_v47  ;;  %21571 = vmatmul.mubr.f32.vlgmr.msra.gmra.mxu1 %v23858_v51 }
 0x3af   : > { %21554 = vmatpush3.msra.mxu0 %v23454_v29  ;;  %21555 = vmatprep.mubr.msk.f32.mxu0 %vm23141_vm1, %v23140_v28 }
 0x3b0   : > { %21579 = vmatpush3.msra.mxu1 %v23472_v41  ;;  %21580 = vmatprep.mubr.msk.f32.mxu1 %vm23141_vm1, %v23140_v28 }
 0x3b1   : > { %21563 = vmatprep.subr.mxu0 %v23140_v28  ;;  %21588 = vmatprep.subr.mxu1 %v23140_v28 }
 0x3b2   : > { %21556 = vmatmul.mubr.f32.vlgmr.msra.gmra.mxu0 %v23818_v46  ;;  %21581 = vmatmul.mubr.f32.vlgmr.msra.gmra.mxu1 %v5734_v10 }
 0x3b3   : > { %21564 = vmatpush3.msra.mxu0 %v23472_v41  ;;  %21565 = vmatprep.mubr.msk.f32.mxu0 %vm23141_vm1, %v23140_v28 }
 0x3b4   : > { %21589 = vmatpush3.msra.mxu1 %v23472_v41  ;;  %21590 = vmatprep.mubr.msk.f32.mxu1 %vm23141_vm1, %v23140_v28 }
 0x3b5   : > { %21573 = vmatprep.subr.mxu0 %v23140_v28  ;;  %21598 = vmatprep.subr.mxu1 %v23140_v28 }
 0x3b6   : > { %21566 = vmatmul.mubr.f32.vlgmr.msra.gmra.mxu0 %v5736_v55  ;;  %21591 = vmatmul.mubr.f32.vlgmr.msra.gmra.mxu1 %v23858_v51 }
 0x3b7   : > { %21574 = vmatpush3.msra.mxu0 %v23477_v49  ;;  %21575 = vmatprep.mubr.msk.f32.mxu0 %vm23141_vm1, %v23140_v28 }
 0x3b8   : > { %21599 = vmatpush3.msra.mxu1 %v23539_v24  ;;  %21600 = vmatprep.mubr.msk.f32.mxu1 %vm23141_vm1, %v23140_v28 }
 0x3b9   : > { %21583 = vmatprep.subr.mxu0 %v23140_v28  ;;  %21608 = vmatprep.subr.mxu1 %v23140_v28 }
 0x3ba   : > { %21576 = vmatmul.mubr.f32.vlgmr.msra.gmra.mxu0 %v23872_v53  ;;  %21601 = vmatmul.mubr.f32.vlgmr.msra.gmra.mxu1 %v23818_v46 }
 0x3bb   : > { %21584 = vmatpush3.msra.mxu0 %v23497_v7  ;;  %21585 = vmatprep.mubr.msk.f32.mxu0 %vm23141_vm1, %v23140_v28 }
 0x3bc   : > { %21609 = vmatpush3.msra.mxu1 %v23472_v41  ;;  %21610 = vmatprep.mubr.msk.f32.mxu1 %vm23141_vm1, %v23140_v28 }
 0x3bd   : > { %21593 = vmatprep.subr.mxu0 %v23140_v28  ;;  %21618 = vmatprep.subr.mxu1 %v23140_v28 }
 0x3be   : > { %21586 = vmatmul.mubr.f32.vlgmr.msra.gmra.mxu0 %v23858_v51  ;;  %21611 = vmatmul.mubr.f32.vlgmr.msra.gmra.mxu1 %v23843_v9 }
 0x3bf   : > { %21594 = vmatpush3.msra.mxu0 %v23472_v41  ;;  %21595 = vmatprep.mubr.msk.f32.mxu0 %vm23141_vm1, %v23140_v28 }
 0x3c0   : > { %21619 = vmatpush3.msra.mxu1 %v23472_v41  ;;  %21620 = vmatprep.mubr.msk.f32.mxu1 %vm23141_vm1, %v23140_v28 }
 0x3c1   : > { %21603 = vmatprep.subr.mxu0 %v23140_v28  ;;  %21628 = vmatprep.subr.mxu1 %v23140_v28 }
 0x3c2   : > { %21596 = vmatmul.mubr.f32.vlgmr.msra.gmra.mxu0 %v5287_v52  ;;  %21621 = vmatmul.mubr.f32.vlgmr.msra.gmra.mxu1 %v23818_v46 }
 0x3c3   : > { %21604 = vmatpush3.msra.mxu0 %v23477_v49  ;;  %21605 = vmatprep.mubr.msk.f32.mxu0 %vm23141_vm1, %v23140_v28 }
 0x3c4   : > { %21629 = vmatpush3.msra.mxu1 %v23658_v35  ;;  %21630 = vmatprep.mubr.msk.f32.mxu1 %vm23141_vm1, %v23140_v28 }
 0x3c5   : > { %21613 = vmatprep.subr.mxu0 %v23140_v28  ;;  %21638 = vmatprep.subr.mxu1 %v23140_v28 }
 0x3c6   : > { %21606 = vmatmul.mubr.f32.vlgmr.msra.gmra.mxu0 %v23831_v47  ;;  %21631 = vmatmul.mubr.f32.vlgmr.msra.gmra.mxu1 %v23858_v51 }
 0x3c7   : > { %21614 = vmatpush3.msra.mxu0 %v23497_v7  ;;  %21615 = vmatprep.mubr.msk.f32.mxu0 %vm23141_vm1, %v23140_v28 }
 0x3c8   : > { %21639 = vmatpush3.msra.mxu1 %v23587_v62  ;;  %21640 = vmatprep.mubr.msk.f32.mxu1 %vm23141_vm1, %v23140_v28 }
 0x3c9   : > { %21623 = vmatprep.subr.mxu0 %v23140_v28  ;;  %21648 = vmatprep.subr.mxu1 %v23140_v28 }
 0x3ca   : > { %21616 = vmatmul.mubr.f32.vlgmr.msra.gmra.mxu0 %v23818_v46  ;;  %21641 = vmatmul.mubr.f32.vlgmr.msra.gmra.mxu1 %v5734_v10  ;;  %v24218_v10 = vsub.f32 %v9724_v6, %v24203_v45 }
 0x3cb   : > { %21624 = vmatpush3.msra.mxu0 %v23587_v62  ;;  %21625 = vmatprep.mubr.msk.f32.mxu0 %vm23141_vm1, %v23140_v28 }
 0x3cc   : > { %21649 = vmatpush3.msra.mxu1 %v23587_v62  ;;  %21650 = vmatprep.mubr.msk.f32.mxu1 %vm23141_vm1, %v23140_v28 }
 0x3cd   : > { %21633 = vmatprep.subr.mxu0 %v23140_v28  ;;  %21658 = vmatprep.subr.mxu1 %v23140_v28 }
 0x3ce   : > { %21626 = vmatmul.mubr.f32.vlgmr.msra.gmra.mxu0 %v5736_v55  ;;  %21651 = vmatmul.mubr.f32.vlgmr.msra.gmra.mxu1 %v23858_v51 }
 0x3cf   : > { %21634 = vmatpush3.msra.mxu0 %v23614_v16  ;;  %21635 = vmatprep.mubr.msk.f32.mxu0 %vm23141_vm1, %v23140_v28 }
 0x3d0   : > { %21659 = vmatpush3.msra.mxu1 %v23465_v33  ;;  %21660 = vmatprep.mubr.msk.f32.mxu1 %vm23141_vm1, %v23140_v28  ;;  %v7092_v33 = vsub.f32 %v23966_v60, %v23978_v11 }
 0x3d1   : > { %21643 = vmatprep.subr.mxu0 %v23140_v28  ;;  %21668 = vmatprep.subr.mxu1 %v23140_v28 }
 0x3d2   : > { %21636 = vmatmul.mubr.f32.vlgmr.msra.gmra.mxu0 %v23872_v53  ;;  %21661 = vmatmul.mubr.f32.vlgmr.msra.gmra.mxu1 %v23953_v59  ;;  %v7093_v63 = vand.u32 4294901760, %v7092_v33  ;;  %v24215_v53 = vand.u32 4294901760, %v9347_v44 }
 0x3d3   : > { %21644 = vmatpush3.msra.mxu0 %v23629_v20  ;;  %21645 = vmatprep.mubr.msk.f32.mxu0 %vm23141_vm1, %v23140_v28 }
 0x3d4   : > { %21669 = vmatpush3.msra.mxu1 %v23447_v25  ;;  %21670 = vmatprep.mubr.msk.f32.mxu1 %vm23141_vm1, %v23140_v28 }
 0x3d5   : > { %21653 = vmatprep.subr.mxu0 %v23140_v28  ;;  %21678 = vmatprep.subr.mxu1 %v23140_v28 }
 0x3d6   : > { %21646 = vmatmul.mubr.f32.vlgmr.msra.gmra.mxu0 %v23858_v51  ;;  %21671 = vmatmul.mubr.f32.vlgmr.msra.gmra.mxu1 %v23978_v11 }
 0x3d7   : > { %21654 = vmatpush3.msra.mxu0 %v23447_v25  ;;  %21655 = vmatprep.mubr.msk.f32.mxu0 %vm23141_vm1, %v23140_v28 }
 0x3d8   : > { %21679 = vmatpush3.msra.mxu1 %v23447_v25  ;;  %21680 = vmatprep.mubr.msk.f32.mxu1 %vm23141_vm1, %v23140_v28  ;;  %v24019_v25 = vand.u32 4294901760, %v24007_v0 }
 0x3d9   : > { %21663 = vmatprep.subr.mxu0 %v23140_v28  ;;  %21688 = vmatprep.subr.mxu1 %v23140_v28 }
 0x3da   : > { %21656 = vmatmul.mubr.f32.vlgmr.msra.gmra.mxu0 %v7093_v63  ;;  %21681 = vmatmul.mubr.f32.vlgmr.msra.gmra.mxu1 %v23953_v59 }
 0x3db   : > { %21664 = vmatpush3.msra.mxu0 %v23450_v27  ;;  %21665 = vmatprep.mubr.msk.f32.mxu0 %vm23141_vm1, %v23140_v28  ;;  %v7541_v27 = vsub.f32 %v24007_v0, %v24019_v25 }
 0x3dc   : > { %21689 = vmatpush3.msra.mxu1 %v23539_v24  ;;  %21690 = vmatprep.mubr.msk.f32.mxu1 %vm23141_vm1, %v23140_v28 }
 0x3dd   : > { %21673 = vmatprep.subr.mxu0 %v23140_v28  ;;  %21698 = vmatprep.subr.mxu1 %v23140_v28 }
 0x3de   : > { %21666 = vmatmul.mubr.f32.vlgmr.msra.gmra.mxu0 %v23966_v60  ;;  %21691 = vmatmul.mubr.f32.vlgmr.msra.gmra.mxu1 %v23993_v61 }
 0x3df   : > { %21674 = vmatpush3.msra.mxu0 %v23454_v29  ;;  %21675 = vmatprep.mubr.msk.f32.mxu0 %vm23141_vm1, %v23140_v28  ;;  %v7542_v29 = vand.u32 4294901760, %v7541_v27 }
 0x3e0   : > { %21699 = vmatpush3.msra.mxu1 %v23472_v41  ;;  %21700 = vmatprep.mubr.msk.f32.mxu1 %vm23141_vm1, %v23140_v28 }
 0x3e1   : > { %21683 = vmatprep.subr.mxu0 %v23140_v28  ;;  %21708 = vmatprep.subr.mxu1 %v23140_v28 }
 0x3e2   : > { %21676 = vmatmul.mubr.f32.vlgmr.msra.gmra.mxu0 %v23953_v59  ;;  %21701 = vmatmul.mubr.f32.vlgmr.msra.gmra.mxu1 %v24019_v25 }
 0x3e3   : > { %21684 = vmatpush3.msra.mxu0 %v23472_v41  ;;  %21685 = vmatprep.mubr.msk.f32.mxu0 %vm23141_vm1, %v23140_v28 }
 0x3e4   : > { %21709 = vmatpush3.msra.mxu1 %v23472_v41  ;;  %21710 = vmatprep.mubr.msk.f32.mxu1 %vm23141_vm1, %v23140_v28 }
 0x3e5   : > { %21693 = vmatprep.subr.mxu0 %v23140_v28  ;;  %21718 = vmatprep.subr.mxu1 %v23140_v28 }
 0x3e6   : > { %21686 = vmatmul.mubr.f32.vlgmr.msra.gmra.mxu0 %v7542_v29  ;;  %21711 = vmatmul.mubr.f32.vlgmr.msra.gmra.mxu1 %v23993_v61 }
 0x3e7   : > { %21694 = vmatpush3.msra.mxu0 %v23477_v49  ;;  %21695 = vmatprep.mubr.msk.f32.mxu0 %vm23141_vm1, %v23140_v28 }
 0x3e8   : > { %21719 = vmatpush3.msra.mxu1 %v23539_v24  ;;  %21720 = vmatprep.mubr.msk.f32.mxu1 %vm23141_vm1, %v23140_v28  ;;  %v24062_v24 = vand.u32 4294901760, %v8825_v12 }
 0x3e9   : > { %21703 = vmatprep.subr.mxu0 %v23140_v28  ;;  %21728 = vmatprep.subr.mxu1 %v23140_v28 }
 0x3ea   : > { %21696 = vmatmul.mubr.f32.vlgmr.msra.gmra.mxu0 %v24007_v0  ;;  %21721 = vmatmul.mubr.f32.vlgmr.msra.gmra.mxu1 %v23953_v59  ;;  %v24075_v1 = vsub.f32 %v8825_v12, %v24062_v24 }
 0x3eb   : > { %21704 = vmatpush3.msra.mxu0 %v23497_v7  ;;  %21705 = vmatprep.mubr.msk.f32.mxu0 %vm23141_vm1, %v23140_v28 }
 0x3ec   : > { %21729 = vmatpush3.msra.mxu1 %v23472_v41  ;;  %21730 = vmatprep.mubr.msk.f32.mxu1 %vm23141_vm1, %v23140_v28 }
 0x3ed   : > { %21713 = vmatprep.subr.mxu0 %v23140_v28  ;;  %21738 = vmatprep.subr.mxu1 %v23140_v28 }
 0x3ee   : > { %21706 = vmatmul.mubr.f32.vlgmr.msra.gmra.mxu0 %v23993_v61  ;;  %21731 = vmatmul.mubr.f32.vlgmr.msra.gmra.mxu1 %v23978_v11 }
 0x3ef   : > { %21714 = vmatpush3.msra.mxu0 %v23472_v41  ;;  %21715 = vmatprep.mubr.msk.f32.mxu0 %vm23141_vm1, %v23140_v28 }
 0x3f0   : > { %21739 = vmatpush3.msra.mxu1 %v23472_v41  ;;  %21740 = vmatprep.mubr.msk.f32.mxu1 %vm23141_vm1, %v23140_v28  ;;  %v24087_v41 = vand.u32 4294901760, %v24075_v1 }
 0x3f1   : > { %21723 = vmatprep.subr.mxu0 %v23140_v28  ;;  %21748 = vmatprep.subr.mxu1 %v23140_v28 }
 0x3f2   : > { %21716 = vmatmul.mubr.f32.vlgmr.msra.gmra.mxu0 %v7093_v63  ;;  %21741 = vmatmul.mubr.f32.vlgmr.msra.gmra.mxu1 %v23953_v59 }
 0x3f3   : > { %21724 = vmatpush3.msra.mxu0 %v23477_v49  ;;  %21725 = vmatprep.mubr.msk.f32.mxu0 %vm23141_vm1, %v23140_v28  ;;  %v8939_v49 = vsub.f32 %v24075_v1, %v24087_v41 }
 0x3f4   : > { %21749 = vmatpush3.msra.mxu1 %v23658_v35  ;;  %21750 = vmatprep.mubr.msk.f32.mxu1 %vm23141_vm1, %v23140_v28 }
 0x3f5   : > { %21733 = vmatprep.subr.mxu0 %v23140_v28  ;;  %21758 = vmatprep.subr.mxu1 %v23140_v28 }
 0x3f6   : > { %21726 = vmatmul.mubr.f32.vlgmr.msra.gmra.mxu0 %v23966_v60  ;;  %21751 = vmatmul.mubr.f32.vlgmr.msra.gmra.mxu1 %v23993_v61 }
 0x3f7   : > { %21734 = vmatpush3.msra.mxu0 %v23497_v7  ;;  %21735 = vmatprep.mubr.msk.f32.mxu0 %vm23141_vm1, %v23140_v28  ;;  %v24119_v7 = vand.u32 4294901760, %v8939_v49 }
 0x3f8   : > { %21759 = vmatpush3.msra.mxu1 %v23587_v62  ;;  %21760 = vmatprep.mubr.msk.f32.mxu1 %vm23141_vm1, %v23140_v28 }
 0x3f9   : > { %21743 = vmatprep.subr.mxu0 %v23140_v28  ;;  %21768 = vmatprep.subr.mxu1 %v23140_v28 }
 0x3fa   : > { %21736 = vmatmul.mubr.f32.vlgmr.msra.gmra.mxu0 %v23953_v59  ;;  %21761 = vmatmul.mubr.f32.vlgmr.msra.gmra.mxu1 %v24019_v25 }
 0x3fb   : > { %21744 = vmatpush3.msra.mxu0 %v23587_v62  ;;  %21745 = vmatprep.mubr.msk.f32.mxu0 %vm23141_vm1, %v23140_v28 }
 0x3fc   : > { %21769 = vmatpush3.msra.mxu1 %v23587_v62  ;;  %21770 = vmatprep.mubr.msk.f32.mxu1 %vm23141_vm1, %v23140_v28  ;;  %v24141_v62 = vand.u32 4294901760, %v24126_v26 }
 0x3fd   : > { %21753 = vmatprep.subr.mxu0 %v23140_v28  ;;  %21778 = vmatprep.subr.mxu1 %v23140_v28 }
 0x3fe   : > { %21746 = vmatmul.mubr.f32.vlgmr.msra.gmra.mxu0 %v7542_v29  ;;  %21771 = vmatmul.mubr.f32.vlgmr.msra.gmra.mxu1 %v23993_v61  ;;  %v9388_v32 = vsub.f32 %v24126_v26, %v24141_v62 }
 0x3ff   : > { %21754 = vmatpush3.msra.mxu0 %v23614_v16  ;;  %21755 = vmatprep.mubr.msk.f32.mxu0 %vm23141_vm1, %v23140_v28 }
 0x400   : > { %21779 = vmatpush3.msra.mxu1 %v24119_v7  ;;  %21780 = vmatprep.mubr.msk.f32.mxu1 %vm23141_vm1, %v23140_v28  ;;  %v24172_v15 = vand.u32 4294901760, %v9388_v32 }
 0x401   : > { %21763 = vmatprep.subr.mxu0 %v23140_v28  ;;  %21788 = vmatprep.subr.mxu1 %v23140_v28 }
 0x402   : > { %v1753_v30 = vpop.f32.mrf.mxu1  ;;  %21756 = vmatmul.mubr.f32.vlgmr.msra.gmra.mxu0 %v24007_v0  ;;  %21781 = vmatmul.mubr.f32.vlgmr.msra.gmra.mxu1 %v24105_v17 }
 0x403   : > { %21764 = vmatpush3.msra.mxu0 %v23629_v20  ;;  %21765 = vmatprep.mubr.msk.f32.mxu0 %vm23141_vm1, %v23140_v28 }
 0x404   : > { %v21302_v16 = vpop.f32.mrf.mxu1  ;;  %21789 = vmatpush3.msra.mxu1 %v24062_v24  ;;  %21790 = vmatprep.mubr.msk.f32.mxu1 %vm23141_vm1, %v23140_v28 }
 0x405   : > { %21773 = vmatprep.subr.mxu0 %v23140_v28  ;;  %21798 = vmatprep.subr.mxu1 %v23140_v28 }
 0x406   : > { %v1901_v20 = vpop.f32.mrf.mxu1  ;;  %21766 = vmatmul.mubr.f32.vlgmr.msra.gmra.mxu0 %v23993_v61  ;;  %21791 = vmatmul.mubr.f32.vlgmr.msra.gmra.mxu1 %v24138_v56  ;;  %v24231_v61 = vand.u32 4294901760, %v24218_v10 }
 0x407   : > { %21774 = vmatpush3.msra.mxu0 %v24062_v24  ;;  %21775 = vmatprep.mubr.msk.f32.mxu0 %vm23141_vm1, %v23140_v28 }
 0x408   : > { %v21312_v35 = vpop.f32.mrf.mxu1  ;;  %21799 = vmatpush3.msra.mxu1 %v24062_v24  ;;  %21800 = vmatprep.mubr.msk.f32.mxu1 %vm23141_vm1, %v23140_v28  ;;  %v10281_v8 = vsub.f32 %v24218_v10, %v24231_v61 }
 0x409   : > { %21783 = vmatprep.subr.mxu0 %v23140_v28  ;;  %21808 = vmatprep.subr.mxu1 %v23140_v28 }
 0x40a   : > { %v1677_v13 = vpop.f32.mrf.mxu0  ;;  %v2047_v37 = vpop.f32.mrf.mxu1  ;;  %21776 = vmatmul.mubr.f32.vlgmr.msra.gmra.mxu0 %v24170_v36  ;;  %21801 = vmatmul.mubr.f32.vlgmr.msra.gmra.mxu1 %v24105_v17  ;;  %v24255_v35 = vand.u32 4294901760, %v10281_v8 }
 0x40b   : > { %21784 = vmatpush3.msra.mxu0 %v24075_v1  ;;  %21785 = vmatprep.mubr.msk.f32.mxu0 %vm23141_vm1, %v23140_v28  ;;  %v1754_v42 = vadd.f32 %v1753_v30, %v1677_v13 }
 0x40c   : > { %v21297_v38 = vpop.f32.mrf.mxu0  ;;  %v21322_v50 = vpop.f32.mrf.mxu1  ;;  %21809 = vmatpush3.msra.mxu1 %v24172_v15  ;;  %21810 = vmatprep.mubr.msk.f32.mxu1 %vm23141_vm1, %v23140_v28 }
 0x40d   : > { %21793 = vmatprep.subr.mxu0 %v23140_v28  ;;  %21818 = vmatprep.subr.mxu1 %v23140_v28 }
 0x40e   : > { %v1827_v39 = vpop.f32.mrf.mxu0  ;;  %v2202_v40 = vpop.f32.mrf.mxu1  ;;  %21786 = vmatmul.mubr.f32.vlgmr.msra.gmra.mxu0 %v24123_v19  ;;  %21811 = vmatmul.mubr.f32.vlgmr.msra.gmra.mxu1 %v24158_v34 }
 0x40f   : > { %v1828_v22 = vadd.f32 %v1827_v39, %v1754_v42  ;;  %21794 = vmatpush3.msra.mxu0 %v24087_v41  ;;  %21795 = vmatprep.mubr.msk.f32.mxu0 %vm23141_vm1, %v23140_v28 }
 0x410   : > { %v21307_v43 = vpop.f32.mrf.mxu0  ;;  %v21332_v14 = vpop.f32.mrf.mxu1  ;;  %21819 = vmatpush3.msra.mxu1 %v24107_v18  ;;  %21820 = vmatprep.mubr.msk.f32.mxu1 %vm23141_vm1, %v23140_v28 }
 0x411   : > { %v1902_v46 = vadd.f32 %v1901_v20, %v1828_v22  ;;  %21803 = vmatprep.subr.mxu0 %v23140_v28  ;;  %21828 = vmatprep.subr.mxu1 %v23140_v28  ;;  %v24279_v43 = vand.u32 4294901760, %v23576_v58 }
 0x412   : > { %v1975_v47 = vpop.f32.mrf.mxu0  ;;  %v2350_v9 = vpop.f32.mrf.mxu1  ;;  %21796 = vmatmul.mubr.f32.vlgmr.msra.gmra.mxu0 %v24105_v17  ;;  %21821 = vmatmul.mubr.f32.vlgmr.msra.gmra.mxu1 %v24189_v57 }
 0x413   : > { %v1976_v48 = vadd.f32 %v1975_v47, %v1902_v46  ;;  %21804 = vmatpush3.msra.mxu0 %v24107_v18  ;;  %21805 = vmatprep.mubr.msk.f32.mxu0 %vm23141_vm1, %v23140_v28 }
 0x414   : > { %v21317_v51 = vpop.f32.mrf.mxu0  ;;  %v21342_v52 = vpop.f32.mrf.mxu1  ;;  %21829 = vmatpush3.msra.mxu1 %v24107_v18  ;;  %21830 = vmatprep.mubr.msk.f32.mxu1 %vm23141_vm1, %v23140_v28 }
 0x415   : > { %v2048_v54 = vadd.f32 %v2047_v37, %v1976_v48  ;;  %21813 = vmatprep.subr.mxu0 %v23140_v28  ;;  %21838 = vmatprep.subr.mxu1 %v23140_v28  ;;  %v24293_v48 = vsub.f32 %v23576_v58, %v24279_v43 }
 0x416   : > { %v2126_v55 = vpop.f32.mrf.mxu0  ;;  %v2496_v59 = vpop.f32.mrf.mxu1  ;;  %21806 = vmatmul.mubr.f32.vlgmr.msra.gmra.mxu0 %v24215_v53  ;;  %21831 = vmatmul.mubr.f32.vlgmr.msra.gmra.mxu1 %v24158_v34 }
 0x417   : > { %v2127_v60 = vadd.f32 %v2126_v55, %v2048_v54  ;;  %21814 = vmatpush3.msra.mxu0 %v24126_v26  ;;  %21815 = vmatprep.mubr.msk.f32.mxu0 %vm23141_vm1, %v23140_v28  ;;  %v24306_v55 = vand.u32 4294901760, %v24293_v48 }
 0x418   : > { %v21327_v11 = vpop.f32.mrf.mxu0  ;;  %v21352_v33 = vpop.f32.mrf.mxu1  ;;  %21839 = vmatpush3.msra.mxu1 %v24172_v15  ;;  %21840 = vmatprep.mubr.msk.f32.mxu1 %vm23141_vm1, %v23140_v28 }
 0x419   : > { %v2203_v63 = vadd.f32 %v2202_v40, %v2127_v60  ;;  %21823 = vmatprep.subr.mxu0 %v23140_v28  ;;  %21848 = vmatprep.subr.mxu1 %v23140_v28 }
 0x41a   : > { %v2276_v0 = vpop.f32.mrf.mxu0  ;;  %v2649_v25 = vpop.f32.mrf.mxu1  ;;  %21816 = vmatmul.mubr.f32.vlgmr.msra.gmra.mxu0 %v24176_v23  ;;  %21841 = vmatmul.mubr.f32.vlgmr.msra.gmra.mxu1 %v24105_v17 }
 0x41b   : > { %v2277_v27 = vadd.f32 %v2276_v0, %v2203_v63  ;;  %21824 = vmatpush3.msra.mxu0 %v24141_v62  ;;  %21825 = vmatprep.mubr.msk.f32.mxu0 %vm23141_vm1, %v23140_v28  ;;  %v10704_v0 = vsub.f32 %v24293_v48, %v24306_v55 }
 0x41c   : > { %v21337_v29 = vpop.f32.mrf.mxu0  ;;  %v21362_v12 = vpop.f32.mrf.mxu1  ;;  %21849 = vmatpush3.msra.mxu1 %v24107_v18  ;;  %21850 = vmatprep.mubr.msk.f32.mxu1 %vm23141_vm1, %v23140_v28 }
 0x41d   : > { %v2351_v49 = vadd.f32 %v2350_v9, %v2277_v27  ;;  %21833 = vmatprep.subr.mxu0 %v23140_v28  ;;  %21858 = vmatprep.subr.mxu1 %v23140_v28 }
 0x41e   : > { %v2424_v30 = vpop.f32.mrf.mxu0  ;;  %v2797_v16 = vpop.f32.mrf.mxu1  ;;  %21826 = vmatmul.mubr.f32.vlgmr.msra.gmra.mxu0 %v24158_v34  ;;  %21851 = vmatmul.mubr.f32.vlgmr.msra.gmra.mxu1 %v24138_v56 }
 0x41f   : > { %v2425_v31 = vadd.f32 %v2424_v30, %v2351_v49  ;;  %21834 = vmatpush3.msra.mxu0 %v24107_v18  ;;  %21835 = vmatprep.mubr.msk.f32.mxu0 %vm23141_vm1, %v23140_v28  ;;  %v24333_v30 = vand.u32 4294901760, %v10704_v0 }
 0x420   : > { %v21347_v32 = vpop.f32.mrf.mxu0  ;;  %v21372_v20 = vpop.f32.mrf.mxu1  ;;  %21859 = vmatpush3.msra.mxu1 %v24107_v18  ;;  %21860 = vmatprep.mubr.msk.f32.mxu1 %vm23141_vm1, %v23140_v28 }
 0x421   : > { %v2497_v13 = vadd.f32 %v2496_v59, %v2425_v31  ;;  %21843 = vmatprep.subr.mxu0 %v23140_v28  ;;  %21868 = vmatprep.subr.mxu1 %v23140_v28 }
 0x422   : > { %v2573_v56 = vpop.f32.mrf.mxu0  ;;  %v2943_v37 = vpop.f32.mrf.mxu1  ;;  %21836 = vmatmul.mubr.f32.vlgmr.msra.gmra.mxu0 %v24170_v36  ;;  %21861 = vmatmul.mubr.f32.vlgmr.msra.gmra.mxu1 %v24105_v17 }
 0x423   : > { %3394 = vst.msk [vmem:[#allocation2] sm:$0xff] %vm3393_vm3, %v2497_v13  ;;  %21844 = vmatpush3.msra.mxu0 %v24126_v26  ;;  %21845 = vmatprep.mubr.msk.f32.mxu0 %vm23141_vm1, %v23140_v28  ;;  %v2650_v42 = vadd.f32 %v2649_v25, %v2573_v56 }
 0x424   : > { %v21357_v38 = vpop.f32.mrf.mxu0  ;;  %v21382_v50 = vpop.f32.mrf.mxu1  ;;  %21869 = vmatpush3.msra.mxu1 %v24255_v35  ;;  %21870 = vmatprep.mubr.msk.f32.mxu1 %vm23141_vm1, %v23140_v28 }
 0x425   : > { %21853 = vmatprep.subr.mxu0 %v23140_v28  ;;  %21878 = vmatprep.subr.mxu1 %v23140_v28 }
 0x426   : > { %v2723_v36 = vpop.f32.mrf.mxu0  ;;  %v3095_v6 = vpop.f32.mrf.mxu1  ;;  %21846 = vmatmul.mubr.f32.vlgmr.msra.gmra.mxu0 %v24123_v19  ;;  %21871 = vmatmul.mubr.f32.vlgmr.msra.gmra.mxu1 %v24158_v34 }
 0x427   : > { %v2724_v39 = vadd.f32 %v2723_v36, %v2650_v42  ;;  %21854 = vmatpush3.msra.mxu0 %v24141_v62  ;;  %21855 = vmatprep.mubr.msk.f32.mxu0 %vm23141_vm1, %v23140_v28 }
 0x428   : > { %v21367_v40 = vpop.f32.mrf.mxu0  ;;  %v21392_v22 = vpop.f32.mrf.mxu1  ;;  %21879 = vmatpush3.msra.mxu1 %v24203_v45  ;;  %21880 = vmatprep.mubr.msk.f32.mxu1 %vm23141_vm1, %v23140_v28 }
 0x429   : > { %v2798_v14 = vadd.f32 %v2797_v16, %v2724_v39  ;;  %21863 = vmatprep.subr.mxu0 %v23140_v28  ;;  %21888 = vmatprep.subr.mxu1 %v23140_v28 }
 0x42a   : > { %v2871_v19 = vpop.f32.mrf.mxu0  ;;  %v3243_v44 = vpop.f32.mrf.mxu1  ;;  %21856 = vmatmul.mubr.f32.vlgmr.msra.gmra.mxu0 %v24105_v17  ;;  %21881 = vmatmul.mubr.f32.vlgmr.msra.gmra.mxu1 %v24189_v57 }
 0x42b   : > { %v2872_v46 = vadd.f32 %v2871_v19, %v2798_v14  ;;  %21864 = vmatpush3.msra.mxu0 %v24203_v45  ;;  %21865 = vmatprep.mubr.msk.f32.mxu0 %vm23141_vm1, %v23140_v28 }
 0x42c   : > { %v21377_v47 = vpop.f32.mrf.mxu0  ;;  %v21402_v9 = vpop.f32.mrf.mxu1  ;;  %21889 = vmatpush3.msra.mxu1 %v24203_v45  ;;  %21890 = vmatprep.mubr.msk.f32.mxu1 %vm23141_vm1, %v23140_v28 }
 0x42d   : > { %v2944_v17 = vadd.f32 %v2943_v37, %v2872_v46  ;;  %21873 = vmatprep.subr.mxu0 %v23140_v28  ;;  %21898 = vmatprep.subr.mxu1 %v23140_v28 }
 0x42e   : > { %v3019_v57 = vpop.f32.mrf.mxu0  ;;  %v3389_v51 = vpop.f32.mrf.mxu1  ;;  %21866 = vmatmul.mubr.f32.vlgmr.msra.gmra.mxu0 %v24215_v53  ;;  %21891 = vmatmul.mubr.f32.vlgmr.msra.gmra.mxu1 %v24158_v34 }
 0x42f   : > { %v3020_v52 = vadd.f32 %v3019_v57, %v2944_v17  ;;  %21874 = vmatpush3.msra.mxu0 %v24218_v10  ;;  %21875 = vmatprep.mubr.msk.f32.mxu0 %vm23141_vm1, %v23140_v28 }
 0x430   : > { %v21387_v54 = vpop.f32.mrf.mxu0  ;;  %v21412_v58 = vpop.f32.mrf.mxu1  ;;  %21899 = vmatpush3.msra.mxu1 %v24119_v7  ;;  %21900 = vmatprep.mubr.msk.f32.mxu1 %vm23141_vm1, %v23140_v28 }
 0x431   : > { %v3096_v59 = vadd.f32 %v3095_v6, %v3020_v52  ;;  %21883 = vmatprep.subr.mxu0 %v23140_v28  ;;  %21908 = vmatprep.subr.mxu1 %v23140_v28 }
 0x432   : > { %v3169_v53 = vpop.f32.mrf.mxu0  ;;  %v3559_v60 = vpop.f32.mrf.mxu1  ;;  %21876 = vmatmul.mubr.f32.vlgmr.msra.gmra.mxu0 %v24176_v23  ;;  %21901 = vmatmul.mubr.f32.vlgmr.msra.gmra.mxu1 %v24279_v43  ;;  %v24321_v23 = vand.u32 4294901760, %v23592_v2 }
 0x433   : > { %v3170_v11 = vadd.f32 %v3169_v53, %v3096_v59  ;;  %21884 = vmatpush3.msra.mxu0 %v24231_v61  ;;  %21885 = vmatprep.mubr.msk.f32.mxu0 %vm23141_vm1, %v23140_v28 }
 0x434   : > { %v21397_v33 = vpop.f32.mrf.mxu0  ;;  %v21422_v63 = vpop.f32.mrf.mxu1  ;;  %21909 = vmatpush3.msra.mxu1 %v24062_v24  ;;  %21910 = vmatprep.mubr.msk.f32.mxu1 %vm23141_vm1, %v23140_v28 }
 0x435   : > { %v3244_v25 = vadd.f32 %v3243_v44, %v3170_v11  ;;  %21893 = vmatprep.subr.mxu0 %v23140_v28  ;;  %21918 = vmatprep.subr.mxu1 %v23140_v28 }
 0x436   : > { %v3317_v27 = vpop.f32.mrf.mxu0  ;;  %v3707_v29 = vpop.f32.mrf.mxu1  ;;  %21886 = vmatmul.mubr.f32.vlgmr.msra.gmra.mxu0 %v24158_v34  ;;  %21911 = vmatmul.mubr.f32.vlgmr.msra.gmra.mxu1 %v24306_v55  ;;  %v24337_v34 = vsub.f32 %v23592_v2, %v24321_v23 }
 0x437   : > { %v3318_v12 = vadd.f32 %v3317_v27, %v3244_v25  ;;  %21894 = vmatpush3.msra.mxu0 %v24062_v24  ;;  %21895 = vmatprep.mubr.msk.f32.mxu0 %vm23141_vm1, %v23140_v28 }
 0x438   : > { %v21407_v8 = vpop.f32.mrf.mxu0  ;;  %v21432_v49 = vpop.f32.mrf.mxu1  ;;  %21919 = vmatpush3.msra.mxu1 %v24062_v24  ;;  %21920 = vmatprep.mubr.msk.f32.mxu1 %vm23141_vm1, %v23140_v28  ;;  %v24351_v13 = vand.u32 4294901760, %v24337_v34 }
 0x439   : > { %v3390_v16 = vadd.f32 %v3389_v51, %v3318_v12  ;;  %21903 = vmatprep.subr.mxu0 %v23140_v28  ;;  %21928 = vmatprep.subr.mxu1 %v23140_v28 }
 0x43a   : > { %v3483_v31 = vpop.f32.mrf.mxu0  ;;  %v3853_v32 = vpop.f32.mrf.mxu1  ;;  %21896 = vmatmul.mubr.f32.vlgmr.msra.gmra.mxu0 %v24333_v30  ;;  %21921 = vmatmul.mubr.f32.vlgmr.msra.gmra.mxu1 %v24279_v43  ;;  %v11153_v6 = vsub.f32 %v24337_v34, %v24351_v13 }
 0x43b   : > { %3395 = vst.msk [vmem:[#allocation2 + $0x8] sm:$0xff] %vm3393_vm3, %v3390_v16  ;;  %21904 = vmatpush3.msra.mxu0 %v24075_v1  ;;  %21905 = vmatprep.mubr.msk.f32.mxu0 %vm23141_vm1, %v23140_v28  ;;  %v3560_v56 = vadd.f32 %v3559_v60, %v3483_v31 }
 0x43c   : > { %v21417_v2 = vpop.f32.mrf.mxu0  ;;  %v21442_v20 = vpop.f32.mrf.mxu1  ;;  %21929 = vmatpush3.msra.mxu1 %v24172_v15  ;;  %21930 = vmatprep.mubr.msk.f32.mxu1 %vm23141_vm1, %v23140_v28  ;;  %v24375_v46 = vand.u32 4294901760, %v11153_v6 }
 0x43d   : > { %21913 = vmatprep.subr.mxu0 %v23140_v28  ;;  %21938 = vmatprep.subr.mxu1 %v23140_v28 }
 0x43e   : > { %v3633_v37 = vpop.f32.mrf.mxu0  ;;  %v4008_v38 = vpop.f32.mrf.mxu1  ;;  %21906 = vmatmul.mubr.f32.vlgmr.msra.gmra.mxu0 %v24293_v48  ;;  %21931 = vmatmul.mubr.f32.vlgmr.msra.gmra.mxu1 %v24321_v23 }
 0x43f   : > { %v3634_v50 = vadd.f32 %v3633_v37, %v3560_v56  ;;  %21914 = vmatpush3.msra.mxu0 %v24087_v41  ;;  %21915 = vmatprep.mubr.msk.f32.mxu0 %vm23141_vm1, %v23140_v28  ;;  %v24429_v37 = vand.u32 4294901760, %v23597_v3 }
 0x440   : > { %v21427_v42 = vpop.f32.mrf.mxu0  ;;  %v21452_v36 = vpop.f32.mrf.mxu1  ;;  %21939 = vmatpush3.msra.mxu1 %v24107_v18  ;;  %21940 = vmatprep.mubr.msk.f32.mxu1 %vm23141_vm1, %v23140_v28 }
 0x441   : > { %v3708_v39 = vadd.f32 %v3707_v29, %v3634_v50  ;;  %21923 = vmatprep.subr.mxu0 %v23140_v28  ;;  %21948 = vmatprep.subr.mxu1 %v23140_v28 }
 0x442   : > { %v3781_v40 = vpop.f32.mrf.mxu0  ;;  %v4156_v22 = vpop.f32.mrf.mxu1  ;;  %21916 = vmatmul.mubr.f32.vlgmr.msra.gmra.mxu0 %v24279_v43  ;;  %21941 = vmatmul.mubr.f32.vlgmr.msra.gmra.mxu1 %v24351_v13 }
 0x443   : > { %v3782_v14 = vadd.f32 %v3781_v40, %v3708_v39  ;;  %21924 = vmatpush3.msra.mxu0 %v24107_v18  ;;  %21925 = vmatprep.mubr.msk.f32.mxu0 %vm23141_vm1, %v23140_v28  ;;  %v24443_v39 = vsub.f32 %v23597_v3, %v24429_v37 }
 0x444   : > { %v21437_v19 = vpop.f32.mrf.mxu0  ;;  %v21462_v44 = vpop.f32.mrf.mxu1  ;;  %21949 = vmatpush3.msra.mxu1 %v24107_v18  ;;  %21950 = vmatprep.mubr.msk.f32.mxu1 %vm23141_vm1, %v23140_v28 }
 0x445   : > { %v3854_v47 = vadd.f32 %v3853_v32, %v3782_v14  ;;  %21933 = vmatprep.subr.mxu0 %v23140_v28  ;;  %21958 = vmatprep.subr.mxu1 %v23140_v28  ;;  %v24456_v19 = vand.u32 4294901760, %v24443_v39 }
 0x446   : > { %v3932_v9 = vpop.f32.mrf.mxu0  ;;  %v4302_v17 = vpop.f32.mrf.mxu1  ;;  %21926 = vmatmul.mubr.f32.vlgmr.msra.gmra.mxu0 %v24375_v46  ;;  %21951 = vmatmul.mubr.f32.vlgmr.msra.gmra.mxu1 %v24321_v23 }
 0x447   : > { %v3933_v57 = vadd.f32 %v3932_v9, %v3854_v47  ;;  %21934 = vmatpush3.msra.mxu0 %v24126_v26  ;;  %21935 = vmatprep.mubr.msk.f32.mxu0 %vm23141_vm1, %v23140_v28 }
 0x448   : > { %v21447_v51 = vpop.f32.mrf.mxu0  ;;  %v21472_v52 = vpop.f32.mrf.mxu1  ;;  %21959 = vmatpush3.msra.mxu1 %v24172_v15  ;;  %21960 = vmatprep.mubr.msk.f32.mxu1 %vm23141_vm1, %v23140_v28 }
 0x449   : > { %v4009_v54 = vadd.f32 %v4008_v38, %v3933_v57  ;;  %21943 = vmatprep.subr.mxu0 %v23140_v28  ;;  %21968 = vmatprep.subr.mxu1 %v23140_v28  ;;  %v12510_v57 = vsub.f32 %v24443_v39, %v24456_v19 }
 0x44a   : > { %v4082_v58 = vpop.f32.mrf.mxu0  ;;  %v4455_v59 = vpop.f32.mrf.mxu1  ;;  %21936 = vmatmul.mubr.f32.vlgmr.msra.gmra.mxu0 %v24337_v34  ;;  %21961 = vmatmul.mubr.f32.vlgmr.msra.gmra.mxu1 %v24279_v43 }
 0x44b   : > { %v4083_v53 = vadd.f32 %v4082_v58, %v4009_v54  ;;  %21944 = vmatpush3.msra.mxu0 %v24141_v62  ;;  %21945 = vmatprep.mubr.msk.f32.mxu0 %vm23141_vm1, %v23140_v28 }
 0x44c   : > { %v21457_v60 = vpop.f32.mrf.mxu0  ;;  %v21482_v11 = vpop.f32.mrf.mxu1  ;;  %21969 = vmatpush3.msra.mxu1 %v24107_v18  ;;  %21970 = vmatprep.mubr.msk.f32.mxu1 %vm23141_vm1, %v23140_v28 }
 0x44d   : > { %v4157_v33 = vadd.f32 %v4156_v22, %v4083_v53  ;;  %21953 = vmatprep.subr.mxu0 %v23140_v28  ;;  %21978 = vmatprep.subr.mxu1 %v23140_v28  ;;  %v24483_v60 = vand.u32 4294901760, %v12510_v57 }
 0x44e   : > { %v4230_v63 = vpop.f32.mrf.mxu0  ;;  %v4603_v0 = vpop.f32.mrf.mxu1  ;;  %21946 = vmatmul.mubr.f32.vlgmr.msra.gmra.mxu0 %v24321_v23  ;;  %21971 = vmatmul.mubr.f32.vlgmr.msra.gmra.mxu1 %v24306_v55 }
 0x44f   : > { %v4231_v25 = vadd.f32 %v4230_v63, %v4157_v33  ;;  %21954 = vmatpush3.msra.mxu0 %v24107_v18  ;;  %21955 = vmatprep.mubr.msk.f32.mxu0 %vm23141_vm1, %v23140_v28 }
 0x450   : > { %v21467_v27 = vpop.f32.mrf.mxu0  ;;  %v21492_v29 = vpop.f32.mrf.mxu1  ;;  %21979 = vmatpush3.msra.mxu1 %v24107_v18  ;;  %21980 = vmatprep.mubr.msk.f32.mxu1 %vm23141_vm1, %v23140_v28 }
 0x451   : > { %v4303_v12 = vadd.f32 %v4302_v17, %v4231_v25  ;;  %21963 = vmatprep.subr.mxu0 %v23140_v28  ;;  %21988 = vmatprep.subr.mxu1 %v23140_v28 }
 0x452   : > { %v4379_v8 = vpop.f32.mrf.mxu0  ;;  %v4749_v55 = vpop.f32.mrf.mxu1  ;;  %21956 = vmatmul.mubr.f32.vlgmr.msra.gmra.mxu0 %v24333_v30  ;;  %21981 = vmatmul.mubr.f32.vlgmr.msra.gmra.mxu1 %v24279_v43 }
 0x453   : > { %5200 = vst.msk [vmem:[#allocation2 + $0x10] sm:$0xff] %vm3393_vm3, %v4303_v12  ;;  %21964 = vmatpush3.msra.mxu0 %v24126_v26  ;;  %21965 = vmatprep.mubr.msk.f32.mxu0 %vm23141_vm1, %v23140_v28  ;;  %v4456_v31 = vadd.f32 %v4455_v59, %v4379_v8 }
 0x454   : > { %v21477_v49 = vpop.f32.mrf.mxu0  ;;  %v21502_v16 = vpop.f32.mrf.mxu1  ;;  %21989 = vmatpush3.msra.mxu1 %v24255_v35  ;;  %21990 = vmatprep.mubr.msk.f32.mxu1 %vm23141_vm1, %v23140_v28 }
 0x455   : > { %21973 = vmatprep.subr.mxu0 %v23140_v28  ;;  %21998 = vmatprep.subr.mxu1 %v23140_v28 }
 0x456   : > { %v4529_v30 = vpop.f32.mrf.mxu0  ;;  %v4901_v32 = vpop.f32.mrf.mxu1  ;;  %21966 = vmatmul.mubr.f32.vlgmr.msra.gmra.mxu0 %v24293_v48  ;;  %21991 = vmatmul.mubr.f32.vlgmr.msra.gmra.mxu1 %v24321_v23 }
 0x457   : > { %v4530_v2 = vadd.f32 %v4529_v30, %v4456_v31  ;;  %21974 = vmatpush3.msra.mxu0 %v24141_v62  ;;  %21975 = vmatprep.mubr.msk.f32.mxu0 %vm23141_vm1, %v23140_v28 }
 0x458   : > { %v21487_v20 = vpop.f32.mrf.mxu0  ;;  %v21512_v56 = vpop.f32.mrf.mxu1  ;;  %21999 = vmatpush3.msra.mxu1 %v24203_v45  ;;  %22000 = vmatprep.mubr.msk.f32.mxu1 %vm23141_vm1, %v23140_v28 }
 0x459   : > { %v4604_v38 = vadd.f32 %v4603_v0, %v4530_v2  ;;  %21983 = vmatprep.subr.mxu0 %v23140_v28  ;;  %22008 = vmatprep.subr.mxu1 %v23140_v28 }
 0x45a   : > { %v4677_v48 = vpop.f32.mrf.mxu0  ;;  %v5049_v50 = vpop.f32.mrf.mxu1  ;;  %21976 = vmatmul.mubr.f32.vlgmr.msra.gmra.mxu0 %v24279_v43  ;;  %22001 = vmatmul.mubr.f32.vlgmr.msra.gmra.mxu1 %v24351_v13 }
 0x45b   : > { %v4678_v42 = vadd.f32 %v4677_v48, %v4604_v38  ;;  %21984 = vmatpush3.msra.mxu0 %v24203_v45  ;;  %21985 = vmatprep.mubr.msk.f32.mxu0 %vm23141_vm1, %v23140_v28 }
 0x45c   : > { %v21497_v36 = vpop.f32.mrf.mxu0  ;;  %v21522_v6 = vpop.f32.mrf.mxu1  ;;  %22009 = vmatpush3.msra.mxu1 %v24203_v45  ;;  %22010 = vmatprep.mubr.msk.f32.mxu1 %vm23141_vm1, %v23140_v28 }
 0x45d   : > { %v4750_v43 = vadd.f32 %v4749_v55, %v4678_v42  ;;  %21993 = vmatprep.subr.mxu0 %v23140_v28  ;;  %22018 = vmatprep.subr.mxu1 %v23140_v28  ;;  %v14243_v6 = vld [vmem:[#allocation12] sm:$0xff] }
 0x45e   : > { %v4825_v13 = vpop.f32.mrf.mxu0  ;;  %v5195_v40 = vpop.f32.mrf.mxu1  ;;  %21986 = vmatmul.mubr.f32.vlgmr.msra.gmra.mxu0 %v24375_v46  ;;  %22011 = vmatmul.mubr.f32.vlgmr.msra.gmra.mxu1 %v24321_v23 }
 0x45f   : > { %v4826_v22 = vadd.f32 %v4825_v13, %v4750_v43  ;;  %21994 = vmatpush3.msra.mxu0 %v24218_v10  ;;  %21995 = vmatprep.mubr.msk.f32.mxu0 %vm23141_vm1, %v23140_v28 }
 0x460   : > { %v21507_v14 = vpop.f32.mrf.mxu0  ;;  %v21532_v3 = vpop.f32.mrf.mxu1  ;;  %22019 = vmatpush3.msra.mxu1 %v24119_v7  ;;  %22020 = vmatprep.mubr.msk.f32.mxu1 %vm23141_vm1, %v23140_v28 }
 0x461   : > { %v4902_v44 = vadd.f32 %v4901_v32, %v4826_v22  ;;  %22003 = vmatprep.subr.mxu0 %v23140_v28  ;;  %22028 = vmatprep.subr.mxu1 %v23140_v28  ;;  %v24547_v14 = vand.u32 4294901760, %v14243_v6 }
 0x462   : > { %v4975_v46 = vpop.f32.mrf.mxu0  ;;  %v5365_v47 = vpop.f32.mrf.mxu1  ;;  %21996 = vmatmul.mubr.f32.vlgmr.msra.gmra.mxu0 %v24337_v34  ;;  %22021 = vmatmul.mubr.f32.vlgmr.msra.gmra.mxu1 %v24429_v37  ;;  %v24471_v34 = vand.u32 4294901760, %v23600_v4 }
 0x463   : > { %v4976_v9 = vadd.f32 %v4975_v46, %v4902_v44  ;;  %22004 = vmatpush3.msra.mxu0 %v24231_v61  ;;  %22005 = vmatprep.mubr.msk.f32.mxu0 %vm23141_vm1, %v23140_v28 }
 0x464   : > { %v21517_v7 = vpop.f32.mrf.mxu0  ;;  %v21542_v17 = vpop.f32.mrf.mxu1  ;;  %22029 = vmatpush3.msra.mxu1 %v24062_v24  ;;  %22030 = vmatprep.mubr.msk.f32.mxu1 %vm23141_vm1, %v23140_v28 }
 0x465   : > { %v5050_v51 = vadd.f32 %v5049_v50, %v4976_v9  ;;  %22013 = vmatprep.subr.mxu0 %v23140_v28  ;;  %22038 = vmatprep.subr.mxu1 %v23140_v28  ;;  %v24560_v17 = vsub.f32 %v14243_v6, %v24547_v14 }
 0x466   : > { %v5123_v52 = vpop.f32.mrf.mxu0  ;;  %v5513_v54 = vpop.f32.mrf.mxu1  ;;  %22006 = vmatmul.mubr.f32.vlgmr.msra.gmra.mxu0 %v24321_v23  ;;  %22031 = vmatmul.mubr.f32.vlgmr.msra.gmra.mxu1 %v24456_v19  ;;  %v24487_v23 = vsub.f32 %v23600_v4, %v24471_v34 }
 0x467   : > { %v5124_v58 = vadd.f32 %v5123_v52, %v5050_v51  ;;  %22014 = vmatpush3.msra.mxu0 %v24062_v24  ;;  %22015 = vmatprep.mubr.msk.f32.mxu0 %vm23141_vm1, %v23140_v28 }
 0x468   : > { %v21527_v59 = vpop.f32.mrf.mxu0  ;;  %v21552_v53 = vpop.f32.mrf.mxu1  ;;  %22039 = vmatpush3.msra.mxu1 %v24062_v24  ;;  %22040 = vmatprep.mubr.msk.f32.mxu1 %vm23141_vm1, %v23140_v28  ;;  %v24501_v0 = vand.u32 4294901760, %v24487_v23 }
 0x469   : > { %v5196_v11 = vadd.f32 %v5195_v40, %v5124_v58  ;;  %22023 = vmatprep.subr.mxu0 %v23140_v28  ;;  %22048 = vmatprep.subr.mxu1 %v23140_v28 }
 0x46a   : > { %v5289_v33 = vpop.f32.mrf.mxu0  ;;  %v5659_v63 = vpop.f32.mrf.mxu1  ;;  %22016 = vmatmul.mubr.f32.vlgmr.msra.gmra.mxu0 %v24483_v60  ;;  %22041 = vmatmul.mubr.f32.vlgmr.msra.gmra.mxu1 %v24429_v37  ;;  %v12959_v55 = vsub.f32 %v24487_v23, %v24501_v0 }
 0x46b   : > { %5201 = vst.msk [vmem:[#allocation2 + $0x18] sm:$0xff] %vm3393_vm3, %v5196_v11  ;;  %22024 = vmatpush3.msra.mxu0 %v24075_v1  ;;  %22025 = vmatprep.mubr.msk.f32.mxu0 %vm23141_vm1, %v23140_v28  ;;  %v5366_v25 = vadd.f32 %v5365_v47, %v5289_v33 }
 0x46c   : > { %v21537_v4 = vpop.f32.mrf.mxu0  ;;  %v21562_v24 = vpop.f32.mrf.mxu1  ;;  %22049 = vmatpush3.msra.mxu1 %v24172_v15  ;;  %22050 = vmatprep.mubr.msk.f32.mxu1 %vm23141_vm1, %v23140_v28  ;;  %v24525_v2 = vand.u32 4294901760, %v12959_v55 }
 0x46d   : > { %22033 = vmatprep.subr.mxu0 %v23140_v28  ;;  %22058 = vmatprep.subr.mxu1 %v23140_v28 }
 0x46e   : > { %v5439_v27 = vpop.f32.mrf.mxu0  ;;  %v5814_v1 = vpop.f32.mrf.mxu1  ;;  %22026 = vmatmul.mubr.f32.vlgmr.msra.gmra.mxu0 %v24443_v39  ;;  %22051 = vmatmul.mubr.f32.vlgmr.msra.gmra.mxu1 %v24471_v34 }
 0x46f   : > { %v5440_v29 = vadd.f32 %v5439_v27, %v5366_v25  ;;  %22034 = vmatpush3.msra.mxu0 %v24087_v41  ;;  %22035 = vmatprep.mubr.msk.f32.mxu0 %vm23141_vm1, %v23140_v28 }
 0x470   : > { %v21547_v12 = vpop.f32.mrf.mxu0  ;;  %v21572_v8 = vpop.f32.mrf.mxu1  ;;  %22059 = vmatpush3.msra.mxu1 %v24107_v18  ;;  %22060 = vmatprep.mubr.msk.f32.mxu1 %vm23141_vm1, %v23140_v28 }
 0x471   : > { %v5514_v49 = vadd.f32 %v5513_v54, %v5440_v29  ;;  %22043 = vmatprep.subr.mxu0 %v23140_v28  ;;  %22068 = vmatprep.subr.mxu1 %v23140_v28  ;;  %v14356_v54 = vand.u32 4294901760, %v24560_v17 }
 0x472   : > { %v5587_v16 = vpop.f32.mrf.mxu0  ;;  %v5962_v41 = vpop.f32.mrf.mxu1  ;;  %22036 = vmatmul.mubr.f32.vlgmr.msra.gmra.mxu0 %v24429_v37  ;;  %22061 = vmatmul.mubr.f32.vlgmr.msra.gmra.mxu1 %v24501_v0 }
 0x473   : > { %v5588_v31 = vadd.f32 %v5587_v16, %v5514_v49  ;;  %22044 = vmatpush3.msra.mxu0 %v24107_v18  ;;  %22045 = vmatprep.mubr.msk.f32.mxu0 %vm23141_vm1, %v23140_v28  ;;  %v14357_v33 = vsub.f32 %v24560_v17, %v14356_v54 }
 0x474   : > { %v21557_v30 = vpop.f32.mrf.mxu0  ;;  %v21582_v32 = vpop.f32.mrf.mxu1  ;;  %22069 = vmatpush3.msra.mxu1 %v24107_v18  ;;  %22070 = vmatprep.mubr.msk.f32.mxu1 %vm23141_vm1, %v23140_v28 }
 0x475   : > { %v5660_v20 = vadd.f32 %v5659_v63, %v5588_v31  ;;  %22053 = vmatprep.subr.mxu0 %v23140_v28  ;;  %22078 = vmatprep.subr.mxu1 %v23140_v28  ;;  %v14358_v29 = vand.u32 4294901760, %v14357_v33 }
 0x476   : > { %v5738_v56 = vpop.f32.mrf.mxu0  ;;  %v6108_v38 = vpop.f32.mrf.mxu1  ;;  %22046 = vmatmul.mubr.f32.vlgmr.msra.gmra.mxu0 %v24525_v2  ;;  %22071 = vmatmul.mubr.f32.vlgmr.msra.gmra.mxu1 %v24471_v34 }
 0x477   : > { %v5739_v48 = vadd.f32 %v5738_v56, %v5660_v20  ;;  %22054 = vmatpush3.msra.mxu0 %v24126_v26  ;;  %22055 = vmatprep.mubr.msk.f32.mxu0 %vm23141_vm1, %v23140_v28 }
 0x478   : > { %v21567_v50 = vpop.f32.mrf.mxu0  ;;  %v21592_v42 = vpop.f32.mrf.mxu1  ;;  %22079 = vmatpush3.msra.mxu1 %v24172_v15  ;;  %22080 = vmatprep.mubr.msk.f32.mxu1 %vm23141_vm1, %v23140_v28 }
 0x479   : > { %v5815_v36 = vadd.f32 %v5814_v1, %v5739_v48  ;;  %22063 = vmatprep.subr.mxu0 %v23140_v28  ;;  %22088 = vmatprep.subr.mxu1 %v23140_v28 }
 0x47a   : > { %v5888_v43 = vpop.f32.mrf.mxu0  ;;  %v6261_v13 = vpop.f32.mrf.mxu1  ;;  %22056 = vmatmul.mubr.f32.vlgmr.msra.gmra.mxu0 %v24487_v23  ;;  %22081 = vmatmul.mubr.f32.vlgmr.msra.gmra.mxu1 %v24429_v37 }
 0x47b   : > { %v5889_v40 = vadd.f32 %v5888_v43, %v5815_v36  ;;  %22064 = vmatpush3.msra.mxu0 %v24141_v62  ;;  %22065 = vmatprep.mubr.msk.f32.mxu0 %vm23141_vm1, %v23140_v28 }
 0x47c   : > { %v21577_v15 = vpop.f32.mrf.mxu0  ;;  %v21602_v22 = vpop.f32.mrf.mxu1  ;;  %22089 = vmatpush3.msra.mxu1 %v24107_v18  ;;  %22090 = vmatprep.mubr.msk.f32.mxu1 %vm23141_vm1, %v23140_v28 }
 0x47d   : > { %v5963_v3 = vadd.f32 %v5962_v41, %v5889_v40  ;;  %22073 = vmatprep.subr.mxu0 %v23140_v28  ;;  %22098 = vmatprep.subr.mxu1 %v23140_v28 }
 0x47e   : > { %v6036_v44 = vpop.f32.mrf.mxu0  ;;  %v6409_v46 = vpop.f32.mrf.mxu1  ;;  %22066 = vmatmul.mubr.f32.vlgmr.msra.gmra.mxu0 %v24471_v34  ;;  %22091 = vmatmul.mubr.f32.vlgmr.msra.gmra.mxu1 %v24456_v19 }
 0x47f   : > { %v6037_v47 = vadd.f32 %v6036_v44, %v5963_v3  ;;  %22074 = vmatpush3.msra.mxu0 %v24107_v18  ;;  %22075 = vmatprep.mubr.msk.f32.mxu0 %vm23141_vm1, %v23140_v28 }
 0x480   : > { %v21587_v9 = vpop.f32.mrf.mxu0  ;;  %v21612_v7 = vpop.f32.mrf.mxu1  ;;  %22099 = vmatpush3.msra.mxu1 %v24107_v18  ;;  %22100 = vmatprep.mubr.msk.f32.mxu1 %vm23141_vm1, %v23140_v28 }
 0x481   : > { %v6109_v57 = vadd.f32 %v6108_v38, %v6037_v47  ;;  %22083 = vmatprep.subr.mxu0 %v23140_v28  ;;  %22108 = vmatprep.subr.mxu1 %v23140_v28  ;;  %v24642_v38 = vand.u32 4294901760, %v23634_v21 }
 0x482   : > { %v6185_v19 = vpop.f32.mrf.mxu0  ;;  %v6555_v51 = vpop.f32.mrf.mxu1  ;;  %22076 = vmatmul.mubr.f32.vlgmr.msra.gmra.mxu0 %v24483_v60  ;;  %22101 = vmatmul.mubr.f32.vlgmr.msra.gmra.mxu1 %v24429_v37 }
 0x483   : > { %7006 = vst.msk [vmem:[#allocation2 + $0x20] sm:$0xff] %vm3393_vm3, %v6109_v57  ;;  %22084 = vmatpush3.msra.mxu0 %v24126_v26  ;;  %22085 = vmatprep.mubr.msk.f32.mxu0 %vm23141_vm1, %v23140_v28  ;;  %v6262_v58 = vadd.f32 %v6261_v13, %v6185_v19  ;;  %v14242_v26 = vld [vmem:[%s25368_s5] sm:$0xff] }
 0x484   : > { %v21597_v18 = vpop.f32.mrf.mxu0  ;;  %v21622_v52 = vpop.f32.mrf.mxu1  ;;  %22109 = vmatpush3.msra.mxu1 %v24255_v35  ;;  %22110 = vmatprep.mubr.msk.f32.mxu1 %vm23141_vm1, %v23140_v28  ;;  %v24593_v63 = vand.u32 4294901760, %v14242_v26 }
 0x485   : > { %22093 = vmatprep.subr.mxu0 %v23140_v28  ;;  %22118 = vmatprep.subr.mxu1 %v23140_v28 }
 0x486   : > { %v6335_v59 = vpop.f32.mrf.mxu0  ;;  %v6707_v53 = vpop.f32.mrf.mxu1  ;;  %22086 = vmatmul.mubr.f32.vlgmr.msra.gmra.mxu0 %v24443_v39  ;;  %22111 = vmatmul.mubr.f32.vlgmr.msra.gmra.mxu1 %v24471_v34  ;;  %v24591_v39 = vand.u32 4294901760, %v23603_v5 }
 0x487   : > { %v6336_v35 = vadd.f32 %v6335_v59, %v6262_v58  ;;  %22094 = vmatpush3.msra.mxu0 %v24141_v62  ;;  %22095 = vmatprep.mubr.msk.f32.mxu0 %vm23141_vm1, %v23140_v28 }
 0x488   : > { %v21607_v60 = vpop.f32.mrf.mxu0  ;;  %v21632_v11 = vpop.f32.mrf.mxu1  ;;  %22119 = vmatpush3.msra.mxu1 %v24203_v45  ;;  %22120 = vmatprep.mubr.msk.f32.mxu1 %vm23141_vm1, %v23140_v28  ;;  %v24607_v12 = vsub.f32 %v23603_v5, %v24591_v39 }
 0x489   : > { %v6410_v62 = vadd.f32 %v6409_v46, %v6336_v35  ;;  %22103 = vmatprep.subr.mxu0 %v23140_v28  ;;  %22128 = vmatprep.subr.mxu1 %v23140_v28  ;;  %v15142_v46 = vld [vmem:[#allocation14] sm:$0xff] }
 0x48a   : > { %v6483_v4 = vpop.f32.mrf.mxu0  ;;  %v6855_v24 = vpop.f32.mrf.mxu1  ;;  %22096 = vmatmul.mubr.f32.vlgmr.msra.gmra.mxu0 %v24429_v37  ;;  %22121 = vmatmul.mubr.f32.vlgmr.msra.gmra.mxu1 %v24501_v0  ;;  %v24610_v37 = vsub.f32 %v14242_v26, %v24593_v63  ;;  %v24622_v16 = vand.u32 4294901760, %v24607_v12  ;;  %v24686_v18 = vand.u32 4294901760, %v15142_v46 }
 0x48b   : > { %v6484_v25 = vadd.f32 %v6483_v4, %v6410_v62  ;;  %22104 = vmatpush3.msra.mxu0 %v24203_v45  ;;  %22105 = vmatprep.mubr.msk.f32.mxu0 %vm23141_vm1, %v23140_v28  ;;  %v16041_v4 = vld [vmem:[#allocation2 + $0x8] sm:$0xff] }
 0x48c   : > { %v21617_v27 = vpop.f32.mrf.mxu0  ;;  %v21642_v1 = vpop.f32.mrf.mxu1  ;;  %22129 = vmatpush3.msra.mxu1 %v24203_v45  ;;  %22130 = vmatprep.mubr.msk.f32.mxu1 %vm23141_vm1, %v23140_v28  ;;  %v24625_v41 = vand.u32 4294901760, %v24610_v37  ;;  %v14316_v56 = vsub.f32 %v24607_v12, %v24622_v16  ;;  %v24701_v35 = vsub.f32 %v15142_v46, %v24686_v18 }
 0x48d   : > { %v6556_v0 = vadd.f32 %v6555_v51, %v6484_v25  ;;  %22113 = vmatprep.subr.mxu0 %v23140_v28  ;;  %22138 = vmatprep.subr.mxu1 %v23140_v28 }
 0x48e   : > { %v6631_v8 = vpop.f32.mrf.mxu0  ;;  %v7001_v55 = vpop.f32.mrf.mxu1  ;;  %22106 = vmatmul.mubr.f32.vlgmr.msra.gmra.mxu0 %v24525_v2  ;;  %22131 = vmatmul.mubr.f32.vlgmr.msra.gmra.mxu1 %v24471_v34  ;;  %v24654_v43 = vand.u32 4294901760, %v14316_v56  ;;  %v15698_v27 = vand.u32 4294901760, %v24701_v35 }
 0x48f   : > { %v6632_v45 = vadd.f32 %v6631_v8, %v6556_v0  ;;  %22114 = vmatpush3.msra.mxu0 %v24218_v10  ;;  %22115 = vmatprep.mubr.msk.f32.mxu0 %vm23141_vm1, %v23140_v28  ;;  %v24717_v8 = vand.u32 4294901760, %v16041_v4 }
 0x490   : > { %v21627_v5 = vpop.f32.mrf.mxu0  ;;  %v21652_v49 = vpop.f32.mrf.mxu1  ;;  %22139 = vmatpush3.msra.mxu1 %v14358_v29  ;;  %22140 = vmatprep.mubr.msk.f32.mxu1 %vm23141_vm1, %v23140_v28 }
 0x491   : > { %v6708_v31 = vadd.f32 %v6707_v53, %v6632_v45  ;;  %22123 = vmatprep.subr.mxu0 %v23140_v28  ;;  %22148 = vmatprep.subr.mxu1 %v23140_v28  ;;  %v16040_v45 = vld [vmem:[#allocation2] sm:$0xff] }
 0x492   : > { %v6781_v10 = vpop.f32.mrf.mxu0  ;;  %v7171_v30 = vpop.f32.mrf.mxu1  ;;  %22116 = vmatmul.mubr.f32.vlgmr.msra.gmra.mxu0 %v24487_v23  ;;  %22141 = vmatmul.mubr.f32.vlgmr.msra.gmra.mxu1 %v24591_v39  ;;  %v14806_v23 = vsub.f32 %v24610_v37, %v24625_v41 }
 0x493   : > { %v6782_v32 = vadd.f32 %v6781_v10, %v6708_v31  ;;  %22124 = vmatpush3.msra.mxu0 %v24231_v61  ;;  %22125 = vmatprep.mubr.msk.f32.mxu0 %vm23141_vm1, %v23140_v28  ;;  %v15699_v31 = vsub.f32 %v24701_v35, %v15698_v27 }
 0x494   : > { %v21637_v2 = vpop.f32.mrf.mxu0  ;;  %v21662_v20 = vpop.f32.mrf.mxu1  ;;  %22149 = vmatpush3.msra.mxu1 %v24547_v14  ;;  %22150 = vmatprep.mubr.msk.f32.mxu1 %vm23141_vm1, %v23140_v28  ;;  %v14807_v13 = vand.u32 4294901760, %v14806_v23 }
 0x495   : > { %v6856_v61 = vadd.f32 %v6855_v24, %v6782_v32  ;;  %22133 = vmatprep.subr.mxu0 %v23140_v28  ;;  %22158 = vmatprep.subr.mxu1 %v23140_v28  ;;  %v24733_v2 = vsub.f32 %v16041_v4, %v24717_v8  ;;  %v24735_v20 = vand.u32 4294901760, %v16040_v45 }
 0x496   : > { %v6929_v48 = vpop.f32.mrf.mxu0  ;;  %v7319_v50 = vpop.f32.mrf.mxu1  ;;  %22126 = vmatmul.mubr.f32.vlgmr.msra.gmra.mxu0 %v24471_v34  ;;  %22151 = vmatmul.mubr.f32.vlgmr.msra.gmra.mxu1 %v24622_v16  ;;  %v24658_v34 = vsub.f32 %v23634_v21, %v24642_v38 }
 0x497   : > { %v6930_v42 = vadd.f32 %v6929_v48, %v6856_v61  ;;  %22134 = vmatpush3.msra.mxu0 %v24547_v14  ;;  %22135 = vmatprep.mubr.msk.f32.mxu0 %vm23141_vm1, %v23140_v28  ;;  %v15700_v48 = vand.u32 4294901760, %v15699_v31 }
 0x498   : > { %v21647_v36 = vpop.f32.mrf.mxu0  ;;  %v21672_v6 = vpop.f32.mrf.mxu1  ;;  %22159 = vmatpush3.msra.mxu1 %v24547_v14  ;;  %22160 = vmatprep.mubr.msk.f32.mxu1 %vm23141_vm1, %v23140_v28  ;;  %v24671_v3 = vand.u32 4294901760, %v24658_v34 }
 0x499   : > { %v7002_v40 = vadd.f32 %v7001_v55, %v6930_v42  ;;  %22143 = vmatprep.subr.mxu0 %v23140_v28  ;;  %22168 = vmatprep.subr.mxu1 %v23140_v28  ;;  %v24748_v6 = vand.u32 4294901760, %v24733_v2 }
 0x49a   : > { %v7095_v15 = vpop.f32.mrf.mxu0  ;;  %v7465_v22 = vpop.f32.mrf.mxu1  ;;  %22136 = vmatmul.mubr.f32.vlgmr.msra.gmra.mxu0 %v24654_v43  ;;  %22161 = vmatmul.mubr.f32.vlgmr.msra.gmra.mxu1 %v24591_v39  ;;  %v14765_v51 = vsub.f32 %v24658_v34, %v24671_v3 }
 0x49b   : > { %7007 = vst.msk [vmem:[#allocation2 + $0x28] sm:$0xff] %vm3393_vm3, %v7002_v40  ;;  %22144 = vmatpush3.msra.mxu0 %v24560_v17  ;;  %22145 = vmatprep.mubr.msk.f32.mxu0 %vm23141_vm1, %v23140_v28  ;;  %v7172_v44 = vadd.f32 %v7171_v30, %v7095_v15 }
 0x49c   : > { %v21657_v21 = vpop.f32.mrf.mxu0  ;;  %v21682_v14 = vpop.f32.mrf.mxu1  ;;  %22169 = vmatpush3.msra.mxu1 %v14807_v13  ;;  %22170 = vmatprep.mubr.msk.f32.mxu1 %vm23141_vm1, %v23140_v28  ;;  %v24698_v53 = vand.u32 4294901760, %v14765_v51 }
 0x49d   : > { %22153 = vmatprep.subr.mxu0 %v23140_v28  ;;  %22178 = vmatprep.subr.mxu1 %v23140_v28 }
 0x49e   : > { %v7245_v47 = vpop.f32.mrf.mxu0  ;;  %v7620_v9 = vpop.f32.mrf.mxu1  ;;  %22146 = vmatmul.mubr.f32.vlgmr.msra.gmra.mxu0 %v24607_v12  ;;  %22171 = vmatmul.mubr.f32.vlgmr.msra.gmra.mxu1 %v24642_v38 }
 0x49f   : > { %v7246_v7 = vadd.f32 %v7245_v47, %v7172_v44  ;;  %22154 = vmatpush3.msra.mxu0 %v14356_v54  ;;  %22155 = vmatprep.mubr.msk.f32.mxu0 %vm23141_vm1, %v23140_v28 }
 0x4a0   : > { %v21667_v57 = vpop.f32.mrf.mxu0  ;;  %v21692_v19 = vpop.f32.mrf.mxu1  ;;  %22179 = vmatpush3.msra.mxu1 %v24593_v63  ;;  %22180 = vmatprep.mubr.msk.f32.mxu1 %vm23141_vm1, %v23140_v28 }
 0x4a1   : > { %v7320_v52 = vadd.f32 %v7319_v50, %v7246_v7  ;;  %22163 = vmatprep.subr.mxu0 %v23140_v28  ;;  %22188 = vmatprep.subr.mxu1 %v23140_v28  ;;  %v16038_v50 = vld [vmem:[#allocation15] sm:$0xff] }
 0x4a2   : > { %v7393_v17 = vpop.f32.mrf.mxu0  ;;  %v7768_v54 = vpop.f32.mrf.mxu1  ;;  %22156 = vmatmul.mubr.f32.vlgmr.msra.gmra.mxu0 %v24591_v39  ;;  %22181 = vmatmul.mubr.f32.vlgmr.msra.gmra.mxu1 %v24671_v3 }
 0x4a3   : > { %v7394_v58 = vadd.f32 %v7393_v17, %v7320_v52  ;;  %22164 = vmatpush3.msra.mxu0 %v24593_v63  ;;  %22165 = vmatprep.mubr.msk.f32.mxu0 %vm23141_vm1, %v23140_v28 }
 0x4a4   : > { %v21677_v26 = vpop.f32.mrf.mxu0  ;;  %v21702_v59 = vpop.f32.mrf.mxu1  ;;  %22189 = vmatpush3.msra.mxu1 %v24593_v63  ;;  %22190 = vmatprep.mubr.msk.f32.mxu1 %vm23141_vm1, %v23140_v28 }
 0x4a5   : > { %v7466_v60 = vadd.f32 %v7465_v22, %v7394_v58  ;;  %22173 = vmatprep.subr.mxu0 %v23140_v28  ;;  %22198 = vmatprep.subr.mxu1 %v23140_v28  ;;  %v16564_v59 = vld [vmem:[#allocation2 + $0x10] sm:$0xff] }
 0x4a6   : > { %v7544_v11 = vpop.f32.mrf.mxu0  ;;  %v7914_v33 = vpop.f32.mrf.mxu1  ;;  %22166 = vmatmul.mubr.f32.vlgmr.msra.gmra.mxu0 %v24698_v53  ;;  %22191 = vmatmul.mubr.f32.vlgmr.msra.gmra.mxu1 %v24642_v38 }
 0x4a7   : > { %v7545_v62 = vadd.f32 %v7544_v11, %v7466_v60  ;;  %22174 = vmatpush3.msra.mxu0 %v24610_v37  ;;  %22175 = vmatprep.mubr.msk.f32.mxu0 %vm23141_vm1, %v23140_v28 }
 0x4a8   : > { %v21687_v24 = vpop.f32.mrf.mxu0  ;;  %v21712_v25 = vpop.f32.mrf.mxu1  ;;  %22199 = vmatpush3.msra.mxu1 %v14807_v13  ;;  %22200 = vmatprep.mubr.msk.f32.mxu1 %vm23141_vm1, %v23140_v28  ;;  %v16039_v13 = vld [vmem:[#allocation15 + $0x8] sm:$0xff] }
 0x4a9   : > { %v7621_v1 = vadd.f32 %v7620_v9, %v7545_v62  ;;  %22183 = vmatprep.subr.mxu0 %v23140_v28  ;;  %22208 = vmatprep.subr.mxu1 %v23140_v28  ;;  %v16047_v46 = vsel %vm559_vm0, %v16039_v13, 0  ;;  %v24803_v24 = vand.u32 4294901760, %v16564_v59 }
 0x4aa   : > { %v7694_v29 = vpop.f32.mrf.mxu0  ;;  %v8067_v0 = vpop.f32.mrf.mxu1  ;;  %22176 = vmatmul.mubr.f32.vlgmr.msra.gmra.mxu0 %v24658_v34  ;;  %22201 = vmatmul.mubr.f32.vlgmr.msra.gmra.mxu1 %v24591_v39  ;;  %v24780_v51 = vand.u32 4294901760, %v16047_v46 }
 0x4ab   : > { %v7695_v55 = vadd.f32 %v7694_v29, %v7621_v1  ;;  %22184 = vmatpush3.msra.mxu0 %v24625_v41  ;;  %22185 = vmatprep.mubr.msk.f32.mxu0 %vm23141_vm1, %v23140_v28  ;;  %v24821_v31 = vsub.f32 %v16564_v59, %v24803_v24 }
 0x4ac   : > { %v21697_v5 = vpop.f32.mrf.mxu0  ;;  %v21722_v49 = vpop.f32.mrf.mxu1  ;;  %22209 = vmatpush3.msra.mxu1 %v24593_v63  ;;  %22210 = vmatprep.mubr.msk.f32.mxu1 %vm23141_vm1, %v23140_v28 }
 0x4ad   : > { %v7769_v10 = vadd.f32 %v7768_v54, %v7695_v55  ;;  %22193 = vmatprep.subr.mxu0 %v23140_v28  ;;  %22218 = vmatprep.subr.mxu1 %v23140_v28 }
 0x4ae   : > { %v7842_v30 = vpop.f32.mrf.mxu0  ;;  %v8215_v32 = vpop.f32.mrf.mxu1  ;;  %22186 = vmatmul.mubr.f32.vlgmr.msra.gmra.mxu0 %v24642_v38  ;;  %22211 = vmatmul.mubr.f32.vlgmr.msra.gmra.mxu1 %v24622_v16 }
 0x4af   : > { %v7843_v56 = vadd.f32 %v7842_v30, %v7769_v10  ;;  %22194 = vmatpush3.msra.mxu0 %v24593_v63  ;;  %22195 = vmatprep.mubr.msk.f32.mxu0 %vm23141_vm1, %v23140_v28 }
 0x4b0   : > { %v21707_v23 = vpop.f32.mrf.mxu0  ;;  %v21732_v61 = vpop.f32.mrf.mxu1  ;;  %22219 = vmatpush3.msra.mxu1 %v24593_v63  ;;  %22220 = vmatprep.mubr.msk.f32.mxu1 %vm23141_vm1, %v23140_v28  ;;  %v24751_v63 = vsub.f32 %v16040_v45, %v24735_v20 }
 0x4b1   : > { %v7915_v16 = vadd.f32 %v7914_v33, %v7843_v56  ;;  %22203 = vmatprep.subr.mxu0 %v23140_v28  ;;  %22228 = vmatprep.subr.mxu1 %v23140_v28 }
 0x4b2   : > { %v7991_v42 = vpop.f32.mrf.mxu0  ;;  %v8361_v36 = vpop.f32.mrf.mxu1  ;;  %22196 = vmatmul.mubr.f32.vlgmr.msra.gmra.mxu0 %v24654_v43  ;;  %22221 = vmatmul.mubr.f32.vlgmr.msra.gmra.mxu1 %v24591_v39  ;;  %v16044_v43 = vsel %vm559_vm0, %v16038_v50, 0  ;;  %v24767_v44 = vand.u32 4294901760, %v24751_v63 }
 0x4b3   : > { %8812 = vst.msk [vmem:[#allocation2 + $0x30] sm:$0xff] %vm3393_vm3, %v7915_v16  ;;  %22204 = vmatpush3.msra.mxu0 %v24610_v37  ;;  %22205 = vmatprep.mubr.msk.f32.mxu0 %vm23141_vm1, %v23140_v28  ;;  %v8068_v22 = vadd.f32 %v8067_v0, %v7991_v42  ;;  %v16168_v37 = vsub.f32 %v24733_v2, %v24748_v6  ;;  %v24772_v9 = vand.u32 4294901760, %v16044_v43 }
 0x4b4   : > { %v21717_v40 = vpop.f32.mrf.mxu0  ;;  %v21742_v15 = vpop.f32.mrf.mxu1  ;;  %22229 = vmatpush3.msra.mxu1 %v15700_v48  ;;  %22230 = vmatprep.mubr.msk.f32.mxu1 %vm23141_vm1, %v23140_v28  ;;  %v16175_v54 = vsub.f32 %v24751_v63, %v24767_v44  ;;  %v24841_v48 = vand.u32 4294901760, %v24821_v31 }
 0x4b5   : > { %22213 = vmatprep.subr.mxu0 %v23140_v28  ;;  %22238 = vmatprep.subr.mxu1 %v23140_v28  ;;  %v16169_v17 = vand.u32 4294901760, %v16168_v37  ;;  %v24791_v60 = vsub.f32 %v16044_v43, %v24772_v9 }
 0x4b6   : > { %v8141_v21 = vpop.f32.mrf.mxu0  ;;  %v8513_v14 = vpop.f32.mrf.mxu1  ;;  %22206 = vmatmul.mubr.f32.vlgmr.msra.gmra.mxu0 %v24607_v12  ;;  %22231 = vmatmul.mubr.f32.vlgmr.msra.gmra.mxu1 %v24642_v38  ;;  %v16565_v12 = vld [vmem:[#allocation2 + $0x18] sm:$0xff]  ;;  %v16176_v4 = vand.u32 4294901760, %v16175_v54 }
 0x4b7   : > { %v8142_v47 = vadd.f32 %v8141_v21, %v8068_v22  ;;  %22214 = vmatpush3.msra.mxu0 %v24625_v41  ;;  %22239 = vmatpush3.msra.mxu1 %v24686_v18  ;;  %v24788_v26 = vand.u32 4294901760, %v16565_v12  ;;  %v17084_v22 = vld [vmem:[#allocation2 + $0x28] sm:$0xff] }
 0x4b8   : > { %v21727_v7 = vpop.f32.mrf.mxu0  ;;  %v21752_v57 = vpop.f32.mrf.mxu1  ;;  %22215 = vmatprep.mubr.msk.f32.mxu0 %vm23141_vm1, %v23140_v28  ;;  %22240 = vmatprep.mubr.msk.f32.mxu1 %vm23141_vm1, %v23140_v28 }
 0x4b9   : > { %22248 = vmatprep.subr.mxu1 %v23140_v28  ;;  %v8216_v19 = vadd.f32 %v8215_v32, %v8142_v47  ;;  %22223 = vmatprep.subr.mxu0 %v23140_v28  ;;  %v24807_v1 = vsub.f32 %v16565_v12, %v24788_v26  ;;  %v17083_v47 = vld [vmem:[#allocation2 + $0x20] sm:$0xff] }
 0x4ba   : > { %v8289_v41 = vpop.f32.mrf.mxu0  ;;  %v8661_v52 = vpop.f32.mrf.mxu1  ;;  %22216 = vmatmul.mubr.f32.vlgmr.msra.gmra.mxu0 %v24591_v39  ;;  %22241 = vmatmul.mubr.f32.vlgmr.msra.gmra.mxu1 %v24671_v3 }
 0x4bb   : > { %v8290_v58 = vadd.f32 %v8289_v41, %v8216_v19  ;;  %22249 = vmatpush3.msra.mxu1 %v24686_v18  ;;  %22224 = vmatpush3.msra.mxu0 %v24686_v18  ;;  %v24799_v18 = vsub.f32 %v16047_v46, %v24780_v51  ;;  %v24826_v30 = vand.u32 4294901760, %v24807_v1  ;;  %v24865_v46 = vand.u32 4294901760, %v17084_v22 }
 0x4bc   : > { %22260 = vmatprep.subr.mxu1 %v16169_v17  ;;  %v21737_v11 = vpop.f32.mrf.mxu0  ;;  %v21762_v39 = vpop.f32.mrf.mxu1  ;;  %22225 = vmatprep.mubr.msk.f32.mxu0 %vm23141_vm1, %v23140_v28 }
 0x4bd   : > { %22250 = vmatprep.mubr.msk.f32.mxu1 %vm23141_vm1, %v23140_v28  ;;  %v8362_v3 = vadd.f32 %v8361_v36, %v8290_v58  ;;  %22233 = vmatprep.subr.mxu0 %v23140_v28  ;;  %v24818_v49 = vand.u32 4294901760, %v24799_v18  ;;  %v16685_v50 = vsub.f32 %v24807_v1, %v24826_v30  ;;  %v24875_v54 = vsub.f32 %v17084_v22, %v24865_v46 }
 0x4be   : > { %v8437_v33 = vpop.f32.mrf.mxu0  ;;  %v8807_v62 = vpop.f32.mrf.mxu1  ;;  %22226 = vmatmul.mubr.f32.vlgmr.msra.gmra.mxu0 %v24698_v53  ;;  %22251 = vmatmul.mubr.f32.vlgmr.msra.gmra.mxu1 %v24642_v38  ;;  %v24812_v53 = vand.u32 4294901760, %v24791_v60 }
 0x4bf   : > { %v8438_v25 = vadd.f32 %v8437_v33, %v8362_v3  ;;  %22261 = vmatpush3.msra.mxu1 %v16169_v17  ;;  %22234 = vmatpush3.msra.mxu0 %v24701_v35  ;;  %v16686_v21 = vand.u32 4294901760, %v16685_v50  ;;  %v24889_v3 = vand.u32 4294901760, %v24875_v54 }
 0x4c0   : > { %22262 = vmatprep.subr.mxu1 %v16176_v4  ;;  %v21747_v29 = vpop.f32.mrf.mxu0  ;;  %v21772_v0 = vpop.f32.mrf.mxu1  ;;  %22235 = vmatprep.mubr.msk.f32.mxu0 %vm23141_vm1, %v23140_v28  ;;  %v16119_v23 = vsub.f32 %v24791_v60, %v24812_v53 }
 0x4c1   : > { %22263 = vmatpush3.msra.mxu1 %v16176_v4  ;;  %22243 = vmatprep.subr.mxu0 %v23140_v28  ;;  %v8514_v55 = vadd.f32 %v8513_v14, %v8438_v25 }
 0x4c2   : > { %22264 = vmatprep.mubr.f32.mxu1 %v24772_v9  ;;  %22274 = vmatprep.subr.mxu1 %v24717_v8  ;;  %v8587_v45 = vpop.f32.mrf.mxu0  ;;  %v8977_v5 = vpop.f32.mrf.mxu1  ;;  %v24849_v36 = vand.u32 4294901760, %v16119_v23 }
 0x4c3   : > { %v8588_v10 = vadd.f32 %v8587_v45, %v8514_v55  ;;  %22236 = vmatmul.mubr.f32.vlgmr.msra.gmra.mxu0 %v24658_v34  ;;  %22265 = vmatmul.mubr.f32.vlgmr.msra.gmra.mxu1 %v24780_v51  ;;  %v17204_v55 = vsub.f32 %v24875_v54, %v24889_v3 }
 0x4c4   : > { %22244 = vmatpush3.msra.mxu0 %v15698_v27  ;;  %22275 = vmatpush3.msra.mxu1 %v24717_v8  ;;  %v21757_v32 = vpop.f32.mrf.mxu0  ;;  %v21782_v56 = vpop.f32.mrf.mxu1  ;;  %v16129_v27 = vsub.f32 %v24799_v18, %v24818_v49 }
 0x4c5   : > { %22253 = vmatprep.subr.mxu0 %v24717_v8  ;;  %22276 = vmatprep.subr.mxu1 %v24735_v20  ;;  %v8662_v34 = vadd.f32 %v8661_v52, %v8588_v10  ;;  %v24871_v52 = vand.u32 4294901760, %v17083_v47 }
 0x4c6   : > { %22277 = vmatpush3.msra.mxu1 %v24735_v20  ;;  %22245 = vmatprep.mubr.msk.f32.mxu0 %vm23141_vm1, %v23140_v28  ;;  %v8735_v61 = vpop.f32.mrf.mxu0  ;;  %v9125_v35 = vpop.f32.mrf.mxu1  ;;  %v24855_v43 = vand.u32 4294901760, %v16129_v27 }
 0x4c7   : > { %22278 = vmatprep.mubr.f32.mxu1 %v24812_v53  ;;  %22288 = vmatprep.subr.mxu1 %v24717_v8  ;;  %v8736_v16 = vadd.f32 %v8735_v61, %v8662_v34  ;;  %v24884_v39 = vsub.f32 %v17083_v47, %v24871_v52  ;;  %v17205_v61 = vand.u32 4294901760, %v17204_v55 }
 0x4c8   : > { %22246 = vmatmul.mubr.f32.vlgmr.msra.gmra.mxu0 %v24642_v38  ;;  %22279 = vmatmul.mubr.f32.vlgmr.msra.gmra.mxu1 %v24818_v49  ;;  %v21767_v28 = vpop.f32.mrf.mxu0  ;;  %v21792_v42 = vpop.f32.mrf.mxu1  ;;  %v16692_v38 = vsub.f32 %v24821_v31, %v24841_v48 }
 0x4c9   : > { %v8808_v13 = vadd.f32 %v8807_v62, %v8736_v16  ;;  %22254 = vmatpush3.msra.mxu0 %v24717_v8  ;;  %22289 = vmatpush3.msra.mxu1 %v24717_v8  ;;  %v17602_v28 = vld [vmem:[#allocation2 + $0x30] sm:$0xff] }
 0x4ca   : > { %22255 = vmatprep.subr.mxu0 %v24735_v20  ;;  %22290 = vmatprep.subr.mxu1 %v24735_v20  ;;  %v8901_v40 = vpop.f32.mrf.mxu0  ;;  %v9271_v15 = vpop.f32.mrf.mxu1  ;;  %v16693_v7 = vand.u32 4294901760, %v16692_v38  ;;  %v24923_v22 = vand.u32 4294901760, %v17602_v28 }
 0x4cb   : > { %8813 = vst.msk [vmem:[#allocation2 + $0x38] sm:$0xff] %vm3393_vm3, %v8808_v13  ;;  %22256 = vmatpush3.msra.mxu0 %v24735_v20  ;;  %22291 = vmatpush3.msra.mxu1 %v24735_v20  ;;  %v8978_v37 = vadd.f32 %v8977_v5, %v8901_v40 }
 0x4cc   : > { %22257 = vmatprep.mubr.f32.mxu0 %v24849_v36  ;;  %22267 = vmatprep.subr.mxu0 %v24733_v2  ;;  %v21777_v8 = vpop.f32.mrf.mxu0  ;;  %v21802_v14 = vpop.f32.mrf.mxu1 }
 0x4cd   : > { %22292 = vmatprep.mubr.f32.mxu1 %v24772_v9  ;;  %22302 = vmatprep.subr.mxu1 %v16686_v21 }
 0x4ce   : > { %22258 = vmatmul.mubr.f32.vlgmr.msra.gmra.mxu0 %v24855_v43  ;;  %22293 = vmatmul.mubr.f32.vlgmr.msra.gmra.mxu1 %v24780_v51  ;;  %v9051_v20 = vpop.f32.mrf.mxu0  ;;  %v9426_v57 = vpop.f32.mrf.mxu1 }
 0x4cf   : > { %22268 = vmatpush3.msra.mxu0 %v24733_v2  ;;  %22303 = vmatpush3.msra.mxu1 %v16686_v21  ;;  %v9052_v12 = vadd.f32 %v9051_v20, %v8978_v37 }
 0x4d0   : > { %22269 = vmatprep.subr.mxu0 %v24751_v63  ;;  %22304 = vmatprep.subr.mxu1 %v16693_v7  ;;  %v21787_v19 = vpop.f32.mrf.mxu0  ;;  %v21812_v41 = vpop.f32.mrf.mxu1 }
 0x4d1   : > { %22270 = vmatpush3.msra.mxu0 %v24751_v63  ;;  %22305 = vmatpush3.msra.mxu1 %v16693_v7  ;;  %v9126_v17 = vadd.f32 %v9125_v35, %v9052_v12 }
 0x4d2   : > { %22271 = vmatprep.mubr.f32.mxu0 %v24791_v60  ;;  %22281 = vmatprep.subr.mxu0 %v24748_v6  ;;  %v9199_v2 = vpop.f32.mrf.mxu0  ;;  %v9574_v58 = vpop.f32.mrf.mxu1  ;;  %v17603_v34 = vld [vmem:[#allocation2 + $0x38] sm:$0xff] }
 0x4d3   : > { %22306 = vmatprep.mubr.f32.mxu1 %v24772_v9  ;;  %22316 = vmatprep.subr.mxu1 %v24788_v26  ;;  %v9200_v59 = vadd.f32 %v9199_v2, %v9126_v17  ;;  %v24917_v50 = vand.u32 4294901760, %v17603_v34 }
 0x4d4   : > { %22272 = vmatmul.mubr.f32.vlgmr.msra.gmra.mxu0 %v24799_v18  ;;  %22307 = vmatmul.mubr.f32.vlgmr.msra.gmra.mxu1 %v24780_v51  ;;  %v21797_v63 = vpop.f32.mrf.mxu0  ;;  %v21822_v11 = vpop.f32.mrf.mxu1 }
 0x4d5   : > { %22282 = vmatpush3.msra.mxu0 %v24748_v6  ;;  %22317 = vmatpush3.msra.mxu1 %v24788_v26  ;;  %v9272_v33 = vadd.f32 %v9271_v15, %v9200_v59  ;;  %v24898_v6 = vand.u32 4294901760, %v24884_v39  ;;  %v24928_v21 = vsub.f32 %v17603_v34, %v24917_v50 }
 0x4d6   : > { %22283 = vmatprep.subr.mxu0 %v24767_v44  ;;  %22318 = vmatprep.subr.mxu1 %v24803_v24  ;;  %v9350_v62 = vpop.f32.mrf.mxu0  ;;  %v9720_v4 = vpop.f32.mrf.mxu1 }
 0x4d7   : > { %22284 = vmatpush3.msra.mxu0 %v24767_v44  ;;  %22319 = vmatpush3.msra.mxu1 %v24803_v24  ;;  %v9351_v25 = vadd.f32 %v9350_v62, %v9272_v33  ;;  %v17211_v32 = vsub.f32 %v24884_v39, %v24898_v6  ;;  %v24942_v7 = vand.u32 4294901760, %v24928_v21 }
 0x4d8   : > { %22285 = vmatprep.mubr.f32.mxu0 %v24772_v9  ;;  %22295 = vmatprep.subr.mxu0 %v24788_v26  ;;  %v21807_v29 = vpop.f32.mrf.mxu0  ;;  %v21832_v0 = vpop.f32.mrf.mxu1 }
 0x4d9   : > { %22320 = vmatprep.mubr.f32.mxu1 %v24812_v53  ;;  %22330 = vmatprep.subr.mxu1 %v24788_v26  ;;  %v9427_v44 = vadd.f32 %v9426_v57, %v9351_v25  ;;  %v17723_v2 = vsub.f32 %v24928_v21, %v24942_v7 }
 0x4da   : > { %22286 = vmatmul.mubr.f32.vlgmr.msra.gmra.mxu0 %v24780_v51  ;;  %22321 = vmatmul.mubr.f32.vlgmr.msra.gmra.mxu1 %v24818_v49  ;;  %v9500_v45 = vpop.f32.mrf.mxu0  ;;  %v9873_v5 = vpop.f32.mrf.mxu1 }
 0x4db   : > { %22296 = vmatpush3.msra.mxu0 %v24788_v26  ;;  %22331 = vmatpush3.msra.mxu1 %v24788_v26  ;;  %v9501_v10 = vadd.f32 %v9500_v45, %v9427_v44 }
 0x4dc   : > { %22297 = vmatprep.subr.mxu0 %v24803_v24  ;;  %22332 = vmatprep.subr.mxu1 %v24803_v24  ;;  %v21817_v56 = vpop.f32.mrf.mxu0  ;;  %v21842_v23 = vpop.f32.mrf.mxu1 }
 0x4dd   : > { %22298 = vmatpush3.msra.mxu0 %v24803_v24  ;;  %22333 = vmatpush3.msra.mxu1 %v24803_v24  ;;  %v9575_v35 = vadd.f32 %v9574_v58, %v9501_v10  ;;  %v17212_v24 = vand.u32 4294901760, %v17211_v32 }
 0x4de   : > { %22299 = vmatprep.mubr.f32.mxu0 %v24849_v36  ;;  %22309 = vmatprep.subr.mxu0 %v24807_v1  ;;  %v9648_v26 = vpop.f32.mrf.mxu0  ;;  %v10021_v27 = vpop.f32.mrf.mxu1 }
 0x4df   : > { %22334 = vmatprep.mubr.f32.mxu1 %v24772_v9  ;;  %22344 = vmatprep.subr.mxu1 %v17205_v61  ;;  %v9649_v16 = vadd.f32 %v9648_v26, %v9575_v35 }
 0x4e0   : > { %22300 = vmatmul.mubr.f32.vlgmr.msra.gmra.mxu0 %v24855_v43  ;;  %22335 = vmatmul.mubr.f32.vlgmr.msra.gmra.mxu1 %v24780_v51  ;;  %v21827_v42 = vpop.f32.mrf.mxu0  ;;  %v21852_v13 = vpop.f32.mrf.mxu1 }
 0x4e1   : > { %22310 = vmatpush3.msra.mxu0 %v24807_v1  ;;  %22345 = vmatpush3.msra.mxu1 %v17205_v61  ;;  %v9721_v40 = vadd.f32 %v9720_v4, %v9649_v16  ;;  %v17724_v4 = vand.u32 4294901760, %v17723_v2 }
 0x4e2   : > { %22311 = vmatprep.subr.mxu0 %v24821_v31  ;;  %22346 = vmatprep.subr.mxu1 %v17212_v24  ;;  %v9797_v15 = vpop.f32.mrf.mxu0  ;;  %v10167_v38 = vpop.f32.mrf.mxu1 }
 0x4e3   : > { %22312 = vmatpush3.msra.mxu0 %v24821_v31  ;;  %22347 = vmatpush3.msra.mxu1 %v17212_v24  ;;  %10618 = vst.msk [vmem:[#allocation2 + $0x40] sm:$0xff] %vm3393_vm3, %v9721_v40  ;;  %v9874_v14 = vadd.f32 %v9873_v5, %v9797_v15  ;;  %v24937_v31 = vsub.f32 %v17602_v28, %v24923_v22 }
 0x4e4   : > { %22313 = vmatprep.mubr.f32.mxu0 %v24791_v60  ;;  %22323 = vmatprep.subr.mxu0 %v24826_v30  ;;  %v21837_v1 = vpop.f32.mrf.mxu0  ;;  %v21862_v8 = vpop.f32.mrf.mxu1 }
 0x4e5   : > { %22348 = vmatprep.mubr.f32.mxu1 %v24772_v9  ;;  %22358 = vmatprep.subr.mxu1 %v24865_v46 }
 0x4e6   : > { %22314 = vmatmul.mubr.f32.vlgmr.msra.gmra.mxu0 %v24799_v18  ;;  %22349 = vmatmul.mubr.f32.vlgmr.msra.gmra.mxu1 %v24780_v51  ;;  %v9947_v37 = vpop.f32.mrf.mxu0  ;;  %v10319_v47 = vpop.f32.mrf.mxu1 }
 0x4e7   : > { %22324 = vmatpush3.msra.mxu0 %v24826_v30  ;;  %22359 = vmatpush3.msra.mxu1 %v24865_v46  ;;  %v9948_v20 = vadd.f32 %v9947_v37, %v9874_v14  ;;  %v24951_v30 = vand.u32 4294901760, %v24937_v31 }
 0x4e8   : > { %22325 = vmatprep.subr.mxu0 %v24841_v48  ;;  %22360 = vmatprep.subr.mxu1 %v24871_v52  ;;  %v21847_v57 = vpop.f32.mrf.mxu0  ;;  %v21872_v12 = vpop.f32.mrf.mxu1 }
 0x4e9   : > { %22326 = vmatpush3.msra.mxu0 %v24841_v48  ;;  %22361 = vmatpush3.msra.mxu1 %v24871_v52  ;;  %v10022_v19 = vadd.f32 %v10021_v27, %v9948_v20  ;;  %v17730_v11 = vsub.f32 %v24937_v31, %v24951_v30 }
 0x4ea   : > { %22327 = vmatprep.mubr.f32.mxu0 %v24772_v9  ;;  %22337 = vmatprep.subr.mxu0 %v24865_v46  ;;  %v10095_v41 = vpop.f32.mrf.mxu0  ;;  %v10467_v17 = vpop.f32.mrf.mxu1  ;;  %v18159_v16 = vld [vmem:[#allocation2 + $0x40] sm:$0xff] }
 0x4eb   : > { %22362 = vmatprep.mubr.f32.mxu1 %v24812_v53  ;;  %22372 = vmatprep.subr.mxu1 %v24865_v46  ;;  %v10096_v48 = vadd.f32 %v10095_v41, %v10022_v19  ;;  %v17731_v55 = vand.u32 4294901760, %v17730_v11  ;;  %v24996_v13 = vand.u32 4294901760, %v18159_v16 }
 0x4ec   : > { %22328 = vmatmul.mubr.f32.vlgmr.msra.gmra.mxu0 %v24780_v51  ;;  %22363 = vmatmul.mubr.f32.vlgmr.msra.gmra.mxu1 %v24818_v49  ;;  %v21857_v58 = vpop.f32.mrf.mxu0  ;;  %v21882_v59 = vpop.f32.mrf.mxu1 }
 0x4ed   : > { %22338 = vmatpush3.msra.mxu0 %v24865_v46  ;;  %22373 = vmatpush3.msra.mxu1 %v24865_v46  ;;  %v10168_v63 = vadd.f32 %v10167_v38, %v10096_v48 }
 0x4ee   : > { %22339 = vmatprep.subr.mxu0 %v24871_v52  ;;  %22374 = vmatprep.subr.mxu1 %v24871_v52  ;;  %v10243_v33 = vpop.f32.mrf.mxu0  ;;  %v10613_v62 = vpop.f32.mrf.mxu1 }
 0x4ef   : > { %22340 = vmatpush3.msra.mxu0 %v24871_v52  ;;  %22375 = vmatpush3.msra.mxu1 %v24871_v52  ;;  %v10244_v25 = vadd.f32 %v10243_v33, %v10168_v63 }
 0x4f0   : > { %22341 = vmatprep.mubr.f32.mxu0 %v24849_v36  ;;  %22351 = vmatprep.subr.mxu0 %v24875_v54  ;;  %v21867_v46 = vpop.f32.mrf.mxu0  ;;  %v21892_v29 = vpop.f32.mrf.mxu1 }
 0x4f1   : > { %22376 = vmatprep.mubr.f32.mxu1 %v24772_v9  ;;  %22386 = vmatprep.subr.mxu1 %v17724_v4  ;;  %v10320_v0 = vadd.f32 %v10319_v47, %v10244_v25  ;;  %v18285_v47 = vsub.f32 %v18159_v16, %v24996_v13 }
 0x4f2   : > { %22342 = vmatmul.mubr.f32.vlgmr.msra.gmra.mxu0 %v24855_v43  ;;  %22377 = vmatmul.mubr.f32.vlgmr.msra.gmra.mxu1 %v24780_v51  ;;  %v10393_v44 = vpop.f32.mrf.mxu0  ;;  %v10783_v45 = vpop.f32.mrf.mxu1 }
 0x4f3   : > { %22352 = vmatpush3.msra.mxu0 %v24875_v54  ;;  %22387 = vmatpush3.msra.mxu1 %v17724_v4  ;;  %v10394_v52 = vadd.f32 %v10393_v44, %v10320_v0  ;;  %v18286_v2 = vand.u32 4294901760, %v18285_v47 }
 0x4f4   : > { %22353 = vmatprep.subr.mxu0 %v24884_v39  ;;  %22388 = vmatprep.subr.mxu1 %v17731_v55  ;;  %v21877_v5 = vpop.f32.mrf.mxu0  ;;  %v21902_v10 = vpop.f32.mrf.mxu1 }
 0x4f5   : > { %22354 = vmatpush3.msra.mxu0 %v24884_v39  ;;  %22389 = vmatpush3.msra.mxu1 %v17731_v55  ;;  %v10468_v32 = vadd.f32 %v10467_v17, %v10394_v52  ;;  %v18287_v4 = vsub.f32 %v18285_v47, %v18286_v2 }
 0x4f6   : > { %22355 = vmatprep.mubr.f32.mxu0 %v24791_v60  ;;  %22365 = vmatprep.subr.mxu0 %v24889_v3  ;;  %v10541_v56 = vpop.f32.mrf.mxu0  ;;  %v10931_v23 = vpop.f32.mrf.mxu1 }
 0x4f7   : > { %22390 = vmatprep.mubr.f32.mxu1 %v24772_v9  ;;  %22400 = vmatprep.subr.mxu1 %v24917_v50  ;;  %v10542_v54 = vadd.f32 %v10541_v56, %v10468_v32  ;;  %v18288_v55 = vand.u32 4294901760, %v18287_v4 }
 0x4f8   : > { %22356 = vmatmul.mubr.f32.vlgmr.msra.gmra.mxu0 %v24799_v18  ;;  %22391 = vmatmul.mubr.f32.vlgmr.msra.gmra.mxu1 %v24780_v51  ;;  %v21887_v34 = vpop.f32.mrf.mxu0  ;;  %v21912_v61 = vpop.f32.mrf.mxu1 }
 0x4f9   : > { %22366 = vmatpush3.msra.mxu0 %v24889_v3  ;;  %22401 = vmatpush3.msra.mxu1 %v24917_v50  ;;  %v10614_v39 = vadd.f32 %v10613_v62, %v10542_v54 }
 0x4fa   : > { %22367 = vmatprep.subr.mxu0 %v24898_v6  ;;  %22402 = vmatprep.subr.mxu1 %v24923_v22  ;;  %v10707_v35 = vpop.f32.mrf.mxu0  ;;  %v11077_v26 = vpop.f32.mrf.mxu1 }
 0x4fb   : > { %22368 = vmatpush3.msra.mxu0 %v24898_v6  ;;  %22403 = vmatpush3.msra.mxu1 %v24923_v22  ;;  %10619 = vst.msk [vmem:[#allocation2 + $0x48] sm:$0xff] %vm3393_vm3, %v10614_v39  ;;  %v10784_v28 = vadd.f32 %v10783_v45, %v10707_v35 }
 0x4fc   : > { %22369 = vmatprep.mubr.f32.mxu0 %v24772_v9  ;;  %22379 = vmatprep.subr.mxu0 %v24917_v50  ;;  %v21897_v3 = vpop.f32.mrf.mxu0  ;;  %v21922_v27 = vpop.f32.mrf.mxu1 }
 0x4fd   : > { %22404 = vmatprep.mubr.f32.mxu1 %v24812_v53  ;;  %22414 = vmatprep.subr.mxu1 %v24917_v50 }
 0x4fe   : > { %22370 = vmatmul.mubr.f32.vlgmr.msra.gmra.mxu0 %v24780_v51  ;;  %22405 = vmatmul.mubr.f32.vlgmr.msra.gmra.mxu1 %v24818_v49  ;;  %v10857_v6 = vpop.f32.mrf.mxu0  ;;  %v11232_v24 = vpop.f32.mrf.mxu1 }
 0x4ff   : > { %22380 = vmatpush3.msra.mxu0 %v24917_v50  ;;  %22415 = vmatpush3.msra.mxu1 %v24917_v50  ;;  %v10858_v42 = vadd.f32 %v10857_v6, %v10784_v28 }
 0x500   : > { %22381 = vmatprep.subr.mxu0 %v24923_v22  ;;  %22416 = vmatprep.subr.mxu1 %v24923_v22  ;;  %v21907_v40 = vpop.f32.mrf.mxu0  ;;  %v21932_v15 = vpop.f32.mrf.mxu1 }
 0x501   : > { %22382 = vmatpush3.msra.mxu0 %v24923_v22  ;;  %22417 = vmatpush3.msra.mxu1 %v24923_v22  ;;  %v10932_v38 = vadd.f32 %v10931_v23, %v10858_v42 }
 0x502   : > { %22383 = vmatprep.mubr.f32.mxu0 %v24849_v36  ;;  %22393 = vmatprep.subr.mxu0 %v24928_v21  ;;  %v11005_v1 = vpop.f32.mrf.mxu0  ;;  %v11380_v50 = vpop.f32.mrf.mxu1  ;;  %v18160_v8 = vld [vmem:[#allocation2 + $0x48] sm:$0xff] }
 0x503   : > { %22384 = vmatmul.mubr.f32.vlgmr.msra.gmra.mxu0 %v24855_v43  ;;  %22418 = vmatprep.mubr.f32.mxu1 %v24772_v9  ;;  %v11006_v14 = vadd.f32 %v11005_v1, %v10932_v38  ;;  %v25006_v37 = vand.u32 4294901760, %v18160_v8 }
 0x504   : > { %22394 = vmatpush3.msra.mxu0 %v24928_v21  ;;  %22397 = vmatprep.mubr.f32.mxu0 %v24791_v60  ;;  %v21917_v22 = vpop.f32.mrf.mxu0  ;;  %v21942_v20 = vpop.f32.mrf.mxu1 }
 0x505   : > { %22395 = vmatprep.subr.mxu0 %v24937_v31  ;;  %22419 = vmatmul.mubr.f32.vlgmr.msra.gmra.mxu1 %v24780_v51  ;;  %v11078_v57 = vadd.f32 %v11077_v26, %v11006_v14  ;;  %v18278_v12 = vsub.f32 %v18160_v8, %v25006_v37 }
 0x506   : > { %22396 = vmatpush3.msra.mxu0 %v24937_v31  ;;  %v11156_v19 = vpop.f32.mrf.mxu0  ;;  %v11526_v41 = vpop.f32.mrf.mxu1  ;;  %22432 = vmatprep.mubr.f32.mxu1 %v24772_v9 }
 0x507   : > { %22407 = vmatprep.subr.mxu0 %v24942_v7  ;;  %22398 = vmatmul.mubr.f32.vlgmr.msra.gmra.mxu0 %v24799_v18  ;;  %v11157_v21 = vadd.f32 %v11156_v19, %v11078_v57  ;;  %v18279_v17 = vand.u32 4294901760, %v18278_v12 }
 0x508   : > { %22408 = vmatpush3.msra.mxu0 %v24942_v7  ;;  %22411 = vmatprep.mubr.f32.mxu0 %v24772_v9  ;;  %v21927_v48 = vpop.f32.mrf.mxu0  ;;  %v21952_v58 = vpop.f32.mrf.mxu1 }
 0x509   : > { %22409 = vmatprep.subr.mxu0 %v24951_v30  ;;  %v11233_v31 = vadd.f32 %v11232_v24, %v11157_v21  ;;  %v18280_v59 = vsub.f32 %v18278_v12, %v18279_v17 }
 0x50a   : > { %22410 = vmatpush3.msra.mxu0 %v24951_v30  ;;  %v11306_v63 = vpop.f32.mrf.mxu0  ;;  %v11679_v11 = vpop.f32.mrf.mxu1 }
 0x50b   : > { %22412 = vmatmul.mubr.f32.vlgmr.msra.gmra.mxu0 %v24780_v51  ;;  %22421 = vmatprep.subr.mxu0 %v25006_v37  ;;  %v11307_v33 = vadd.f32 %v11306_v63, %v11233_v31  ;;  %v18281_v62 = vand.u32 4294901760, %v18280_v59 }
 0x50c   : > { %22422 = vmatpush3.msra.mxu0 %v25006_v37  ;;  %22425 = vmatprep.mubr.f32.mxu0 %v24849_v36  ;;  %v21937_v7 = vpop.f32.mrf.mxu0  ;;  %v21962_v25 = vpop.f32.mrf.mxu1 }
 0x50d   : > { %22423 = vmatprep.subr.mxu0 %v24996_v13  ;;  %22428 = vmatprep.subr.mxu1 %v18281_v62  ;;  %v11381_v46 = vadd.f32 %v11380_v50, %v11307_v33 }
 0x50e   : > { %22424 = vmatpush3.msra.mxu0 %v24996_v13  ;;  %v11454_v30 = vpop.f32.mrf.mxu0  ;;  %v11827_v29 = vpop.f32.mrf.mxu1  ;;  %22429 = vmatpush3.msra.mxu1 %v18281_v62 }
 0x50f   : > { %22435 = vmatprep.subr.mxu0 %v18278_v12  ;;  %22426 = vmatmul.mubr.f32.vlgmr.msra.gmra.mxu0 %v24855_v43  ;;  %v11455_v0 = vadd.f32 %v11454_v30, %v11381_v46 }
 0x510   : > { %22436 = vmatpush3.msra.mxu0 %v18278_v12  ;;  %22439 = vmatprep.mubr.f32.mxu0 %v24791_v60  ;;  %v21947_v44 = vpop.f32.mrf.mxu0  ;;  %v21972_v45 = vpop.f32.mrf.mxu1 }
 0x511   : > { %22437 = vmatprep.subr.mxu0 %v18285_v47  ;;  %v11527_v52 = vadd.f32 %v11526_v41, %v11455_v0  ;;  %22430 = vmatprep.subr.mxu1 %v18288_v55 }
 0x512   : > { %22438 = vmatpush3.msra.mxu0 %v18285_v47  ;;  %22431 = vmatpush3.msra.mxu1 %v18288_v55  ;;  %v11603_v5 = vpop.f32.mrf.mxu0  ;;  %v11973_v10 = vpop.f32.mrf.mxu1 }
 0x513   : > { %22449 = vmatprep.subr.mxu0 %v18279_v17  ;;  %12424 = vst.msk [vmem:[#allocation2 + $0x50] sm:$0xff] %vm3393_vm3, %v11527_v52  ;;  %22440 = vmatmul.mubr.f32.vlgmr.msra.gmra.mxu0 %v24799_v18  ;;  %v11680_v23 = vadd.f32 %v11679_v11, %v11603_v5 }
 0x514   : > { %22450 = vmatpush3.msra.mxu0 %v18279_v17  ;;  %22433 = vmatmul.mubr.f32.vlgmr.msra.gmra.mxu1 %v24780_v51  ;;  %v21957_v32 = vpop.f32.mrf.mxu0  ;;  %v21982_v56 = vpop.f32.mrf.mxu1 }
 0x515   : > { %22451 = vmatprep.subr.mxu0 %v18286_v2  ;;  %22442 = vmatprep.subr.mxu1 %v25006_v37 }
 0x516   : > { %22452 = vmatpush3.msra.mxu0 %v18286_v2  ;;  %22443 = vmatpush3.msra.mxu1 %v25006_v37  ;;  %v11753_v54 = vpop.f32.mrf.mxu0  ;;  %v12125_v34 = vpop.f32.mrf.mxu1 }
 0x517   : > { %22444 = vmatprep.subr.mxu1 %v24996_v13  ;;  %22446 = vmatprep.mubr.f32.mxu1 %v24812_v53  ;;  %v11754_v61 = vadd.f32 %v11753_v54, %v11680_v23 }
 0x518   : > { %22445 = vmatpush3.msra.mxu1 %v24996_v13  ;;  %22453 = vmatprep.mubr.f32.mxu0 %v24772_v9  ;;  %v21967_v39 = vpop.f32.mrf.mxu0  ;;  %v21992_v35 = vpop.f32.mrf.mxu1 }
 0x519   : > { %22447 = vmatmul.mubr.f32.vlgmr.msra.gmra.mxu1 %v24818_v49  ;;  %22456 = vmatprep.subr.mxu1 %v25006_v37  ;;  %v11828_v26 = vadd.f32 %v11827_v29, %v11754_v61 }
 0x51a   : > { %22457 = vmatpush3.msra.mxu1 %v25006_v37  ;;  %22454 = vmatmul.mubr.f32.vlgmr.msra.gmra.mxu0 %v24780_v51  ;;  %v11901_v3 = vpop.f32.mrf.mxu0  ;;  %v12273_v27 = vpop.f32.mrf.mxu1  ;;  %v18676_v48 = vld [vmem:[#allocation2 + $0x50] sm:$0xff] }
 0x51b   : > { %22458 = vmatprep.subr.mxu1 %v24996_v13  ;;  %22460 = vmatprep.mubr.f32.mxu1 %v24772_v9  ;;  %v11902_v16 = vadd.f32 %v11901_v3, %v11828_v26  ;;  %v25050_v63 = vand.u32 4294901760, %v18676_v48 }
 0x51c   : > { %22459 = vmatpush3.msra.mxu1 %v24996_v13  ;;  %v21977_v28 = vpop.f32.mrf.mxu0  ;;  %v22002_v6 = vpop.f32.mrf.mxu1  ;;  %22467 = vmatprep.mubr.f32.mxu0 %v24849_v36 }
 0x51d   : > { %22461 = vmatmul.mubr.f32.vlgmr.msra.gmra.mxu1 %v24780_v51  ;;  %v11974_v24 = vadd.f32 %v11973_v10, %v11902_v16  ;;  %v18802_v46 = vsub.f32 %v18676_v48, %v25050_v63 }
 0x51e   : > { %v12049_v42 = vpop.f32.mrf.mxu0  ;;  %v12419_v40 = vpop.f32.mrf.mxu1  ;;  %22474 = vmatprep.mubr.f32.mxu1 %v24772_v9 }
 0x51f   : > { %v12050_v15 = vadd.f32 %v12049_v42, %v11974_v24  ;;  %v18803_v32 = vand.u32 4294901760, %v18802_v46 }
 0x520   : > { %v21987_v38 = vpop.f32.mrf.mxu0  ;;  %v22012_v1 = vpop.f32.mrf.mxu1 }
 0x521   : > { %v12126_v50 = vadd.f32 %v12125_v34, %v12050_v15  ;;  %v18804_v3 = vsub.f32 %v18802_v46, %v18803_v32 }
 0x522   : > { %v12199_v8 = vpop.f32.mrf.mxu0  ;;  %v12589_v14 = vpop.f32.mrf.mxu1 }
 0x523   : > { %v12200_v37 = vadd.f32 %v12199_v8, %v12126_v50  ;;  %v18805_v15 = vand.u32 4294901760, %v18804_v3 }
 0x524   : > { %v21997_v47 = vpop.f32.mrf.mxu0  ;;  %v22022_v13 = vpop.f32.mrf.mxu1 }
 0x525   : > { %v12274_v22 = vadd.f32 %v12273_v27, %v12200_v37 }
 0x526   : > { %v12347_v20 = vpop.f32.mrf.mxu0  ;;  %v12737_v57 = vpop.f32.mrf.mxu1 }
 0x527   : > { %v12348_v12 = vadd.f32 %v12347_v20, %v12274_v22 }
 0x528   : > { %v22007_v19 = vpop.f32.mrf.mxu0  ;;  %v22032_v41 = vpop.f32.mrf.mxu1 }
 0x529   : > { %v12420_v21 = vadd.f32 %v12419_v40, %v12348_v12 }
 0x52a   : > { %v12513_v17 = vpop.f32.mrf.mxu0  ;;  %v12883_v2 = vpop.f32.mrf.mxu1 }
 0x52b   : > { %12425 = vst.msk [vmem:[#allocation2 + $0x58] sm:$0xff] %vm3393_vm3, %v12420_v21  ;;  %v12590_v59 = vadd.f32 %v12589_v14, %v12513_v17 }
 0x52c   : > { %v22017_v58 = vpop.f32.mrf.mxu0  ;;  %v22042_v31 = vpop.f32.mrf.mxu1 }
 0x52e   : > { %v12663_v11 = vpop.f32.mrf.mxu0  ;;  %v13038_v33 = vpop.f32.mrf.mxu1 }
 0x52f   : > { %v12664_v62 = vadd.f32 %v12663_v11, %v12590_v59 }
 0x530   : > { %v22027_v4 = vpop.f32.mrf.mxu0  ;;  %v22052_v7 = vpop.f32.mrf.mxu1 }
 0x531   : > { %v12738_v25 = vadd.f32 %v12737_v57, %v12664_v62 }
 0x532   : > { %v12811_v30 = vpop.f32.mrf.mxu0  ;;  %v13186_v29 = vpop.f32.mrf.mxu1  ;;  %v18677_v0 = vld [vmem:[#allocation2 + $0x58] sm:$0xff] }
 0x533   : > { %v12812_v55 = vadd.f32 %v12811_v30, %v12738_v25  ;;  %v25053_v44 = vand.u32 4294901760, %v18677_v0 }
 0x534   : > { %v22037_v45 = vpop.f32.mrf.mxu0  ;;  %v22062_v52 = vpop.f32.mrf.mxu1 }
 0x535   : > { %22463 = vmatprep.subr.mxu0 %v25053_v44  ;;  %v12884_v5 = vadd.f32 %v12883_v2, %v12812_v55  ;;  %v18795_v10 = vsub.f32 %v18677_v0, %v25053_v44 }
 0x536   : > { %v12962_v56 = vpop.f32.mrf.mxu0  ;;  %v13332_v23 = vpop.f32.mrf.mxu1  ;;  %22464 = vmatpush3.msra.mxu0 %v25053_v44 }
 0x537   : > { %v12963_v54 = vadd.f32 %v12962_v56, %v12884_v5  ;;  %22465 = vmatprep.subr.mxu0 %v25050_v63  ;;  %v18796_v34 = vand.u32 4294901760, %v18795_v10 }
 0x538   : > { %v22047_v61 = vpop.f32.mrf.mxu0  ;;  %v22072_v39 = vpop.f32.mrf.mxu1  ;;  %22466 = vmatpush3.msra.mxu0 %v25050_v63 }
 0x539   : > { %22477 = vmatprep.subr.mxu0 %v18795_v10  ;;  %v13039_v35 = vadd.f32 %v13038_v33, %v12963_v54  ;;  %22468 = vmatmul.mubr.f32.vlgmr.msra.gmra.mxu0 %v24855_v43  ;;  %v18797_v26 = vsub.f32 %v18795_v10, %v18796_v34 }
 0x53a   : > { %v13112_v27 = vpop.f32.mrf.mxu0  ;;  %v13485_v16 = vpop.f32.mrf.mxu1  ;;  %22478 = vmatpush3.msra.mxu0 %v18795_v10  ;;  %22481 = vmatprep.mubr.f32.mxu0 %v24791_v60 }
 0x53b   : > { %v13113_v28 = vadd.f32 %v13112_v27, %v13039_v35  ;;  %22479 = vmatprep.subr.mxu0 %v18802_v46  ;;  %v18798_v6 = vand.u32 4294901760, %v18797_v26 }
 0x53c   : > { %v22057_v24 = vpop.f32.mrf.mxu0  ;;  %v22082_v42 = vpop.f32.mrf.mxu1  ;;  %22480 = vmatpush3.msra.mxu0 %v18802_v46 }
 0x53d   : > { %22470 = vmatprep.subr.mxu1 %v18798_v6  ;;  %22491 = vmatprep.subr.mxu0 %v18796_v34  ;;  %v13187_v40 = vadd.f32 %v13186_v29, %v13113_v28 }
 0x53e   : > { %v13260_v38 = vpop.f32.mrf.mxu0  ;;  %v13633_v1 = vpop.f32.mrf.mxu1  ;;  %22471 = vmatpush3.msra.mxu1 %v18798_v6  ;;  %22482 = vmatmul.mubr.f32.vlgmr.msra.gmra.mxu0 %v24799_v18 }
 0x53f   : > { %v13261_v50 = vadd.f32 %v13260_v38, %v13187_v40  ;;  %22492 = vmatpush3.msra.mxu0 %v18796_v34  ;;  %22472 = vmatprep.subr.mxu1 %v18805_v15 }
 0x540   : > { %22493 = vmatprep.subr.mxu0 %v18803_v32  ;;  %v22067_v8 = vpop.f32.mrf.mxu0  ;;  %v22092_v14 = vpop.f32.mrf.mxu1  ;;  %22473 = vmatpush3.msra.mxu1 %v18805_v15 }
 0x541   : > { %v13333_v37 = vadd.f32 %v13332_v23, %v13261_v50  ;;  %22494 = vmatpush3.msra.mxu0 %v18803_v32  ;;  %22475 = vmatmul.mubr.f32.vlgmr.msra.gmra.mxu1 %v24780_v51 }
 0x542   : > { %22484 = vmatprep.subr.mxu1 %v25053_v44  ;;  %v13409_v47 = vpop.f32.mrf.mxu0  ;;  %v13779_v13 = vpop.f32.mrf.mxu1  ;;  %22488 = vmatprep.mubr.f32.mxu1 %v24812_v53 }
 0x543   : > { %14230 = vst.msk [vmem:[#allocation2 + $0x60] sm:$0xff] %vm3393_vm3, %v13333_v37  ;;  %22485 = vmatpush3.msra.mxu1 %v25053_v44  ;;  %22495 = vmatprep.mubr.f32.mxu0 %v24772_v9  ;;  %v13486_v57 = vadd.f32 %v13485_v16, %v13409_v47 }
 0x544   : > { %22486 = vmatprep.subr.mxu1 %v25050_v63  ;;  %v22077_v22 = vpop.f32.mrf.mxu0  ;;  %v22102_v20 = vpop.f32.mrf.mxu1  ;;  %22496 = vmatmul.mubr.f32.vlgmr.msra.gmra.mxu0 %v24780_v51 }
 0x545   : > { %22487 = vmatpush3.msra.mxu1 %v25050_v63  ;;  %22509 = vmatprep.mubr.f32.mxu0 %v24849_v36 }
 0x546   : > { %22489 = vmatmul.mubr.f32.vlgmr.msra.gmra.mxu1 %v24818_v49  ;;  %22498 = vmatprep.subr.mxu1 %v25053_v44  ;;  %v13559_v12 = vpop.f32.mrf.mxu0  ;;  %v13931_v19 = vpop.f32.mrf.mxu1 }
 0x547   : > { %v13560_v41 = vadd.f32 %v13559_v12, %v13486_v57  ;;  %22499 = vmatpush3.msra.mxu1 %v25053_v44  ;;  %22502 = vmatprep.mubr.f32.mxu1 %v24772_v9 }
 0x548   : > { %22500 = vmatprep.subr.mxu1 %v25050_v63  ;;  %v22087_v21 = vpop.f32.mrf.mxu0  ;;  %v22112_v17 = vpop.f32.mrf.mxu1 }
 0x549   : > { %22501 = vmatpush3.msra.mxu1 %v25050_v63  ;;  %v13634_v2 = vadd.f32 %v13633_v1, %v13560_v41 }
 0x54a   : > { %22503 = vmatmul.mubr.f32.vlgmr.msra.gmra.mxu1 %v24780_v51  ;;  %v13707_v48 = vpop.f32.mrf.mxu0  ;;  %v14079_v58 = vpop.f32.mrf.mxu1  ;;  %v19195_v61 = vld [vmem:[#allocation2 + $0x60] sm:$0xff] }
 0x54b   : > { %v13708_v31 = vadd.f32 %v13707_v48, %v13634_v2  ;;  %22516 = vmatprep.mubr.f32.mxu1 %v24772_v9  ;;  %v25082_v3 = vand.u32 4294901760, %v19195_v61 }
 0x54c   : > { %v22097_v59 = vpop.f32.mrf.mxu0  ;;  %v22122_v11 = vpop.f32.mrf.mxu1 }
 0x54d   : > { %v13780_v33 = vadd.f32 %v13779_v13, %v13708_v31  ;;  %v19321_v40 = vsub.f32 %v19195_v61, %v25082_v3 }
 0x54e   : > { %v13855_v62 = vpop.f32.mrf.mxu0  ;;  %v14225_v4 = vpop.f32.mrf.mxu1 }
 0x54f   : > { %v13856_v7 = vadd.f32 %v13855_v62, %v13780_v33  ;;  %v19322_v22 = vand.u32 4294901760, %v19321_v40 }
 0x550   : > { %v22107_v25 = vpop.f32.mrf.mxu0  ;;  %v22132_v46 = vpop.f32.mrf.mxu1 }
 0x551   : > { %v13932_v30 = vadd.f32 %v13931_v19, %v13856_v7  ;;  %v19323_v48 = vsub.f32 %v19321_v40, %v19322_v22 }
 0x552   : > { %v14005_v29 = vpop.f32.mrf.mxu0  ;;  %v14395_v0 = vpop.f32.mrf.mxu1 }
 0x553   : > { %v14006_v63 = vadd.f32 %v14005_v29, %v13932_v30  ;;  %v19324_v7 = vand.u32 4294901760, %v19323_v48 }
 0x554   : > { %v22117_v55 = vpop.f32.mrf.mxu0  ;;  %v22142_v44 = vpop.f32.mrf.mxu1 }
 0x555   : > { %v14080_v45 = vadd.f32 %v14079_v58, %v14006_v63 }
 0x556   : > { %v14153_v52 = vpop.f32.mrf.mxu0  ;;  %v14543_v5 = vpop.f32.mrf.mxu1 }
 0x557   : > { %v14154_v10 = vadd.f32 %v14153_v52, %v14080_v45 }
 0x558   : > { %v22127_v32 = vpop.f32.mrf.mxu0  ;;  %v22152_v56 = vpop.f32.mrf.mxu1 }
 0x559   : > { %v14226_v23 = vadd.f32 %v14225_v4, %v14154_v10 }
 0x55a   : > { %v14319_v54 = vpop.f32.mrf.mxu0  ;;  %v14689_v34 = vpop.f32.mrf.mxu1 }
 0x55b   : > { %14231 = vst.msk [vmem:[#allocation2 + $0x68] sm:$0xff] %vm3393_vm3, %v14226_v23  ;;  %v14396_v26 = vadd.f32 %v14395_v0, %v14319_v54 }
 0x55c   : > { %v22137_v39 = vpop.f32.mrf.mxu0  ;;  %v22162_v35 = vpop.f32.mrf.mxu1 }
 0x55e   : > { %v14469_v27 = vpop.f32.mrf.mxu0  ;;  %v14844_v16 = vpop.f32.mrf.mxu1 }
 0x55f   : > { %v14470_v28 = vadd.f32 %v14469_v27, %v14396_v26 }
 0x560   : > { %v22147_v6 = vpop.f32.mrf.mxu0  ;;  %v22172_v24 = vpop.f32.mrf.mxu1 }
 0x561   : > { %v14544_v42 = vadd.f32 %v14543_v5, %v14470_v28 }
 0x562   : > { %v14617_v15 = vpop.f32.mrf.mxu0  ;;  %v14992_v38 = vpop.f32.mrf.mxu1  ;;  %v19196_v1 = vld [vmem:[#allocation2 + $0x68] sm:$0xff] }
 0x563   : > { %v14618_v50 = vadd.f32 %v14617_v15, %v14544_v42  ;;  %v25085_v8 = vand.u32 4294901760, %v19196_v1 }
 0x564   : > { %v22157_v14 = vpop.f32.mrf.mxu0  ;;  %v22182_v37 = vpop.f32.mrf.mxu1 }
 0x565   : > { %22505 = vmatprep.subr.mxu0 %v25085_v8  ;;  %v14690_v47 = vadd.f32 %v14689_v34, %v14618_v50  ;;  %v19314_v13 = vsub.f32 %v19196_v1, %v25085_v8 }
 0x566   : > { %v14768_v20 = vpop.f32.mrf.mxu0  ;;  %v15138_v57 = vpop.f32.mrf.mxu1  ;;  %22506 = vmatpush3.msra.mxu0 %v25085_v8 }
 0x567   : > { %v14769_v12 = vadd.f32 %v14768_v20, %v14690_v47  ;;  %22507 = vmatprep.subr.mxu0 %v25082_v3  ;;  %v19315_v19 = vand.u32 4294901760, %v19314_v13 }
 0x568   : > { %v22167_v41 = vpop.f32.mrf.mxu0  ;;  %v22192_v21 = vpop.f32.mrf.mxu1  ;;  %22508 = vmatpush3.msra.mxu0 %v25082_v3 }
 0x569   : > { %22519 = vmatprep.subr.mxu0 %v19314_v13  ;;  %v14845_v17 = vadd.f32 %v14844_v16, %v14769_v12  ;;  %22510 = vmatmul.mubr.f32.vlgmr.msra.gmra.mxu0 %v24855_v43  ;;  %v19316_v2 = vsub.f32 %v19314_v13, %v19315_v19 }
 0x56a   : > { %v14918_v58 = vpop.f32.mrf.mxu0  ;;  %v15291_v31 = vpop.f32.mrf.mxu1  ;;  %22520 = vmatpush3.msra.mxu0 %v19314_v13  ;;  %22523 = vmatprep.mubr.f32.mxu0 %v24791_v60 }
 0x56b   : > { %v14919_v59 = vadd.f32 %v14918_v58, %v14845_v17  ;;  %22521 = vmatprep.subr.mxu0 %v19321_v40  ;;  %v19317_v11 = vand.u32 4294901760, %v19316_v2 }
 0x56c   : > { %v22177_v33 = vpop.f32.mrf.mxu0  ;;  %v22202_v62 = vpop.f32.mrf.mxu1  ;;  %22522 = vmatpush3.msra.mxu0 %v19321_v40 }
 0x56d   : > { %22512 = vmatprep.subr.mxu1 %v19317_v11  ;;  %22533 = vmatprep.subr.mxu0 %v19315_v19  ;;  %v14993_v4 = vadd.f32 %v14992_v38, %v14919_v59 }
 0x56e   : > { %v15066_v25 = vpop.f32.mrf.mxu0  ;;  %v15439_v46 = vpop.f32.mrf.mxu1  ;;  %22513 = vmatpush3.msra.mxu1 %v19317_v11  ;;  %22524 = vmatmul.mubr.f32.vlgmr.msra.gmra.mxu0 %v24799_v18 }
 0x56f   : > { %v15067_v30 = vadd.f32 %v15066_v25, %v14993_v4  ;;  %22534 = vmatpush3.msra.mxu0 %v19315_v19  ;;  %22514 = vmatprep.subr.mxu1 %v19324_v7 }
 0x570   : > { %22535 = vmatprep.subr.mxu0 %v19322_v22  ;;  %v22187_v29 = vpop.f32.mrf.mxu0  ;;  %v22212_v0 = vpop.f32.mrf.mxu1  ;;  %22515 = vmatpush3.msra.mxu1 %v19324_v7 }
 0x571   : > { %v15139_v63 = vadd.f32 %v15138_v57, %v15067_v30  ;;  %22536 = vmatpush3.msra.mxu0 %v19322_v22  ;;  %22517 = vmatmul.mubr.f32.vlgmr.msra.gmra.mxu1 %v24780_v51 }
 0x572   : > { %22526 = vmatprep.subr.mxu1 %v25085_v8  ;;  %v15215_v55 = vpop.f32.mrf.mxu0  ;;  %v15585_v44 = vpop.f32.mrf.mxu1  ;;  %22530 = vmatprep.mubr.f32.mxu1 %v24812_v53 }
 0x573   : > { %16036 = vst.msk [vmem:[#allocation2 + $0x70] sm:$0xff] %vm3393_vm3, %v15139_v63  ;;  %22527 = vmatpush3.msra.mxu1 %v25085_v8  ;;  %22537 = vmatprep.mubr.f32.mxu0 %v24772_v9  ;;  %v15292_v5 = vadd.f32 %v15291_v31, %v15215_v55 }
 0x574   : > { %22528 = vmatprep.subr.mxu1 %v25082_v3  ;;  %v22197_v45 = vpop.f32.mrf.mxu0  ;;  %v22222_v52 = vpop.f32.mrf.mxu1  ;;  %22538 = vmatmul.mubr.f32.vlgmr.msra.gmra.mxu0 %v24780_v51 }
 0x575   : > { %22529 = vmatpush3.msra.mxu1 %v25082_v3  ;;  %22551 = vmatprep.mubr.f32.mxu0 %v24849_v36 }
 0x576   : > { %22531 = vmatmul.mubr.f32.vlgmr.msra.gmra.mxu1 %v24818_v49  ;;  %22540 = vmatprep.subr.mxu1 %v25085_v8  ;;  %v15365_v10 = vpop.f32.mrf.mxu0  ;;  %v15737_v32 = vpop.f32.mrf.mxu1 }
 0x577   : > { %v15366_v56 = vadd.f32 %v15365_v10, %v15292_v5  ;;  %22541 = vmatpush3.msra.mxu1 %v25085_v8  ;;  %22544 = vmatprep.mubr.f32.mxu1 %v24772_v9 }
 0x578   : > { %22542 = vmatprep.subr.mxu1 %v25082_v3  ;;  %v22207_v23 = vpop.f32.mrf.mxu0  ;;  %v22232_v54 = vpop.f32.mrf.mxu1 }
 0x579   : > { %22543 = vmatpush3.msra.mxu1 %v25082_v3  ;;  %v15440_v34 = vadd.f32 %v15439_v46, %v15366_v56 }
 0x57a   : > { %22545 = vmatmul.mubr.f32.vlgmr.msra.gmra.mxu1 %v24780_v51  ;;  %v15513_v36 = vpop.f32.mrf.mxu0  ;;  %v15885_v61 = vpop.f32.mrf.mxu1  ;;  %v19714_v57 = vld [vmem:[#allocation2 + $0x70] sm:$0xff] }
 0x57b   : > { %v15514_v39 = vadd.f32 %v15513_v36, %v15440_v34  ;;  %22558 = vmatprep.mubr.f32.mxu1 %v24772_v9  ;;  %v25114_v41 = vand.u32 4294901760, %v19714_v57 }
 0x57c   : > { %v22217_v35 = vpop.f32.mrf.mxu0  ;;  %v22242_v26 = vpop.f32.mrf.mxu1 }
 0x57d   : > { %v15586_v27 = vadd.f32 %v15585_v44, %v15514_v39  ;;  %v19840_v58 = vsub.f32 %v19714_v57, %v25114_v41 }
 0x57e   : > { %v15661_v16 = vpop.f32.mrf.mxu0  ;;  %v16031_v28 = vpop.f32.mrf.mxu1 }
 0x57f   : > { %v15662_v6 = vadd.f32 %v15661_v16, %v15586_v27  ;;  %v19841_v29 = vand.u32 4294901760, %v19840_v58 }
 0x580   : > { %v22227_v24 = vpop.f32.mrf.mxu0  ;;  %v22252_v42 = vpop.f32.mrf.mxu1 }
 0x581   : > { %v15738_v40 = vadd.f32 %v15737_v32, %v15662_v6  ;;  %v19842_v5 = vsub.f32 %v19840_v58, %v19841_v29 }
 0x583   : > { %v15811_v15 = vpop.f32.mrf.mxu0  ;;  %v22266_v38 = vpop.f32.mrf.mxu1  ;;  %v19843_v36 = vand.u32 4294901760, %v19842_v5 }
 0x584   : > { %v15812_v3 = vadd.f32 %v15811_v15, %v15738_v40 }
 0x585   : > { %v22237_v1 = vpop.f32.mrf.mxu0  ;;  %v16213_v50 = vpop.f32.mrf.mxu1 }
 0x586   : > { %v15886_v8 = vadd.f32 %v15885_v61, %v15812_v3 }
 0x588   : > { %v15959_v14 = vpop.f32.mrf.mxu0  ;;  %v22280_v37 = vpop.f32.mrf.mxu1 }
 0x589   : > { %v15960_v47 = vadd.f32 %v15959_v14, %v15886_v8 }
 0x58a   : > { %v22247_v13 = vpop.f32.mrf.mxu0  ;;  %v16377_v22 = vpop.f32.mrf.mxu1 }
 0x58b   : > { %v16032_v20 = vadd.f32 %v16031_v28, %v15960_v47 }
 0x58d   : > { %16037 = vst.msk [vmem:[#allocation2 + $0x78] sm:$0xff] %vm3393_vm3, %v16032_v20 }
 0x58e   : > { %v22259_v12 = vpop.f32.mrf.mxu0  ;;  %v22294_v19 = vpop.f32.mrf.mxu1 }
 0x58f   : > { %v16220_v2 = vadd.f32 %v22266_v38, %v22259_v12 }
 0x590   : > { %v16122_v21 = vpop.f32.mrf.mxu0  ;;  %v16541_v17 = vpop.f32.mrf.mxu1 }
 0x591   : > { %v16214_v48 = vadd.f32 %v16213_v50, %v16122_v21 }
 0x594   : > { %v22273_v31 = vpop.f32.mrf.mxu0  ;;  %v19715_v59 = vld [vmem:[#allocation2 + $0x78] sm:$0xff]  ;;  %v22308_v11 = vpop.f32.mrf.mxu1 }
 0x595   : > { %v16303_v33 = vadd.f32 %v22273_v31, %v16220_v2  ;;  %v25117_v62 = vand.u32 4294901760, %v19715_v59 }
 0x596   : > { %v16295_v4 = vpop.f32.mrf.mxu0  ;;  %v16730_v7 = vpop.f32.mrf.mxu1 }
 0x597   : > { %v16296_v25 = vadd.f32 %v16295_v4, %v16214_v48  ;;  %v16386_v46 = vadd.f32 %v22280_v37, %v16303_v33  ;;  %22547 = vmatprep.subr.mxu0 %v25117_v62  ;;  %v19833_v30 = vsub.f32 %v19715_v59, %v25117_v62 }
 0x598   : > { %22548 = vmatpush3.msra.mxu0 %v25117_v62 }
 0x599   : > { %v16378_v0 = vadd.f32 %v16377_v22, %v16296_v25  ;;  %22549 = vmatprep.subr.mxu0 %v25114_v41  ;;  %v19834_v63 = vand.u32 4294901760, %v19833_v30 }
 0x59a   : > { %v22287_v55 = vpop.f32.mrf.mxu0  ;;  %22550 = vmatpush3.msra.mxu0 %v25114_v41  ;;  %v22322_v44 = vpop.f32.mrf.mxu1 }
 0x59b   : > { %v16469_v45 = vadd.f32 %v22287_v55, %v16386_v46  ;;  %22561 = vmatprep.subr.mxu0 %v19833_v30  ;;  %22552 = vmatmul.mubr.f32.vlgmr.msra.gmra.mxu0 %v24855_v43  ;;  %v19835_v52 = vsub.f32 %v19833_v30, %v19834_v63 }
 0x59c   : > { %v16462_v10 = vpop.f32.mrf.mxu0  ;;  %22562 = vmatpush3.msra.mxu0 %v19833_v30  ;;  %22565 = vmatprep.mubr.f32.mxu0 %v24791_v60  ;;  %v16894_v32 = vpop.f32.mrf.mxu1 }
 0x59d   : > { %v16463_v56 = vadd.f32 %v16462_v10, %v16378_v0  ;;  %v16548_v23 = vadd.f32 %v22294_v19, %v16469_v45  ;;  %22563 = vmatprep.subr.mxu0 %v19840_v58  ;;  %v19836_v54 = vand.u32 4294901760, %v19835_v52 }
 0x59e   : > { %22564 = vmatpush3.msra.mxu0 %v19840_v58 }
 0x59f   : > { %v16542_v34 = vadd.f32 %v16541_v17, %v16463_v56  ;;  %22554 = vmatprep.subr.mxu1 %v19836_v54  ;;  %22575 = vmatprep.subr.mxu0 %v19834_v63  ;;  %v25126_v61 = vmul.f32 %v16548_v23, %v16548_v23 }
 0x5a0   : > { %v22301_v39 = vpop.f32.mrf.mxu0  ;;  %22555 = vmatpush3.msra.mxu1 %v19836_v54  ;;  %22566 = vmatmul.mubr.f32.vlgmr.msra.gmra.mxu0 %v24799_v18  ;;  %v22336_v43 = vpop.f32.mrf.mxu1 }
 0x5a1   : > { %v25129_v35 = vmul.f32 %v16542_v34, %v16542_v34  ;;  %22576 = vmatpush3.msra.mxu0 %v19834_v63  ;;  %22556 = vmatprep.subr.mxu1 %v19843_v36  ;;  %v16737_v27 = vadd.f32 %v22308_v11, %v22301_v39 }
 0x5a2   : > { %v16639_v60 = vpop.f32.mrf.mxu0  ;;  %22577 = vmatprep.subr.mxu0 %v19841_v29  ;;  %22557 = vmatpush3.msra.mxu1 %v19843_v36  ;;  %v17058_v26 = vpop.f32.mrf.mxu1 }
 0x5a3   : > { %22578 = vmatpush3.msra.mxu0 %v19841_v29  ;;  %22559 = vmatmul.mubr.f32.vlgmr.msra.gmra.mxu1 %v24780_v51  ;;  %v16731_v18 = vadd.f32 %v16730_v7, %v16639_v60 }
 0x5a4   : > { %22568 = vmatprep.subr.mxu1 %v25117_v62  ;;  %16557 = vrot.lane.b32.xlu0 %v25126_v61, %s23142_s11 }
 0x5a5   : > { %22569 = vmatpush3.msra.mxu1 %v25117_v62  ;;  %16555 = vrot.lane.b32.xlu1 %v25129_v35, %s23142_s11 }
 0x5a6   : > { %v22315_v16 = vpop.f32.mrf.mxu0  ;;  %22570 = vmatprep.subr.mxu1 %v25114_v41  ;;  %v22350_v28 = vpop.f32.mrf.mxu1  ;;  %22572 = vmatprep.mubr.f32.mxu1 %v24812_v53 }
 0x5a7   : > { %v16820_v6 = vadd.f32 %v22315_v16, %v16737_v27  ;;  %22571 = vmatpush3.msra.mxu1 %v25114_v41  ;;  %22579 = vmatprep.mubr.f32.mxu0 %v24772_v9 }
 0x5a8   : > { %v16812_v24 = vpop.f32.mrf.mxu0  ;;  %22573 = vmatmul.mubr.f32.vlgmr.msra.gmra.mxu1 %v24818_v49  ;;  %22582 = vmatprep.subr.mxu1 %v25117_v62  ;;  %v17249_v42 = vpop.f32.mrf.mxu1 }
 0x5a9   : > { %v16813_v40 = vadd.f32 %v16812_v24, %v16731_v18  ;;  %v16903_v15 = vadd.f32 %v22322_v44, %v16820_v6  ;;  %22580 = vmatmul.mubr.f32.vlgmr.msra.gmra.mxu0 %v24780_v51  ;;  %22583 = vmatpush3.msra.mxu1 %v25117_v62 }
 0x5aa   : > { %22584 = vmatprep.subr.mxu1 %v25114_v41  ;;  %22586 = vmatprep.mubr.f32.mxu1 %v24772_v9 }
 0x5ab   : > { %v16895_v53 = vadd.f32 %v16894_v32, %v16813_v40  ;;  %22585 = vmatpush3.msra.mxu1 %v25114_v41 }
 0x5ac   : > { %v22329_v38 = vpop.f32.mrf.mxu0  ;;  %v22364_v3 = vpop.f32.mrf.mxu1  ;;  %22587 = vmatmul.mubr.f32.vlgmr.msra.gmra.mxu1 %v24780_v51 }
 0x5ad   : > { %v16986_v49 = vadd.f32 %v22329_v38, %v16903_v15 }
 0x5ae   : > { %v16979_v1 = vpop.f32.mrf.mxu0  ;;  %v17413_v50 = vpop.f32.mrf.mxu1 }
 0x5af   : > { %v16980_v8 = vadd.f32 %v16979_v1, %v16895_v53  ;;  %v17065_v14 = vadd.f32 %v22336_v43, %v16986_v49 }
 0x5b1   : > { %v25150_v37 = vmul.f32 %v17065_v14, %v17065_v14  ;;  %v17059_v47 = vadd.f32 %v17058_v26, %v16980_v8 }
 0x5b2   : > { %v22343_v13 = vpop.f32.mrf.mxu0  ;;  %v22378_v22 = vpop.f32.mrf.mxu1 }
 0x5b3   : > { %v25152_v20 = vmul.f32 %v17059_v47, %v17059_v47  ;;  %17074 = vrot.lane.b32.xlu0 %v25150_v37, %s23142_s11  ;;  %v17256_v57 = vadd.f32 %v22350_v28, %v22343_v13 }
 0x5b4   : > { %v17158_v9 = vpop.f32.mrf.mxu0  ;;  %v17577_v51 = vpop.f32.mrf.mxu1 }
 0x5b5   : > { %17072 = vrot.lane.b32.xlu1 %v25152_v20, %s23142_s11  ;;  %v17250_v12 = vadd.f32 %v17249_v42, %v17158_v9 }
 0x5b8   : > { %v22357_v19 = vpop.f32.mrf.mxu0  ;;  %v22392_v21 = vpop.f32.mrf.mxu1 }
 0x5b9   : > { %v17339_v41 = vadd.f32 %v22357_v19, %v17256_v57 }
 0x5ba   : > { %v17331_v17 = vpop.f32.mrf.mxu0  ;;  %v17768_v31 = vpop.f32.mrf.mxu1 }
 0x5bb   : > { %v17332_v2 = vadd.f32 %v17331_v17, %v17250_v12  ;;  %v17422_v48 = vadd.f32 %v22364_v3, %v17339_v41 }
 0x5bd   : > { %v17414_v58 = vadd.f32 %v17413_v50, %v17332_v2 }
 0x5be   : > { %v22371_v59 = vpop.f32.mrf.mxu0  ;;  %v22406_v7 = vpop.f32.mrf.mxu1 }
 0x5bf   : > { %v17505_v11 = vadd.f32 %v22371_v59, %v17422_v48 }
 0x5c0   : > { %v17498_v33 = vpop.f32.mrf.mxu0  ;;  %v17932_v55 = vpop.f32.mrf.mxu1 }
 0x5c1   : > { %v17499_v62 = vadd.f32 %v17498_v33, %v17414_v58  ;;  %v17584_v4 = vadd.f32 %v22378_v22, %v17505_v11 }
 0x5c3   : > { %v25158_v25 = vmul.f32 %v17584_v4, %v17584_v4  ;;  %v17578_v46 = vadd.f32 %v17577_v51, %v17499_v62  ;;  %v22385_v30 = vpop.f32.mrf.mxu0 }
 0x5c4   : > { %v17775_v29 = vadd.f32 %v22392_v21, %v22385_v30 }
 0x5c5   : > { %v25160_v0 = vmul.f32 %v17578_v46, %v17578_v46  ;;  %v17677_v63 = vpop.f32.mrf.mxu0  ;;  %17593 = vrot.lane.b32.xlu0 %v25158_v25, %s23142_s11  ;;  %v22420_v10 = vpop.f32.mrf.mxu1 }
 0x5c6   : > { %v17769_v44 = vadd.f32 %v17768_v31, %v17677_v63 }
 0x5c7   : > { %v22399_v45 = vpop.f32.mrf.mxu0  ;;  %17591 = vrot.lane.b32.xlu1 %v25160_v0, %s23142_s11  ;;  %v18096_v39 = vpop.f32.mrf.mxu1 }
 0x5c8   : > { %v17858_v52 = vadd.f32 %v22399_v45, %v17775_v29 }
 0x5c9   : > { %v17850_v5 = vpop.f32.mrf.mxu0 }
 0x5ca   : > { %v17851_v32 = vadd.f32 %v17850_v5, %v17769_v44  ;;  %v17941_v56 = vadd.f32 %v22406_v7, %v17858_v52 }
 0x5cb   : > { %v22413_v23 = vpop.f32.mrf.mxu0 }
 0x5cc   : > { %v17933_v54 = vadd.f32 %v17932_v55, %v17851_v32  ;;  %v18024_v34 = vadd.f32 %v22413_v23, %v17941_v56 }
 0x5cd   : > { %v18017_v36 = vpop.f32.mrf.mxu0 }
 0x5ce   : > { %v18018_v43 = vadd.f32 %v18017_v36, %v17933_v54  ;;  %v18103_v60 = vadd.f32 %v22420_v10, %v18024_v34 }
 0x5cf   : > { %v22427_v26 = vpop.f32.mrf.mxu0 }
 0x5d0   : > { %v25166_v27 = vmul.f32 %v18103_v60, %v18103_v60  ;;  %v18097_v18 = vadd.f32 %v18096_v39, %v18018_v43 }
 0x5d1   : > { %v18234_v16 = vpop.f32.mrf.mxu0 }
 0x5d2   : > { %v25168_v28 = vmul.f32 %v18097_v18, %v18097_v18  ;;  %18112 = vrot.lane.b32.xlu0 %v25166_v27, %s23142_s11 }
 0x5d3   : > { %v22441_v6 = vpop.f32.mrf.mxu0 }
 0x5d4   : > { %18110 = vrot.lane.b32.xlu1 %v25168_v28, %s23142_s11  ;;  %v22434_v24 = vpop.f32.mrf.mxu1 }
 0x5d5   : > { %v18332_v42 = vadd.f32 %v22434_v24, %v22427_v26  ;;  %v18407_v15 = vpop.f32.mrf.mxu0 }
 0x5d6   : > { %v18325_v40 = vpop.f32.mrf.mxu1 }
 0x5d7   : > { %v18326_v53 = vadd.f32 %v18325_v40, %v18234_v16  ;;  %v18415_v38 = vadd.f32 %v22441_v6, %v18332_v42 }
 0x5d9   : > { %v18408_v3 = vadd.f32 %v18407_v15, %v18326_v53  ;;  %v22448_v49 = vpop.f32.mrf.mxu1 }
 0x5da   : > { %v18498_v1 = vadd.f32 %v22448_v49, %v18415_v38  ;;  %v22455_v50 = vpop.f32.mrf.mxu0 }
 0x5db   : > { %v18489_v8 = vpop.f32.mrf.mxu1 }
 0x5dc   : > { %v18490_v14 = vadd.f32 %v18489_v8, %v18408_v3  ;;  %v18581_v47 = vadd.f32 %v22455_v50, %v18498_v1  ;;  %v18574_v13 = vpop.f32.mrf.mxu0 }
 0x5dd   : > { %v22462_v22 = vpop.f32.mrf.mxu1 }
 0x5de   : > { %v18575_v9 = vadd.f32 %v18574_v13, %v18490_v14  ;;  %v18660_v57 = vadd.f32 %v22462_v22, %v18581_v47 }
 0x5df   : > { %v18653_v51 = vpop.f32.mrf.mxu1 }
 0x5e0   : > { %v25174_v12 = vmul.f32 %v18660_v57, %v18660_v57  ;;  %v18654_v19 = vadd.f32 %v18653_v51, %v18575_v9 }
 0x5e2   : > { %v25176_v41 = vmul.f32 %v18654_v19, %v18654_v19  ;;  %18669 = vrot.lane.b32.xlu0 %v25174_v12, %s23142_s11 }
 0x5e4   : > { %18667 = vrot.lane.b32.xlu1 %v25176_v41, %s23142_s11 }
 0x5f9   : > { %v22469_v21 = vpop.f32.mrf.mxu0 }
 0x5fb   : > { %v18751_v17 = vpop.f32.mrf.mxu0 }
 0x5fe   : > { %v22483_v2 = vpop.f32.mrf.mxu0 }
 0x600   : > { %v18924_v48 = vpop.f32.mrf.mxu0 }
 0x601   : > { %v22476_v58 = vpop.f32.mrf.mxu1 }
 0x602   : > { %v18849_v31 = vadd.f32 %v22476_v58, %v22469_v21 }
 0x603   : > { %v18842_v59 = vpop.f32.mrf.mxu1 }
 0x604   : > { %v18843_v11 = vadd.f32 %v18842_v59, %v18751_v17  ;;  %v18932_v33 = vadd.f32 %v22483_v2, %v18849_v31  ;;  %v22497_v62 = vpop.f32.mrf.mxu0 }
 0x606   : > { %v18925_v4 = vadd.f32 %v18924_v48, %v18843_v11  ;;  %v22490_v7 = vpop.f32.mrf.mxu1  ;;  %v19091_v29 = vpop.f32.mrf.mxu0 }
 0x607   : > { %v19015_v46 = vadd.f32 %v22490_v7, %v18932_v33 }
 0x608   : > { %v19006_v30 = vpop.f32.mrf.mxu1 }
 0x609   : > { %v19007_v63 = vadd.f32 %v19006_v30, %v18925_v4  ;;  %v19098_v55 = vadd.f32 %v22497_v62, %v19015_v46 }
 0x60a   : > { %v22504_v44 = vpop.f32.mrf.mxu1 }
 0x60b   : > { %v19092_v45 = vadd.f32 %v19091_v29, %v19007_v63  ;;  %v19177_v52 = vadd.f32 %v22504_v44, %v19098_v55 }
 0x60c   : > { %v19170_v5 = vpop.f32.mrf.mxu1 }
 0x60d   : > { %v25182_v10 = vmul.f32 %v19177_v52, %v19177_v52  ;;  %v19171_v32 = vadd.f32 %v19170_v5, %v19092_v45 }
 0x60f   : > { %v25184_v56 = vmul.f32 %v19171_v32, %v19171_v32  ;;  %19186 = vrot.lane.b32.xlu0 %v25182_v10, %s23142_s11 }
 0x611   : > { %19184 = vrot.lane.b32.xlu1 %v25184_v56, %s23142_s11 }
 0x616   : > { %v16558_v26 = vpop.permute.xlu0 %16557 }
 0x617   : > { %v16556_v24 = vpop.permute.xlu1 %16555  ;;  %v16562_v51 = vadd.f32 %v16558_v26, %v25126_v61 }
 0x618   : > { %v16561_v58 = vadd.f32 %v16556_v24, %v25129_v35 }
 0x625   : > { %v17075_v1 = vpop.permute.xlu0 %17074 }
 0x626   : > { %v17079_v19 = vadd.f32 %v17075_v1, %v25150_v37 }
 0x627   : > { %v17073_v47 = vpop.permute.xlu1 %17072 }
 0x628   : > { %v17078_v2 = vadd.f32 %v17073_v47, %v25152_v20  ;;  %v17081_v31 = vadd.f32 %v17079_v19, %v16562_v51 }
 0x629   : > { %v22511_v23 = vpop.f32.mrf.mxu0 }
 0x62a   : > { %v17080_v37 = vadd.f32 %v17078_v2, %v16561_v58 }
 0x62b   : > { %v19270_v54 = vpop.f32.mrf.mxu0 }
 0x62e   : > { %v22525_v34 = vpop.f32.mrf.mxu0 }
 0x630   : > { %v19443_v36 = vpop.f32.mrf.mxu0 }
 0x631   : > { %v22518_v39 = vpop.f32.mrf.mxu1 }
 0x632   : > { %v19368_v43 = vadd.f32 %v22518_v39, %v22511_v23 }
 0x633   : > { %v19361_v60 = vpop.f32.mrf.mxu1 }
 0x634   : > { %v19362_v18 = vadd.f32 %v19361_v60, %v19270_v54  ;;  %v19451_v16 = vadd.f32 %v22525_v34, %v19368_v43  ;;  %v22539_v6 = vpop.f32.mrf.mxu0 }
 0x636   : > { %v19444_v42 = vadd.f32 %v19443_v36, %v19362_v18  ;;  %v22532_v40 = vpop.f32.mrf.mxu1  ;;  %v19610_v38 = vpop.f32.mrf.mxu0 }
 0x637   : > { %v19534_v15 = vadd.f32 %v22532_v40, %v19451_v16  ;;  %v17594_v57 = vpop.permute.xlu0 %17593 }
 0x638   : > { %v19525_v53 = vpop.f32.mrf.mxu1  ;;  %v17598_v48 = vadd.f32 %v17594_v57, %v25158_v25 }
 0x639   : > { %v19526_v3 = vadd.f32 %v19525_v53, %v19444_v42  ;;  %v19617_v49 = vadd.f32 %v22539_v6, %v19534_v15  ;;  %v17592_v17 = vpop.permute.xlu1 %17591 }
 0x63a   : > { %v22546_v50 = vpop.f32.mrf.mxu1  ;;  %v17597_v61 = vadd.f32 %v17592_v17, %v25160_v0  ;;  %v17600_v11 = vadd.f32 %v17598_v48, %v17081_v31 }
 0x63b   : > { %v19611_v8 = vadd.f32 %v19610_v38, %v19526_v3  ;;  %v19696_v14 = vadd.f32 %v22546_v50, %v19617_v49 }
 0x63c   : > { %v19689_v13 = vpop.f32.mrf.mxu1  ;;  %v17599_v4 = vadd.f32 %v17597_v61, %v17080_v37 }
 0x63d   : > { %v25190_v22 = vmul.f32 %v19696_v14, %v19696_v14  ;;  %v19690_v9 = vadd.f32 %v19689_v13, %v19611_v8 }
 0x63f   : > { %v25194_v21 = vmul.f32 %v19690_v9, %v19690_v9  ;;  %19705 = vrot.lane.b32.xlu0 %v25190_v22, %s23142_s11 }
 0x641   : > { %19703 = vrot.lane.b32.xlu1 %v25194_v21, %s23142_s11 }
 0x644   : > { %v18113_v59 = vpop.permute.xlu0 %18112 }
 0x645   : > { %v18117_v33 = vadd.f32 %v18113_v59, %v25166_v27 }
 0x646   : > { %v18111_v62 = vpop.permute.xlu1 %18110 }
 0x647   : > { %v18119_v7 = vadd.f32 %v18117_v33, %v17600_v11  ;;  %v18116_v20 = vadd.f32 %v18111_v62, %v25168_v28 }
 0x649   : > { %v20559_v46 = vadd.f32 -0.225, %v18119_v7  ;;  %v18139_v25 = vmul.f32 1.0404, %v18119_v7  ;;  %v18118_v30 = vadd.f32 %v18116_v20, %v17599_v4 }
 0x64b   : > { %v20561_v29 = vmul.f32 -4.0, %v20559_v46  ;;  %v20563_v63 = vadd.f32 -0.225, %v18139_v25  ;;  %v20558_v55 = vadd.f32 -0.225, %v18118_v30 }
 0x64c   : > { %v18138_v35 = vmul.f32 1.0404, %v18118_v30 }
 0x64d   : > { %v18128_v44 = vmul.f32 1.442695, %v20561_v29  ;;  %v20565_v45 = vmul.f32 -4.0, %v20563_v63  ;;  %v20560_v0 = vmul.f32 -4.0, %v20558_v55 }
 0x64e   : > { %v20562_v52 = vadd.f32 -0.225, %v18138_v35 }
 0x64f   : > { %22740 = vpow2.f32 %v18128_v44  ;;  %v18148_v5 = vmul.f32 1.442695, %v20565_v45  ;;  %v18126_v32 = vmul.f32 1.442695, %v20560_v0 }
 0x650   : > { %v20564_v27 = vmul.f32 -4.0, %v20562_v52 }
 0x651   : > { %22742 = vpow2.f32 %v18148_v5 }
 0x652   : > { %22744 = vpow2.f32 %v18126_v32  ;;  %v18146_v23 = vmul.f32 1.442695, %v20564_v27 }
 0x654   : > { %22746 = vpow2.f32 %v18146_v23 }
 0x65b   : > { %v22553_v28 = vpop.f32.mrf.mxu0 }
 0x65c   : > { %v22741_v54 = vpop.eup %22740 }
 0x65d   : > { %v18131_v34 = vadd.f32 1.0, %v22741_v54  ;;  %v19789_v36 = vpop.f32.mrf.mxu0 }
 0x65e   : > { %v22743_v39 = vpop.eup %22742 }
 0x65f   : > { %v22745_v43 = vpop.eup %22744  ;;  %22748 = vrcp.f32 %v18131_v34  ;;  %v18151_v60 = vadd.f32 1.0, %v22743_v39 }
 0x660   : > { %v18130_v26 = vadd.f32 1.0, %v22745_v43  ;;  %v22567_v16 = vpop.f32.mrf.mxu0 }
 0x661   : > { %v22747_v18 = vpop.eup %22746  ;;  %22750 = vrcp.f32 %v18151_v60 }
 0x662   : > { %22752 = vrcp.f32 %v18130_v26  ;;  %v18150_v6 = vadd.f32 1.0, %v22747_v18  ;;  %v19962_v15 = vpop.f32.mrf.mxu0 }
 0x663   : > { %v22560_v24 = vpop.f32.mrf.mxu1 }
 0x664   : > { %22754 = vrcp.f32 %v18150_v6  ;;  %v19887_v42 = vadd.f32 %v22560_v24, %v22553_v28 }
 0x665   : > { %v19880_v40 = vpop.f32.mrf.mxu1 }
 0x666   : > { %v19970_v53 = vadd.f32 %v22567_v16, %v19887_v42  ;;  %v19881_v38 = vadd.f32 %v19880_v40, %v19789_v36 }
 0x668   : > { %v19963_v3 = vadd.f32 %v19962_v15, %v19881_v38  ;;  %v22574_v49 = vpop.f32.mrf.mxu1 }
 0x669   : > { %v20053_v1 = vadd.f32 %v22574_v49, %v19970_v53  ;;  %v22581_v50 = vpop.f32.mrf.mxu0 }
 0x66a   : > { %v20044_v8 = vpop.f32.mrf.mxu1 }
 0x66b   : > { %v20136_v14 = vadd.f32 %v22581_v50, %v20053_v1  ;;  %v20045_v47 = vadd.f32 %v20044_v8, %v19963_v3  ;;  %v20129_v9 = vpop.f32.mrf.mxu0 }
 0x66c   : > { %v22749_v13 = vpop.eup %22748  ;;  %v22588_v57 = vpop.f32.mrf.mxu1 }
 0x66d   : > { %v20130_v51 = vadd.f32 %v20129_v9, %v20045_v47  ;;  %v20215_v19 = vadd.f32 %v22588_v57, %v20136_v14  ;;  %18137 = vst.msk [vmem:[%s25207_s25 + $0x8] sm:$0xff] %vm559_vm0, %v22749_v13 }
 0x66e   : > { %v22751_v17 = vpop.eup %22750  ;;  %v20208_v2 = vpop.f32.mrf.mxu1 }
 0x66f   : > { %v22753_v48 = vpop.eup %22752  ;;  %v25211_v58 = vmul.f32 %v20215_v19, %v20215_v19  ;;  %v20209_v31 = vadd.f32 %v20208_v2, %v20130_v51  ;;  %18157 = vst.msk [vmem:[%s539_s29 + $0x8] sm:$0xff] %vm559_vm0, %v22751_v17 }
 0x670   : > { %18136 = vst.msk [vmem:[%s25207_s25] sm:$0xff] %vm559_vm0, %v22753_v48 }
 0x671   : > { %v22755_v61 = vpop.eup %22754  ;;  %v25217_v59 = vmul.f32 %v20209_v31, %v20209_v31  ;;  %20224 = vrot.lane.b32.xlu0 %v25211_v58, %s23142_s11 }
 0x672   : > { %18156 = vst.msk [vmem:[%s539_s29] sm:$0xff] %vm559_vm0, %v22755_v61 }
 0x673   : > { %20222 = vrot.lane.b32.xlu1 %v25217_v59, %s23142_s11 }
 0x674   : > { %22987 = shalt.err (!%p22984_p1)
}
 0x675   : > { %s22988_s12 = scalar_lea.hbm %s25232_s24, 256  ;;  %s22992_s29 = scalar_lea.hbm %s25373_s10, 512 }
 0x676   : > { %p22989_p3 = scmp.ne.s32.totalorder %s25232_s24, %s22988_s12  ;;  %p22993_p6 = scmp.lt.s32.totalorder %s25232_s24, %s25373_s10 }
 0x677   : > { %p22994_p10 = scmp.lt.s32.totalorder %s22992_s29, %s22988_s12 }
 0x678   : > { %p22990_p5 = pnand %p22989_p3, %p23351_p13 }
 0x679   : > { %p22995_p11 = por %p22994_p10, %p22993_p6 }
 0x67a   : > { %p22991_p7 = pneg %p22990_p5 }
 0x67c   : > { %p22996_p12 = pnand %p22995_p11, %p22991_p7 }
 0x67e   : > { %22999 = shalt.err (!%p22996_p12)
}
 0x67f   : > { %s23144_s16 = smov 128   ;;  %s25266_s23 = scalar_lea.hbm %s25372_s9, %s25226_s3 }
 0x680   : > { %22620 = dma.vmem_to_hbm [thread:$0]  (%p23351_p13), %s25234_s26, 256, %s25232_s24, %s25236_s27, %s23144_s16, %s23144_s16, %s23138_s6  }
 0x681   : > { %s20276_s30 = sshll.u32 %s25207_s25, 4  ;;  %s20251_s12 = scalar_lea.sflag [#allocation5], %s23384_s4  ;;  %s25269_s30 = int_to_ptr.vmem [resolvable:$true] %s20276_s30 }
 0x682   : > { %s23000_s1 = scalar_lea.vmem %s25269_s30, 256  ;;  %s23145_s11 = smov [#allocation17]  }
 0x683   : > { %p23001_p0 = scmp.ne.s32.totalorder %s25269_s30, %s23000_s1  ;;  %s23004_s29 = sshll.u32 %s23145_s11, 4  ;;  %s23005_s29 = int_to_ptr.vmem [resolvable:$false] %s23004_s29 }
 0x684   : > { %s23006_s24 = scalar_lea.vmem %s23005_s29, 512  ;;  %p23007_p9 = scmp.lt.s32.totalorder %s25269_s30, %s23005_s29 }
 0x685   : > { %p23002_p8 = pnand %p23001_p0, %p23351_p13  ;;  %p23008_p1 = scmp.lt.s32.totalorder %s23006_s24, %s23000_s1 }
 0x687   : > { %p23003_p2 = pneg %p23002_p8  ;;  %p23009_p3 = por %p23008_p1, %p23007_p9 }
 0x689   : > { %p23010_p5 = pnand %p23009_p3, %p23003_p2 }
 0x68b   : > { %23013 = shalt.err (!%p23010_p5)
}
 0x68c   : > { %s23014_s25 = scalar_lea.hbm %s25266_s23, 256  ;;  %s23018_s2 = scalar_lea.hbm %s25372_s9, 512 }
 0x68d   : > { %p23015_p7 = scmp.ne.s32.totalorder %s25266_s23, %s23014_s25  ;;  %p23019_p11 = scmp.lt.s32.totalorder %s25266_s23, %s25372_s9 }
 0x68e   : > { %p23020_p12 = scmp.lt.s32.totalorder %s23018_s2, %s23014_s25 }
 0x68f   : > { %p23016_p6 = pnand %p23015_p7, %p23351_p13 }
 0x690   : > { %p23021_p0 = por %p23020_p12, %p23019_p11 }
 0x691   : > { %p23017_p10 = pneg %p23016_p6 }
 0x693   : > { %p23022_p8 = pnand %p23021_p0, %p23017_p10 }
 0x695   : > { %23025 = shalt.err (!%p23022_p8)
}
 0x696   : > { %22619 = dma.vmem_to_hbm [thread:$0]  (%p23351_p13), %s25269_s30, 256, %s25266_s23, %s20251_s12, %s23144_s16, %s23144_s16, %s23138_s6   ;;  %v18670_v37 = vpop.permute.xlu0 %18669  ;;  %v18668_v11 = vpop.permute.xlu1 %18667 }
 0x697   : > { %v18674_v46 = vadd.f32 %v18670_v37, %v25174_v12  ;;  %v18673_v29 = vadd.f32 %v18668_v11, %v25176_v41  ;;  %s546_s20 = scalar_lea.vmem [#allocation20], %s23387_s8  ;;  %s25419_s1 = sld [smem:[#allocation36_spill]] }
 0x698   : > { %s20312_s23 = sshll.u32 %s546_s20, 4  ;;  %s23146_s8 = smov [#allocation20]   ;;  %s25311_s23 = int_to_ptr.vmem [resolvable:$true] %s20312_s23 }
 0x699   : > { %s23026_s29 = scalar_lea.vmem %s25311_s23, 256  ;;  %s23030_s24 = sshll.u32 %s23146_s8, 4  ;;  %s23031_s24 = int_to_ptr.vmem [resolvable:$false] %s23030_s24 }
 0x69a   : > { %v19187_v33 = vpop.permute.xlu0 %19186  ;;  %v19185_v62 = vpop.permute.xlu1 %19184  ;;  %p23027_p2 = scmp.ne.s32.totalorder %s25311_s23, %s23026_s29  ;;  %s23032_s25 = scalar_lea.vmem %s23031_s24, 512 }
 0x69b   : > { %v19191_v7 = vadd.f32 %v19187_v33, %v25182_v10  ;;  %v19190_v25 = vadd.f32 %v19185_v62, %v25184_v56  ;;  %p23033_p3 = scmp.lt.s32.totalorder %s25311_s23, %s23031_s24  ;;  %p23034_p5 = scmp.lt.s32.totalorder %s23032_s25, %s23026_s29 }
 0x69c   : > { %p23028_p9 = pnand %p23027_p2, %p23351_p13 }
 0x69d   : > { %v19193_v63 = vadd.f32 %v19191_v7, %v18674_v46  ;;  %v19192_v44 = vadd.f32 %v19190_v25, %v18673_v29  ;;  %s25309_s11 = scalar_lea.hbm %s25419_s1, %s25226_s3  ;;  %p23035_p7 = por %p23034_p5, %p23033_p3 }
 0x69e   : > { %p23029_p1 = pneg %p23028_p9 }
 0x6a0   : > { %p23036_p6 = pnand %p23035_p7, %p23029_p1 }
 0x6b1   : > { %v19706_v4 = vpop.permute.xlu0 %19705 }
 0x6b2   : > { %v19710_v30 = vadd.f32 %v19706_v4, %v25190_v22 }
 0x6b3   : > { %v19704_v20 = vpop.permute.xlu1 %19703 }
 0x6b4   : > { %v19709_v55 = vadd.f32 %v19704_v20, %v25194_v21  ;;  %v19712_v45 = vadd.f32 %v19710_v30, %v19193_v63 }
 0x6b6   : > { %v19711_v5 = vadd.f32 %v19709_v55, %v19192_v44 }
 0x6e3   : > { %v20225_v35 = vpop.permute.xlu0 %20224 }
 0x6e4   : > { %v20229_v0 = vadd.f32 %v20225_v35, %v25211_v58 }
 0x6e5   : > { %v20223_v52 = vpop.permute.xlu1 %20222 }
 0x6e6   : > { %v20231_v10 = vadd.f32 %v20229_v0, %v19712_v45  ;;  %v20228_v32 = vadd.f32 %v20223_v52, %v25217_v59 }
 0x6e8   : > { %v20567_v12 = vadd.f32 -0.225, %v20231_v10  ;;  %v20230_v56 = vadd.f32 %v20228_v32, %v19711_v5 }
 0x6ea   : > { %v20569_v27 = vmul.f32 -4.0, %v20567_v12  ;;  %v20566_v22 = vadd.f32 -0.225, %v20230_v56 }
 0x6ec   : > { %v20240_v41 = vmul.f32 1.442695, %v20569_v27  ;;  %v20568_v23 = vmul.f32 -4.0, %v20566_v22 }
 0x6ee   : > { %22756 = vpow2.f32 %v20240_v41  ;;  %v20238_v21 = vmul.f32 1.442695, %v20568_v23 }
 0x6f0   : > { %22758 = vpow2.f32 %v20238_v21 }
 0x6fb   : > { %v22757_v28 = vpop.eup %22756 }
 0x6fc   : > { %v20243_v54 = vadd.f32 1.0, %v22757_v28 }
 0x6fd   : > { %v22759_v34 = vpop.eup %22758 }
 0x6fe   : > { %22760 = vrcp.f32 %v20243_v54  ;;  %v20242_v36 = vadd.f32 1.0, %v22759_v34 }
 0x700   : > { %22762 = vrcp.f32 %v20242_v36 }
 0x70b   : > { %v22761_v39 = vpop.eup %22760 }
 0x70c   : > { %20249 = vst.msk [vmem:[%s546_s20 + $0x8] sm:$0xff] %vm559_vm0, %v22761_v39 }
 0x70d   : > { %v22763_v43 = vpop.eup %22762 }
 0x70e   : > { %20248 = vst.msk [vmem:[%s546_s20] sm:$0xff] %vm559_vm0, %v22763_v43 }
 0x70f   : > { %23039 = shalt.err (!%p23036_p6)
}
 0x710   : > { %s23040_s3 = scalar_lea.hbm %s25309_s11, 256  ;;  %s23044_s2 = scalar_lea.hbm %s25419_s1, 512 }
 0x711   : > { %p23041_p10 = scmp.ne.s32.totalorder %s25309_s11, %s23040_s3  ;;  %p23045_p0 = scmp.lt.s32.totalorder %s25309_s11, %s25419_s1 }
 0x712   : > { %p23046_p8 = scmp.lt.s32.totalorder %s23044_s2, %s23040_s3 }
 0x713   : > { %p23042_p11 = pnand %p23041_p10, %p23351_p13 }
 0x714   : > { %p23047_p2 = por %p23046_p8, %p23045_p0 }
 0x715   : > { %p23043_p12 = pneg %p23042_p11 }
 0x717   : > { %p23048_p9 = pnand %p23047_p2, %p23043_p12 }
 0x719   : > { %23051 = shalt.err (!%p23048_p9)
}
 0x71a   : > { %22621 = dma.vmem_to_hbm [thread:$0]  (%p23351_p13), %s25311_s23, 256, %s25309_s11, %s25236_s27, %s23144_s16, %s23144_s16, %s23138_s6  }
 0x71b PF: > { %s20327_s20 = sand.u32 1, %s23106_s17   ;;  %p25420_p1 = scmp.ge.s32.totalorder %s23126_s22, 2 }
 0x71c   : > { %s20328_s30 = scalar_lea.sflag [#allocation5], %s20327_s20 }
 0x71d   : > { %p22652_p3 = pnand %p25420_p1, %p23359_p4 }
 0x71f   : > { %p22653_p5 = pneg %p22652_p3 }
 0x721   : > { %23097 = dma.done.wait (%p22653_p5), %s20328_s30, 256  }
 0x722   : > { %23099 = vsyncadd (%p22653_p5), %s20328_s30, 4294967040  ;;  %s25421_s28 = sadd.s32 4294967294, %s23126_s22  }
 0x723   : > { %s20336_s12 = sand.u32 1, %s25421_s28  }
 0x724   : > { %s20337_s29 = scalar_lea.sflag [#allocation19], %s20336_s12 }
 0x725   : > { %23101 = dma.done.wait (%p22653_p5), %s20337_s29, 512  }
 0x726   : > { %23103 = vsyncadd (%p22653_p5), %s20337_s29, 4294966784  ;;  %s35_s22 = sadd.s32 1, %s23126_s22   ;;  %s25422_s14 = sld [smem:[#allocation28_spill]] }
 0x727   : > { %p32_p13 = scmp.ge.s32.totalorder %s35_s22, 4   ;;  %s25423_s17 = smov %s23110_s18 }
 0x728   : > { %s25424_s18 = smov %s23114_s19  ;;  %s25425_s19 = smov %s23357_s15 }
 0x729   : > { %s25426_s20 = smov %s23122_s21  ;;  %34 = sbr.rel (!%p32_p13) target bundleno = 21 (0x15), region = 194 }
 0x72c   : > { %s25427_s21 = smov %s25422_s14 }
 0x72e   :  { %20351 = vsyncpa [#allocation4], 1 }
 0x72f   :  { %20353 = vsyncpa [#allocation4 + $0x1], 1 }
 0x730   :  { %20354 = vsyncpa [#allocation7], 1 }
 0x731   :  { %20355 = vsyncpa [#allocation10], 1 }
 0x732   :  { %20356 = vsyncpa [#allocation13], 1 }
 0x733   :  { %20357 = vsyncpa [#allocation16], 1 }
 0x734   :  { %20358 = vsyncpa [#allocation5], 1 }
 0x735   :  { %20360 = vsyncpa [#allocation5 + $0x1], 1 }
 0x736   :  { %20361 = vsyncpa [#allocation19], 1 }
 0x737   :  { %20363 = vsyncpa [#allocation19 + $0x1], 1 }

</bundles_post_ra>
